<compile_context>
chip_gen: v7x
topology: tpu7x:2x2x1
jax: 0.10.0
libtpu: 0.0.40
codegen_flags: <defaults>
</compile_context>

<pallas_src>
import functools

import jax
import jax.numpy as jnp
from jax import lax
from jax.experimental import pallas as pl
from jax.experimental.pallas import tpu as pltpu


# ---------------------------------------------------------------------------
# Fused kernel: one grid step = one batch element (whole image in VMEM).
# ---------------------------------------------------------------------------
def _bottleneck_kernel(x_ref, w1_ref, s1_ref, b1_ref,
                       w2_ref, s2_ref, b2_ref,
                       w3_ref, s3_ref, b3_ref,
                       o_ref, *, img_w):
    """Shapes (per block):
       x_ref : (1, H*W, Cin)     f32   (also the identity residual)
       w1_ref: (Cin, width)      bf16
       w2_ref: (9, width, width) bf16  (ky*3+kx major; matches (dy, dx) order)
       w3_ref: (width, Cout)     bf16
       s*/b* : (1, C)            f32   folded BatchNorm scale / bias
       o_ref : (1, H*W, Cout)    f32
    """
    hw = x_ref.shape[1]
    width = w1_ref.shape[1]

    x = x_ref[0]                                            # (HW, Cin) f32

    # ---- conv1 (1x1) + bn1 + relu ---------------------------------------
    y1 = jnp.dot(x.astype(jnp.bfloat16), w1_ref[...],
                 preferred_element_type=jnp.float32)
    y1 = jnp.maximum(y1 * s1_ref[...] + b1_ref[...], 0.0)   # (HW, width) f32

    # ---- conv2 (3x3, stride=1, padding=1) + bn2 + relu --------------------
    # Zero-pad a row halo on both ends of the flattened image so each of the
    # 9 shifted windows is a plain static slice; columns that would wrap
    # across image rows are masked to zero (== Conv2d zero padding).
    pad_rows = ((img_w + 1 + 15) // 16) * 16        # >= W+1, bf16-tile aligned
    y1b = y1.astype(jnp.bfloat16)
    zpad = jnp.zeros((pad_rows, width), jnp.bfloat16)
    y1_pad = jnp.concatenate([zpad, y1b, zpad], axis=0)      # (HW+2*pad, width)

    col = lax.broadcasted_iota(jnp.int32, (hw, 1), 0) % img_w   # w index / row
    acc2 = jnp.zeros((hw, width), jnp.float32)
    for dy in range(3):
        for dx in range(3):
            start = pad_rows + (dy - 1) * img_w + (dx - 1)
            win = y1_pad[start:start + hw]                   # (HW, width) bf16
            ok = (col + (dx - 1) >= 0) & (col + (dx - 1) < img_w)
            win = jnp.where(ok, win, 0)
            acc2 = acc2 + jnp.dot(win, w2_ref[dy * 3 + dx],
                                  preferred_element_type=jnp.float32)
    y2 = jnp.maximum(acc2 * s2_ref[...] + b2_ref[...], 0.0)  # (HW, width) f32

    # ---- conv3 (1x1) + bn3 + identity residual + relu ---------------------
    y3 = jnp.dot(y2.astype(jnp.bfloat16), w3_ref[...],
                 preferred_element_type=jnp.float32)
    y3 = jnp.maximum(y3 * s3_ref[...] + b3_ref[...] + x, 0.0)

    o_ref[0] = y3.astype(o_ref.dtype)


# ---------------------------------------------------------------------------
# Parameter initialization (deterministic; BN folded to scale/bias).
#   conv1: 1x1 (in_channel -> width)       bn1: width
#   conv2: 3x3 pad=1 (width -> width)      bn2: width
#   conv3: 1x1 (width -> out_channel*4)    bn3: out_channel*4
# stride=1, groups=1, width_per_group=64, downsample=None (identity shortcut).
# NOTE: w2 is stored (kh, kw, Cin, Cout); nn.Conv2d stores (Cout, Cin, kh, kw).
# ---------------------------------------------------------------------------
def init_params(key, in_channel, out_channel, groups=1, width_per_group=64):
    expansion = 4
    width = int(out_channel * (width_per_group / 64.0)) * groups
    cout = out_channel * expansion
    ks = jax.random.split(key, 15)

    def bn_fold(kg, kb, km, kv, c):
        gamma = 1.0 + 0.1 * jax.random.normal(kg, (c,), jnp.float32)
        beta = 0.1 * jax.random.normal(kb, (c,), jnp.float32)
        mean = 0.1 * jax.random.normal(km, (c,), jnp.float32)
        var = jnp.abs(jax.random.normal(kv, (c,), jnp.float32)) + 0.5
        eps = 1e-5
        scale = gamma / jnp.sqrt(var + eps)
        bias = beta - mean * scale
        return scale, bias

    params = {
        "w1": 0.1 * jax.random.normal(ks[0], (in_channel, width), jnp.float32),
        "w2": 0.1 * jax.random.normal(ks[1], (3, 3, width, width), jnp.float32),
        "w3": 0.1 * jax.random.normal(ks[2], (width, cout), jnp.float32),
    }
    params["s1"], params["b1"] = bn_fold(ks[3], ks[4], ks[5], ks[6], width)
    params["s2"], params["b2"] = bn_fold(ks[7], ks[8], ks[9], ks[10], width)
    params["s3"], params["b3"] = bn_fold(ks[11], ks[12], ks[13], ks[14], cout)
    return params


# ---------------------------------------------------------------------------
# Forward pass (NCHW in / NCHW out, like the PyTorch module).
# ---------------------------------------------------------------------------
def bottleneck_forward(x_nchw, p):
    N, C, H, W = x_nchw.shape
    width = p["w1"].shape[1]
    cout = p["w3"].shape[1]
    assert C == cout, "identity shortcut requires in_channel == out_channel*4"

    x_nhwc = jnp.transpose(x_nchw, (0, 2, 3, 1)).astype(jnp.float32)
    x_flat = x_nhwc.reshape(N, H * W, C)

    # bf16 MXU operands (weights); BN affine stays f32.
    w1 = p["w1"].astype(jnp.bfloat16)                       # (Cin, width)
    w2 = p["w2"].reshape(9, width, width).astype(jnp.bfloat16)
    w3 = p["w3"].astype(jnp.bfloat16)                       # (width, cout)
    s1 = p["s1"].reshape(1, width); b1 = p["b1"].reshape(1, width)
    s2 = p["s2"].reshape(1, width); b2 = p["b2"].reshape(1, width)
    s3 = p["s3"].reshape(1, cout);  b3 = p["b3"].reshape(1, cout)

    hw = H * W
    flops = 2 * N * hw * (C * width + 9 * width * width + width * cout)
    bytes_accessed = (
        (x_flat.size + N * hw * cout) * 4          # activations in + out (f32)
        + (w1.size + w2.size + w3.size) * 2        # bf16 weights
        + (s1.size + b1.size + s2.size + b2.size + s3.size + b3.size) * 4
    )

    const2 = lambda n: (0, 0)

    out_flat = pl.pallas_call(
        functools.partial(_bottleneck_kernel, img_w=W),
        out_shape=jax.ShapeDtypeStruct((N, hw, cout), jnp.float32),
        grid_spec=pltpu.PrefetchScalarGridSpec(
            num_scalar_prefetch=0,
            grid=(N,),
            in_specs=[
                pl.BlockSpec((1, hw, C), lambda n: (n, 0, 0)),        # x / residual
                pl.BlockSpec((C, width), const2),                     # w1 (resident)
                pl.BlockSpec((1, width), const2),                     # s1
                pl.BlockSpec((1, width), const2),                     # b1
                pl.BlockSpec((9, width, width), lambda n: (0, 0, 0)), # w2 (resident)
                pl.BlockSpec((1, width), const2),                     # s2
                pl.BlockSpec((1, width), const2),                     # b2
                pl.BlockSpec((width, cout), const2),                  # w3 (resident)
                pl.BlockSpec((1, cout), const2),                      # s3
                pl.BlockSpec((1, cout), const2),                      # b3
            ],
            out_specs=pl.BlockSpec((1, hw, cout), lambda n: (n, 0, 0)),
        ),
        compiler_params=pltpu.CompilerParams(
            dimension_semantics=("parallel",),   # >=2 grid steps -> both v7x TCs
        ),
        cost_estimate=pl.CostEstimate(
            flops=flops, transcendentals=0, bytes_accessed=bytes_accessed),
    )(x_flat, w1, s1, b1, w2, s2, b2, w3, s3, b3)

    return jnp.transpose(out_flat.reshape(N, H, W, cout), (0, 3, 1, 2))


# ---------------------------------------------------------------------------
# Pure-JAX f32 reference (im2col formulation) for a sanity check.
# ---------------------------------------------------------------------------
def bottleneck_reference(x_nchw, p):
    N, C, H, W = x_nchw.shape
    x = jnp.transpose(x_nchw, (0, 2, 3, 1)).astype(jnp.float32)
    M = N * H * W
    x_flat = x.reshape(M, C)
    width = p["w1"].shape[1]
    cout = p["w3"].shape[1]

    y1 = jnp.maximum(x_flat @ p["w1"] * p["s1"] + p["b1"], 0.0)
    y1_img = y1.reshape(N, H, W, width)
    pad = jnp.pad(y1_img, ((0, 0), (1, 1), (1, 1), (0, 0)))
    cols = [pad[:, dy:dy + H, dx:dx + W, :] for dy in range(3) for dx in range(3)]
    col = jnp.concatenate(cols, axis=-1).reshape(M, 9 * width)
    y2 = jnp.maximum(col @ p["w2"].reshape(9 * width, width) * p["s2"] + p["b2"], 0.0)
    y3 = jnp.maximum(y2 @ p["w3"] * p["s3"] + p["b3"] + x_flat, 0.0)
    return jnp.transpose(y3.reshape(N, H, W, cout), (0, 3, 1, 2))


if __name__ == "__main__":
    key = jax.random.PRNGKey(0)
    k_x, k_p = jax.random.split(key)

    # Small shapes consistent with the module: out_channel=4 -> expansion*4=16,
    # identity shortcut (downsample=None) requires in_channel == 16.
    N, Cin, H, W = 2, 16, 16, 16
    out_channel = 4

    x = jax.random.normal(k_x, (N, Cin, H, W), jnp.float32)
    params = init_params(k_p, in_channel=Cin, out_channel=out_channel)

    out = jax.block_until_ready(bottleneck_forward(x, params))
    ref = jax.block_until_ready(bottleneck_reference(x, params))

    assert out.shape == (N, out_channel * 4, H, W)
    # bf16 MXU operands with f32 accumulation => loose-ish tolerance vs f32 ref.
    assert jnp.allclose(out, ref, rtol=3e-2, atol=3e-2)

    print("KERNEL_OK")
</pallas_src>

<mosaic_0001>
module attributes {stable_mosaic.version = 11 : i64} {
  func.func @_bottleneck_kernel(%arg0: i32, %arg1: memref<1x256x16xf32, #tpu.memory_space<vmem>>, %arg2: memref<16x4xbf16, #tpu.memory_space<vmem>>, %arg3: memref<1x4xf32, #tpu.memory_space<vmem>>, %arg4: memref<1x4xf32, #tpu.memory_space<vmem>>, %arg5: memref<9x4x4xbf16, #tpu.memory_space<vmem>>, %arg6: memref<1x4xf32, #tpu.memory_space<vmem>>, %arg7: memref<1x4xf32, #tpu.memory_space<vmem>>, %arg8: memref<4x16xbf16, #tpu.memory_space<vmem>>, %arg9: memref<1x16xf32, #tpu.memory_space<vmem>>, %arg10: memref<1x16xf32, #tpu.memory_space<vmem>>, %arg11: memref<1x256x16xf32, #tpu.memory_space<vmem>>) attributes {dimension_semantics = [#tpu.dimension_semantics<parallel>], iteration_bounds = array<i64: 2>, scalar_prefetch = 0 : i64, scratch_operands = 0 : i64, tpu.core_type = #tpu.core_type<tc>, window_params = [{transform_indices = @transform_0, window_bounds = array<i64: 1, 256, 16>}, {pipeline_mode = #tpu.pipeline_mode<synchronous>, transform_indices = @transform_1, window_bounds = array<i64: 16, 4>}, {pipeline_mode = #tpu.pipeline_mode<synchronous>, transform_indices = @transform_2, window_bounds = array<i64: 1, 4>}, {pipeline_mode = #tpu.pipeline_mode<synchronous>, transform_indices = @transform_3, window_bounds = array<i64: 1, 4>}, {pipeline_mode = #tpu.pipeline_mode<synchronous>, transform_indices = @transform_4, window_bounds = array<i64: 9, 4, 4>}, {pipeline_mode = #tpu.pipeline_mode<synchronous>, transform_indices = @transform_5, window_bounds = array<i64: 1, 4>}, {pipeline_mode = #tpu.pipeline_mode<synchronous>, transform_indices = @transform_6, window_bounds = array<i64: 1, 4>}, {pipeline_mode = #tpu.pipeline_mode<synchronous>, transform_indices = @transform_7, window_bounds = array<i64: 4, 16>}, {pipeline_mode = #tpu.pipeline_mode<synchronous>, transform_indices = @transform_8, window_bounds = array<i64: 1, 16>}, {pipeline_mode = #tpu.pipeline_mode<synchronous>, transform_indices = @transform_9, window_bounds = array<i64: 1, 16>}, {transform_indices = @transform_10, window_bounds = array<i64: 1, 256, 16>}]} {
    %c0 = arith.constant 0 : index
    %c0_0 = arith.constant 0 : index
    %c0_1 = arith.constant 0 : index
    %0 = vector.load %arg1[%c0, %c0_0, %c0_1] : memref<1x256x16xf32, #tpu.memory_space<vmem>>, vector<1x256x16xf32>
    %1 = vector.shape_cast %0 : vector<1x256x16xf32> to vector<256x16xf32>
    %2 = arith.truncf %1 : vector<256x16xf32> to vector<256x16xbf16>
    %c0_2 = arith.constant 0 : index
    %c0_3 = arith.constant 0 : index
    %3 = vector.load %arg2[%c0_2, %c0_3] : memref<16x4xbf16, #tpu.memory_space<vmem>>, vector<16x4xbf16>
    %cst = arith.constant dense<0.000000e+00> : vector<256x4xf32>
    %4 = tpu.matmul %2, %3, %cst {dimension_numbers = #tpu.dot_dimension_numbers<[1], [0], [0], [1], [0, 0, 1, 1], [], []>} : vector<256x16xbf16>, vector<16x4xbf16>, vector<256x4xf32> -> vector<256x4xf32>
    %c0_4 = arith.constant 0 : index
    %c0_5 = arith.constant 0 : index
    %5 = vector.load %arg3[%c0_4, %c0_5] : memref<1x4xf32, #tpu.memory_space<vmem>>, vector<1x4xf32>
    %6 = vector.broadcast %5 : vector<1x4xf32> to vector<256x4xf32>
    %7 = arith.mulf %4, %6 : vector<256x4xf32>
    %c0_6 = arith.constant 0 : index
    %c0_7 = arith.constant 0 : index
    %8 = vector.load %arg4[%c0_6, %c0_7] : memref<1x4xf32, #tpu.memory_space<vmem>>, vector<1x4xf32>
    %9 = vector.broadcast %8 : vector<1x4xf32> to vector<256x4xf32>
    %10 = arith.addf %7, %9 : vector<256x4xf32>
    %cst_8 = arith.constant 0.000000e+00 : f32
    %11 = vector.broadcast %cst_8 : f32 to vector<256x4xf32>
    %12 = arith.maximumf %10, %11 : vector<256x4xf32>
    %13 = arith.truncf %12 : vector<256x4xf32> to vector<256x4xbf16>
    %cst_9 = arith.constant 0.000000e+00 : bf16
    %14 = vector.broadcast %cst_9 : bf16 to vector<32x4xbf16>
    %15 = tpu.concatenate %14, %13, %14 in 0 : vector<32x4xbf16>, vector<256x4xbf16>, vector<32x4xbf16> -> vector<320x4xbf16>
    %16 = tpu.iota {dimensions = array<i32: 0>} : vector<256x1xi32>
    %c16_i32 = arith.constant 16 : i32
    %c0_i32 = arith.constant 0 : i32
    %17 = arith.cmpi eq, %c16_i32, %c0_i32 : i32
    %c1_i32 = arith.constant 1 : i32
    %18 = arith.select %17, %c1_i32, %c16_i32 : i32
    %19 = vector.broadcast %18 : i32 to vector<256x1xi32>
    %20 = arith.remsi %16, %19 : vector<256x1xi32>
    %c0_i32_10 = arith.constant 0 : i32
    %21 = vector.broadcast %c0_i32_10 : i32 to vector<256x1xi32>
    %22 = arith.cmpi ne, %20, %21 : vector<256x1xi32>
    %c0_i32_11 = arith.constant 0 : i32
    %23 = vector.broadcast %c0_i32_11 : i32 to vector<256x1xi32>
    %24 = arith.cmpi slt, %20, %23 : vector<256x1xi32>
    %c0_i32_12 = arith.constant 0 : i32
    %25 = arith.cmpi slt, %18, %c0_i32_12 : i32
    %26 = vector.broadcast %25 : i1 to vector<256x1xi1>
    %27 = vector.broadcast %26 : vector<256x1xi1> to vector<256x1xi1>
    %28 = arith.xori %24, %27 : vector<256x1xi1>
    %29 = arith.andi %28, %22 : vector<256x1xi1>
    %30 = vector.broadcast %18 : i32 to vector<256x1xi32>
    %31 = arith.addi %20, %30 : vector<256x1xi32>
    %32 = arith.select %29, %31, %20 : vector<256x1xi1>, vector<256x1xi32>
    %cst_13 = arith.constant 0.000000e+00 : f32
    %33 = vector.broadcast %cst_13 : f32 to vector<256x4xf32>
    %34 = vector.extract_strided_slice %15 {offsets = [15, 0], sizes = [256, 4], strides = [1, 1]} : vector<320x4xbf16> to vector<256x4xbf16>
    %c-1_i32 = arith.constant -1 : i32
    %35 = vector.broadcast %c-1_i32 : i32 to vector<256x1xi32>
    %36 = arith.addi %32, %35 : vector<256x1xi32>
    %c0_i32_14 = arith.constant 0 : i32
    %37 = vector.broadcast %c0_i32_14 : i32 to vector<256x1xi32>
    %38 = arith.cmpi sge, %36, %37 : vector<256x1xi32>
    %c-1_i32_15 = arith.constant -1 : i32
    %39 = vector.broadcast %c-1_i32_15 : i32 to vector<256x1xi32>
    %40 = arith.addi %32, %39 : vector<256x1xi32>
    %c16_i32_16 = arith.constant 16 : i32
    %41 = vector.broadcast %c16_i32_16 : i32 to vector<256x1xi32>
    %42 = arith.cmpi slt, %40, %41 : vector<256x1xi32>
    %43 = arith.andi %38, %42 : vector<256x1xi1>
    %c0_i32_17 = arith.constant 0 : i32
    %44 = arith.sitofp %c0_i32_17 : i32 to bf16
    %45 = vector.shape_cast %43 : vector<256x1xi1> to vector<256x1xi1>
    %46 = vector.broadcast %45 : vector<256x1xi1> to vector<256x4xi1>
    %47 = vector.broadcast %44 : bf16 to vector<256x4xbf16>
    %48 = arith.select %46, %34, %47 : vector<256x4xi1>, vector<256x4xbf16>
    %c0_18 = arith.constant 0 : index
    %c0_19 = arith.constant 0 : index
    %c0_20 = arith.constant 0 : index
    %49 = vector.load %arg5[%c0_18, %c0_19, %c0_20] : memref<9x4x4xbf16, #tpu.memory_space<vmem>>, vector<1x4x4xbf16>
    %50 = vector.shape_cast %49 : vector<1x4x4xbf16> to vector<4x4xbf16>
    %cst_21 = arith.constant dense<0.000000e+00> : vector<256x4xf32>
    %51 = tpu.matmul %48, %50, %cst_21 {dimension_numbers = #tpu.dot_dimension_numbers<[1], [0], [0], [1], [0, 0, 1, 1], [], []>} : vector<256x4xbf16>, vector<4x4xbf16>, vector<256x4xf32> -> vector<256x4xf32>
    %52 = arith.addf %33, %51 : vector<256x4xf32>
    %53 = vector.extract_strided_slice %15 {offsets = [16, 0], sizes = [256, 4], strides = [1, 1]} : vector<320x4xbf16> to vector<256x4xbf16>
    %c0_i32_22 = arith.constant 0 : i32
    %54 = vector.broadcast %c0_i32_22 : i32 to vector<256x1xi32>
    %55 = arith.addi %32, %54 : vector<256x1xi32>
    %c0_i32_23 = arith.constant 0 : i32
    %56 = vector.broadcast %c0_i32_23 : i32 to vector<256x1xi32>
    %57 = arith.cmpi sge, %55, %56 : vector<256x1xi32>
    %c0_i32_24 = arith.constant 0 : i32
    %58 = vector.broadcast %c0_i32_24 : i32 to vector<256x1xi32>
    %59 = arith.addi %32, %58 : vector<256x1xi32>
    %c16_i32_25 = arith.constant 16 : i32
    %60 = vector.broadcast %c16_i32_25 : i32 to vector<256x1xi32>
    %61 = arith.cmpi slt, %59, %60 : vector<256x1xi32>
    %62 = arith.andi %57, %61 : vector<256x1xi1>
    %c0_i32_26 = arith.constant 0 : i32
    %63 = arith.sitofp %c0_i32_26 : i32 to bf16
    %64 = vector.shape_cast %62 : vector<256x1xi1> to vector<256x1xi1>
    %65 = vector.broadcast %64 : vector<256x1xi1> to vector<256x4xi1>
    %66 = vector.broadcast %63 : bf16 to vector<256x4xbf16>
    %67 = arith.select %65, %53, %66 : vector<256x4xi1>, vector<256x4xbf16>
    %c1 = arith.constant 1 : index
    %c0_27 = arith.constant 0 : index
    %c0_28 = arith.constant 0 : index
    %68 = vector.load %arg5[%c1, %c0_27, %c0_28] : memref<9x4x4xbf16, #tpu.memory_space<vmem>>, vector<1x4x4xbf16>
    %69 = vector.shape_cast %68 : vector<1x4x4xbf16> to vector<4x4xbf16>
    %cst_29 = arith.constant dense<0.000000e+00> : vector<256x4xf32>
    %70 = tpu.matmul %67, %69, %cst_29 {dimension_numbers = #tpu.dot_dimension_numbers<[1], [0], [0], [1], [0, 0, 1, 1], [], []>} : vector<256x4xbf16>, vector<4x4xbf16>, vector<256x4xf32> -> vector<256x4xf32>
    %71 = arith.addf %52, %70 : vector<256x4xf32>
    %72 = vector.extract_strided_slice %15 {offsets = [17, 0], sizes = [256, 4], strides = [1, 1]} : vector<320x4xbf16> to vector<256x4xbf16>
    %c1_i32_30 = arith.constant 1 : i32
    %73 = vector.broadcast %c1_i32_30 : i32 to vector<256x1xi32>
    %74 = arith.addi %32, %73 : vector<256x1xi32>
    %c0_i32_31 = arith.constant 0 : i32
    %75 = vector.broadcast %c0_i32_31 : i32 to vector<256x1xi32>
    %76 = arith.cmpi sge, %74, %75 : vector<256x1xi32>
    %c1_i32_32 = arith.constant 1 : i32
    %77 = vector.broadcast %c1_i32_32 : i32 to vector<256x1xi32>
    %78 = arith.addi %32, %77 : vector<256x1xi32>
    %c16_i32_33 = arith.constant 16 : i32
    %79 = vector.broadcast %c16_i32_33 : i32 to vector<256x1xi32>
    %80 = arith.cmpi slt, %78, %79 : vector<256x1xi32>
    %81 = arith.andi %76, %80 : vector<256x1xi1>
    %c0_i32_34 = arith.constant 0 : i32
    %82 = arith.sitofp %c0_i32_34 : i32 to bf16
    %83 = vector.shape_cast %81 : vector<256x1xi1> to vector<256x1xi1>
    %84 = vector.broadcast %83 : vector<256x1xi1> to vector<256x4xi1>
    %85 = vector.broadcast %82 : bf16 to vector<256x4xbf16>
    %86 = arith.select %84, %72, %85 : vector<256x4xi1>, vector<256x4xbf16>
    %c2 = arith.constant 2 : index
    %c0_35 = arith.constant 0 : index
    %c0_36 = arith.constant 0 : index
    %87 = vector.load %arg5[%c2, %c0_35, %c0_36] : memref<9x4x4xbf16, #tpu.memory_space<vmem>>, vector<1x4x4xbf16>
    %88 = vector.shape_cast %87 : vector<1x4x4xbf16> to vector<4x4xbf16>
    %cst_37 = arith.constant dense<0.000000e+00> : vector<256x4xf32>
    %89 = tpu.matmul %86, %88, %cst_37 {dimension_numbers = #tpu.dot_dimension_numbers<[1], [0], [0], [1], [0, 0, 1, 1], [], []>} : vector<256x4xbf16>, vector<4x4xbf16>, vector<256x4xf32> -> vector<256x4xf32>
    %90 = arith.addf %71, %89 : vector<256x4xf32>
    %91 = vector.extract_strided_slice %15 {offsets = [31, 0], sizes = [256, 4], strides = [1, 1]} : vector<320x4xbf16> to vector<256x4xbf16>
    %c-1_i32_38 = arith.constant -1 : i32
    %92 = vector.broadcast %c-1_i32_38 : i32 to vector<256x1xi32>
    %93 = arith.addi %32, %92 : vector<256x1xi32>
    %c0_i32_39 = arith.constant 0 : i32
    %94 = vector.broadcast %c0_i32_39 : i32 to vector<256x1xi32>
    %95 = arith.cmpi sge, %93, %94 : vector<256x1xi32>
    %c-1_i32_40 = arith.constant -1 : i32
    %96 = vector.broadcast %c-1_i32_40 : i32 to vector<256x1xi32>
    %97 = arith.addi %32, %96 : vector<256x1xi32>
    %c16_i32_41 = arith.constant 16 : i32
    %98 = vector.broadcast %c16_i32_41 : i32 to vector<256x1xi32>
    %99 = arith.cmpi slt, %97, %98 : vector<256x1xi32>
    %100 = arith.andi %95, %99 : vector<256x1xi1>
    %c0_i32_42 = arith.constant 0 : i32
    %101 = arith.sitofp %c0_i32_42 : i32 to bf16
    %102 = vector.shape_cast %100 : vector<256x1xi1> to vector<256x1xi1>
    %103 = vector.broadcast %102 : vector<256x1xi1> to vector<256x4xi1>
    %104 = vector.broadcast %101 : bf16 to vector<256x4xbf16>
    %105 = arith.select %103, %91, %104 : vector<256x4xi1>, vector<256x4xbf16>
    %c3 = arith.constant 3 : index
    %c0_43 = arith.constant 0 : index
    %c0_44 = arith.constant 0 : index
    %106 = vector.load %arg5[%c3, %c0_43, %c0_44] : memref<9x4x4xbf16, #tpu.memory_space<vmem>>, vector<1x4x4xbf16>
    %107 = vector.shape_cast %106 : vector<1x4x4xbf16> to vector<4x4xbf16>
    %cst_45 = arith.constant dense<0.000000e+00> : vector<256x4xf32>
    %108 = tpu.matmul %105, %107, %cst_45 {dimension_numbers = #tpu.dot_dimension_numbers<[1], [0], [0], [1], [0, 0, 1, 1], [], []>} : vector<256x4xbf16>, vector<4x4xbf16>, vector<256x4xf32> -> vector<256x4xf32>
    %109 = arith.addf %90, %108 : vector<256x4xf32>
    %110 = vector.extract_strided_slice %15 {offsets = [32, 0], sizes = [256, 4], strides = [1, 1]} : vector<320x4xbf16> to vector<256x4xbf16>
    %c0_i32_46 = arith.constant 0 : i32
    %111 = vector.broadcast %c0_i32_46 : i32 to vector<256x1xi32>
    %112 = arith.addi %32, %111 : vector<256x1xi32>
    %c0_i32_47 = arith.constant 0 : i32
    %113 = vector.broadcast %c0_i32_47 : i32 to vector<256x1xi32>
    %114 = arith.cmpi sge, %112, %113 : vector<256x1xi32>
    %c0_i32_48 = arith.constant 0 : i32
    %115 = vector.broadcast %c0_i32_48 : i32 to vector<256x1xi32>
    %116 = arith.addi %32, %115 : vector<256x1xi32>
    %c16_i32_49 = arith.constant 16 : i32
    %117 = vector.broadcast %c16_i32_49 : i32 to vector<256x1xi32>
    %118 = arith.cmpi slt, %116, %117 : vector<256x1xi32>
    %119 = arith.andi %114, %118 : vector<256x1xi1>
    %c0_i32_50 = arith.constant 0 : i32
    %120 = arith.sitofp %c0_i32_50 : i32 to bf16
    %121 = vector.shape_cast %119 : vector<256x1xi1> to vector<256x1xi1>
    %122 = vector.broadcast %121 : vector<256x1xi1> to vector<256x4xi1>
    %123 = vector.broadcast %120 : bf16 to vector<256x4xbf16>
    %124 = arith.select %122, %110, %123 : vector<256x4xi1>, vector<256x4xbf16>
    %c4 = arith.constant 4 : index
    %c0_51 = arith.constant 0 : index
    %c0_52 = arith.constant 0 : index
    %125 = vector.load %arg5[%c4, %c0_51, %c0_52] : memref<9x4x4xbf16, #tpu.memory_space<vmem>>, vector<1x4x4xbf16>
    %126 = vector.shape_cast %125 : vector<1x4x4xbf16> to vector<4x4xbf16>
    %cst_53 = arith.constant dense<0.000000e+00> : vector<256x4xf32>
    %127 = tpu.matmul %124, %126, %cst_53 {dimension_numbers = #tpu.dot_dimension_numbers<[1], [0], [0], [1], [0, 0, 1, 1], [], []>} : vector<256x4xbf16>, vector<4x4xbf16>, vector<256x4xf32> -> vector<256x4xf32>
    %128 = arith.addf %109, %127 : vector<256x4xf32>
    %129 = vector.extract_strided_slice %15 {offsets = [33, 0], sizes = [256, 4], strides = [1, 1]} : vector<320x4xbf16> to vector<256x4xbf16>
    %c1_i32_54 = arith.constant 1 : i32
    %130 = vector.broadcast %c1_i32_54 : i32 to vector<256x1xi32>
    %131 = arith.addi %32, %130 : vector<256x1xi32>
    %c0_i32_55 = arith.constant 0 : i32
    %132 = vector.broadcast %c0_i32_55 : i32 to vector<256x1xi32>
    %133 = arith.cmpi sge, %131, %132 : vector<256x1xi32>
    %c1_i32_56 = arith.constant 1 : i32
    %134 = vector.broadcast %c1_i32_56 : i32 to vector<256x1xi32>
    %135 = arith.addi %32, %134 : vector<256x1xi32>
    %c16_i32_57 = arith.constant 16 : i32
    %136 = vector.broadcast %c16_i32_57 : i32 to vector<256x1xi32>
    %137 = arith.cmpi slt, %135, %136 : vector<256x1xi32>
    %138 = arith.andi %133, %137 : vector<256x1xi1>
    %c0_i32_58 = arith.constant 0 : i32
    %139 = arith.sitofp %c0_i32_58 : i32 to bf16
    %140 = vector.shape_cast %138 : vector<256x1xi1> to vector<256x1xi1>
    %141 = vector.broadcast %140 : vector<256x1xi1> to vector<256x4xi1>
    %142 = vector.broadcast %139 : bf16 to vector<256x4xbf16>
    %143 = arith.select %141, %129, %142 : vector<256x4xi1>, vector<256x4xbf16>
    %c5 = arith.constant 5 : index
    %c0_59 = arith.constant 0 : index
    %c0_60 = arith.constant 0 : index
    %144 = vector.load %arg5[%c5, %c0_59, %c0_60] : memref<9x4x4xbf16, #tpu.memory_space<vmem>>, vector<1x4x4xbf16>
    %145 = vector.shape_cast %144 : vector<1x4x4xbf16> to vector<4x4xbf16>
    %cst_61 = arith.constant dense<0.000000e+00> : vector<256x4xf32>
    %146 = tpu.matmul %143, %145, %cst_61 {dimension_numbers = #tpu.dot_dimension_numbers<[1], [0], [0], [1], [0, 0, 1, 1], [], []>} : vector<256x4xbf16>, vector<4x4xbf16>, vector<256x4xf32> -> vector<256x4xf32>
    %147 = arith.addf %128, %146 : vector<256x4xf32>
    %148 = vector.extract_strided_slice %15 {offsets = [47, 0], sizes = [256, 4], strides = [1, 1]} : vector<320x4xbf16> to vector<256x4xbf16>
    %c-1_i32_62 = arith.constant -1 : i32
    %149 = vector.broadcast %c-1_i32_62 : i32 to vector<256x1xi32>
    %150 = arith.addi %32, %149 : vector<256x1xi32>
    %c0_i32_63 = arith.constant 0 : i32
    %151 = vector.broadcast %c0_i32_63 : i32 to vector<256x1xi32>
    %152 = arith.cmpi sge, %150, %151 : vector<256x1xi32>
    %c-1_i32_64 = arith.constant -1 : i32
    %153 = vector.broadcast %c-1_i32_64 : i32 to vector<256x1xi32>
    %154 = arith.addi %32, %153 : vector<256x1xi32>
    %c16_i32_65 = arith.constant 16 : i32
    %155 = vector.broadcast %c16_i32_65 : i32 to vector<256x1xi32>
    %156 = arith.cmpi slt, %154, %155 : vector<256x1xi32>
    %157 = arith.andi %152, %156 : vector<256x1xi1>
    %c0_i32_66 = arith.constant 0 : i32
    %158 = arith.sitofp %c0_i32_66 : i32 to bf16
    %159 = vector.shape_cast %157 : vector<256x1xi1> to vector<256x1xi1>
    %160 = vector.broadcast %159 : vector<256x1xi1> to vector<256x4xi1>
    %161 = vector.broadcast %158 : bf16 to vector<256x4xbf16>
    %162 = arith.select %160, %148, %161 : vector<256x4xi1>, vector<256x4xbf16>
    %c6 = arith.constant 6 : index
    %c0_67 = arith.constant 0 : index
    %c0_68 = arith.constant 0 : index
    %163 = vector.load %arg5[%c6, %c0_67, %c0_68] : memref<9x4x4xbf16, #tpu.memory_space<vmem>>, vector<1x4x4xbf16>
    %164 = vector.shape_cast %163 : vector<1x4x4xbf16> to vector<4x4xbf16>
    %cst_69 = arith.constant dense<0.000000e+00> : vector<256x4xf32>
    %165 = tpu.matmul %162, %164, %cst_69 {dimension_numbers = #tpu.dot_dimension_numbers<[1], [0], [0], [1], [0, 0, 1, 1], [], []>} : vector<256x4xbf16>, vector<4x4xbf16>, vector<256x4xf32> -> vector<256x4xf32>
    %166 = arith.addf %147, %165 : vector<256x4xf32>
    %167 = vector.extract_strided_slice %15 {offsets = [48, 0], sizes = [256, 4], strides = [1, 1]} : vector<320x4xbf16> to vector<256x4xbf16>
    %c0_i32_70 = arith.constant 0 : i32
    %168 = vector.broadcast %c0_i32_70 : i32 to vector<256x1xi32>
    %169 = arith.addi %32, %168 : vector<256x1xi32>
    %c0_i32_71 = arith.constant 0 : i32
    %170 = vector.broadcast %c0_i32_71 : i32 to vector<256x1xi32>
    %171 = arith.cmpi sge, %169, %170 : vector<256x1xi32>
    %c0_i32_72 = arith.constant 0 : i32
    %172 = vector.broadcast %c0_i32_72 : i32 to vector<256x1xi32>
    %173 = arith.addi %32, %172 : vector<256x1xi32>
    %c16_i32_73 = arith.constant 16 : i32
    %174 = vector.broadcast %c16_i32_73 : i32 to vector<256x1xi32>
    %175 = arith.cmpi slt, %173, %174 : vector<256x1xi32>
    %176 = arith.andi %171, %175 : vector<256x1xi1>
    %c0_i32_74 = arith.constant 0 : i32
    %177 = arith.sitofp %c0_i32_74 : i32 to bf16
    %178 = vector.shape_cast %176 : vector<256x1xi1> to vector<256x1xi1>
    %179 = vector.broadcast %178 : vector<256x1xi1> to vector<256x4xi1>
    %180 = vector.broadcast %177 : bf16 to vector<256x4xbf16>
    %181 = arith.select %179, %167, %180 : vector<256x4xi1>, vector<256x4xbf16>
    %c7 = arith.constant 7 : index
    %c0_75 = arith.constant 0 : index
    %c0_76 = arith.constant 0 : index
    %182 = vector.load %arg5[%c7, %c0_75, %c0_76] : memref<9x4x4xbf16, #tpu.memory_space<vmem>>, vector<1x4x4xbf16>
    %183 = vector.shape_cast %182 : vector<1x4x4xbf16> to vector<4x4xbf16>
    %cst_77 = arith.constant dense<0.000000e+00> : vector<256x4xf32>
    %184 = tpu.matmul %181, %183, %cst_77 {dimension_numbers = #tpu.dot_dimension_numbers<[1], [0], [0], [1], [0, 0, 1, 1], [], []>} : vector<256x4xbf16>, vector<4x4xbf16>, vector<256x4xf32> -> vector<256x4xf32>
    %185 = arith.addf %166, %184 : vector<256x4xf32>
    %186 = vector.extract_strided_slice %15 {offsets = [49, 0], sizes = [256, 4], strides = [1, 1]} : vector<320x4xbf16> to vector<256x4xbf16>
    %c1_i32_78 = arith.constant 1 : i32
    %187 = vector.broadcast %c1_i32_78 : i32 to vector<256x1xi32>
    %188 = arith.addi %32, %187 : vector<256x1xi32>
    %c0_i32_79 = arith.constant 0 : i32
    %189 = vector.broadcast %c0_i32_79 : i32 to vector<256x1xi32>
    %190 = arith.cmpi sge, %188, %189 : vector<256x1xi32>
    %c1_i32_80 = arith.constant 1 : i32
    %191 = vector.broadcast %c1_i32_80 : i32 to vector<256x1xi32>
    %192 = arith.addi %32, %191 : vector<256x1xi32>
    %c16_i32_81 = arith.constant 16 : i32
    %193 = vector.broadcast %c16_i32_81 : i32 to vector<256x1xi32>
    %194 = arith.cmpi slt, %192, %193 : vector<256x1xi32>
    %195 = arith.andi %190, %194 : vector<256x1xi1>
    %c0_i32_82 = arith.constant 0 : i32
    %196 = arith.sitofp %c0_i32_82 : i32 to bf16
    %197 = vector.shape_cast %195 : vector<256x1xi1> to vector<256x1xi1>
    %198 = vector.broadcast %197 : vector<256x1xi1> to vector<256x4xi1>
    %199 = vector.broadcast %196 : bf16 to vector<256x4xbf16>
    %200 = arith.select %198, %186, %199 : vector<256x4xi1>, vector<256x4xbf16>
    %c8 = arith.constant 8 : index
    %c0_83 = arith.constant 0 : index
    %c0_84 = arith.constant 0 : index
    %201 = vector.load %arg5[%c8, %c0_83, %c0_84] : memref<9x4x4xbf16, #tpu.memory_space<vmem>>, vector<1x4x4xbf16>
    %202 = vector.shape_cast %201 : vector<1x4x4xbf16> to vector<4x4xbf16>
    %cst_85 = arith.constant dense<0.000000e+00> : vector<256x4xf32>
    %203 = tpu.matmul %200, %202, %cst_85 {dimension_numbers = #tpu.dot_dimension_numbers<[1], [0], [0], [1], [0, 0, 1, 1], [], []>} : vector<256x4xbf16>, vector<4x4xbf16>, vector<256x4xf32> -> vector<256x4xf32>
    %204 = arith.addf %185, %203 : vector<256x4xf32>
    %c0_86 = arith.constant 0 : index
    %c0_87 = arith.constant 0 : index
    %205 = vector.load %arg6[%c0_86, %c0_87] : memref<1x4xf32, #tpu.memory_space<vmem>>, vector<1x4xf32>
    %206 = vector.broadcast %205 : vector<1x4xf32> to vector<256x4xf32>
    %207 = arith.mulf %204, %206 : vector<256x4xf32>
    %c0_88 = arith.constant 0 : index
    %c0_89 = arith.constant 0 : index
    %208 = vector.load %arg7[%c0_88, %c0_89] : memref<1x4xf32, #tpu.memory_space<vmem>>, vector<1x4xf32>
    %209 = vector.broadcast %208 : vector<1x4xf32> to vector<256x4xf32>
    %210 = arith.addf %207, %209 : vector<256x4xf32>
    %cst_90 = arith.constant 0.000000e+00 : f32
    %211 = vector.broadcast %cst_90 : f32 to vector<256x4xf32>
    %212 = arith.maximumf %210, %211 : vector<256x4xf32>
    %213 = arith.truncf %212 : vector<256x4xf32> to vector<256x4xbf16>
    %c0_91 = arith.constant 0 : index
    %c0_92 = arith.constant 0 : index
    %214 = vector.load %arg8[%c0_91, %c0_92] : memref<4x16xbf16, #tpu.memory_space<vmem>>, vector<4x16xbf16>
    %cst_93 = arith.constant dense<0.000000e+00> : vector<256x16xf32>
    %215 = tpu.matmul %213, %214, %cst_93 {dimension_numbers = #tpu.dot_dimension_numbers<[1], [0], [0], [1], [0, 0, 1, 1], [], []>} : vector<256x4xbf16>, vector<4x16xbf16>, vector<256x16xf32> -> vector<256x16xf32>
    %c0_94 = arith.constant 0 : index
    %c0_95 = arith.constant 0 : index
    %216 = vector.load %arg9[%c0_94, %c0_95] : memref<1x16xf32, #tpu.memory_space<vmem>>, vector<1x16xf32>
    %217 = vector.broadcast %216 : vector<1x16xf32> to vector<256x16xf32>
    %218 = arith.mulf %215, %217 : vector<256x16xf32>
    %c0_96 = arith.constant 0 : index
    %c0_97 = arith.constant 0 : index
    %219 = vector.load %arg10[%c0_96, %c0_97] : memref<1x16xf32, #tpu.memory_space<vmem>>, vector<1x16xf32>
    %220 = vector.broadcast %219 : vector<1x16xf32> to vector<256x16xf32>
    %221 = arith.addf %218, %220 : vector<256x16xf32>
    %222 = arith.addf %221, %1 : vector<256x16xf32>
    %cst_98 = arith.constant 0.000000e+00 : f32
    %223 = vector.broadcast %cst_98 : f32 to vector<256x16xf32>
    %224 = arith.maximumf %222, %223 : vector<256x16xf32>
    %c0_99 = arith.constant 0 : index
    %c0_100 = arith.constant 0 : index
    %c0_101 = arith.constant 0 : index
    %225 = vector.load %arg11[%c0_99, %c0_100, %c0_101] : memref<1x256x16xf32, #tpu.memory_space<vmem>>, vector<1x256x16xf32>
    %226 = vector.shape_cast %225 : vector<1x256x16xf32> to vector<256x16xf32>
    %227 = vector.shape_cast %224 : vector<256x16xf32> to vector<1x256x16xf32>
    tpu.vector_store %arg11[%c0_99, %c0_100, %c0_101], %227 {strides = array<i32>} : memref<1x256x16xf32, #tpu.memory_space<vmem>>, vector<1x256x16xf32>,
    return
  }
  func.func @transform_0(%arg0: i32) -> (i32, i32, i32) {
    %c0_i32 = arith.constant 0 : i32
    %c0_i32_0 = arith.constant 0 : i32
    %c0_i32_1 = arith.constant 0 : i32
    return %arg0, %c0_i32, %c0_i32_0 : i32, i32, i32
  }
  func.func @transform_1(%arg0: i32) -> (i32, i32) {
    %c0_i32 = arith.constant 0 : i32
    %c0_i32_0 = arith.constant 0 : i32
    %c0_i32_1 = arith.constant 0 : i32
    return %c0_i32, %c0_i32_0 : i32, i32
  }
  func.func @transform_2(%arg0: i32) -> (i32, i32) {
    %c0_i32 = arith.constant 0 : i32
    %c0_i32_0 = arith.constant 0 : i32
    %c0_i32_1 = arith.constant 0 : i32
    return %c0_i32, %c0_i32_0 : i32, i32
  }
  func.func @transform_3(%arg0: i32) -> (i32, i32) {
    %c0_i32 = arith.constant 0 : i32
    %c0_i32_0 = arith.constant 0 : i32
    %c0_i32_1 = arith.constant 0 : i32
    return %c0_i32, %c0_i32_0 : i32, i32
  }
  func.func @transform_4(%arg0: i32) -> (i32, i32, i32) {
    %c0_i32 = arith.constant 0 : i32
    %c0_i32_0 = arith.constant 0 : i32
    %c0_i32_1 = arith.constant 0 : i32
    %c0_i32_2 = arith.constant 0 : i32
    return %c0_i32, %c0_i32_0, %c0_i32_1 : i32, i32, i32
  }
  func.func @transform_5(%arg0: i32) -> (i32, i32) {
    %c0_i32 = arith.constant 0 : i32
    %c0_i32_0 = arith.constant 0 : i32
    %c0_i32_1 = arith.constant 0 : i32
    return %c0_i32, %c0_i32_0 : i32, i32
  }
  func.func @transform_6(%arg0: i32) -> (i32, i32) {
    %c0_i32 = arith.constant 0 : i32
    %c0_i32_0 = arith.constant 0 : i32
    %c0_i32_1 = arith.constant 0 : i32
    return %c0_i32, %c0_i32_0 : i32, i32
  }
  func.func @transform_7(%arg0: i32) -> (i32, i32) {
    %c0_i32 = arith.constant 0 : i32
    %c0_i32_0 = arith.constant 0 : i32
    %c0_i32_1 = arith.constant 0 : i32
    return %c0_i32, %c0_i32_0 : i32, i32
  }
  func.func @transform_8(%arg0: i32) -> (i32, i32) {
    %c0_i32 = arith.constant 0 : i32
    %c0_i32_0 = arith.constant 0 : i32
    %c0_i32_1 = arith.constant 0 : i32
    return %c0_i32, %c0_i32_0 : i32, i32
  }
  func.func @transform_9(%arg0: i32) -> (i32, i32) {
    %c0_i32 = arith.constant 0 : i32
    %c0_i32_0 = arith.constant 0 : i32
    %c0_i32_1 = arith.constant 0 : i32
    return %c0_i32, %c0_i32_0 : i32, i32
  }
  func.func @transform_10(%arg0: i32) -> (i32, i32, i32) {
    %c0_i32 = arith.constant 0 : i32
    %c0_i32_0 = arith.constant 0 : i32
    %c0_i32_1 = arith.constant 0 : i32
    return %arg0, %c0_i32, %c0_i32_0 : i32, i32, i32
  }
}

</mosaic_0001>

<bundles_post_ra>
// kernel: tpu_custom_call.1
= control target key start
LH: loop header
LB: loop body
LE: loop exit
PB: predicated region body
PF: predicated region fallthrough
CT: control target
= control target key end

     0   :  { %s7158_s13 = smov 0   ;;  %s8952_s0 = inlined_call_operand.vmem [shape: f32[2,256,16], index: 0, kind: input, shape index: {}]   ;;  %s8953_s1 = inlined_call_operand.vmem [shape: bf16[16,4], index: 1, kind: input, shape index: {}]   ;;  %s8954_s2 = inlined_call_operand.vmem [shape: f32[1,4], index: 2, kind: input, shape index: {}]   ;;  %s8955_s3 = inlined_call_operand.vmem [shape: f32[1,4], index: 3, kind: input, shape index: {}]   ;;  %s8956_s4 = inlined_call_operand.vmem [shape: bf16[9,4,4], index: 4, kind: input, shape index: {}]   ;;  %s8957_s5 = inlined_call_operand.vmem [shape: f32[1,4], index: 5, kind: input, shape index: {}]   ;;  %s8958_s6 = inlined_call_operand.vmem [shape: f32[1,4], index: 6, kind: input, shape index: {}]   ;;  %s8959_s7 = inlined_call_operand.vmem [shape: bf16[4,16], index: 7, kind: input, shape index: {}]   ;;  %s8960_s8 = inlined_call_operand.vmem [shape: f32[1,16], index: 8, kind: input, shape index: {}]   ;;  %s8961_s9 = inlined_call_operand.vmem [shape: f32[1,16], index: 9, kind: input, shape index: {}]   ;;  %s8962_s10 = inlined_call_operand.vmem [shape: f32[2,256,16], index: 10, kind: output, shape index: {}]  }
   0x1 LB: > { %s5970_s14 = sadd.s32 4294967295, %s7099_s13   ;;  %p5974_p0 = scmp.ge.s32.totalorder %s7099_s13, 1  ;;  %s7099_s13 = sphi %s7158_s13, %s20_s13  }
   0x2   : > { %p312_p1 = scmp.lt.s32.totalorder %s7099_s13, 3 }
   0x4   : > { %p313_p2 = pnand %p5974_p0, %p312_p1 }
   0x6   : > { %316 = sbr.rel (%p313_p2) target bundleno = 1083 (0x43b), region = 60 }
   0xd   : > { %v7060_v0 = vld [vmem:[%s8953_s1] sm:$0xff]   ;;  %p350_p3 = scmp.lt.s32.totalorder %s5970_s14, 1  ;;  %vm8989_vm0 = vcmask 130048   ;;  %v8963_v49 = vmov 0   ;;  %vm1966_vm1 = vcmask 1041408   ;;  %v755_v56 = vlaneseq }
   0xe   : > { %6407 = vmatprep.subr.bf16.mxu0 %v7060_v0  ;;  %v6028_v50 = vld [vmem:[%s8956_s4 + $0x2] sm:$0x3]  ;;  %v7236_v52 = vld [vmem:[%s8956_s4 + $0x6] sm:$0x3]  ;;  %v7248_v54 = vld [vmem:[%s8956_s4 + $0x8] sm:$0x3] }
   0xf   : > { %s9269_s14 = smov (!%p350_p3, %s5970_s14), 1  ;;  %6408 = vmatpush3.bf16.msra.mxu0 %v7060_v0  ;;  %v1968_v51 = vsel %vm1966_vm1, %v6028_v50, 0  ;;  %7043 = vmatprep.subr.msk.bf16.mxu1 %vm1966_vm1, %v7236_v52  ;;  %v7242_v53 = vsel %vm1966_vm1, %v7236_v52, 0  ;;  %v7255_v55 = vld [vmem:[%s8956_s4] sm:$0x3]  ;;  %v7259_v57 = vshrl.u32 %v755_v56, 7 }
  0x10   : > { %s6218_s17 = sshll.u32 %s9269_s14, 8  ;;  %7039 = vmatprep.subr.msk.bf16.mxu0 %vm1966_vm1, %v6028_v50  ;;  %9048 = vst [vmem:[#allocation2_spill] sm:$0xff] %v7242_v53  ;;  %6782 = vmatpush3.bf16.msra.mxu1 %v7242_v53  ;;  %vm7102_vm4 = vmmov 1  }
  0x11   : > { %s7177_s20 = scalar_lea.vmem %s8952_s0, %s6218_s17  ;;  %7044 = vmatprep.subr.msk.bf16.mxu1 %vm1966_vm1, %v7248_v54  ;;  %v758_v58 = vadd.s32 16, %v7259_v57  ;;  %v760_v59 = vadd.s32 32, %v7259_v57  ;;  %v762_v61 = vadd.s32 48, %v7259_v57  ;;  %v764_v63 = vadd.s32 64, %v7259_v57  ;;  %vm1365_vm5 = vmpackc.low %vm7102_vm4, %vm7102_vm4  ;;  %s8795_s23 = scalar_lea.vmem %s8962_s10, %s6218_s17 }
  0x12   : > { %v363_v1 = vld [vmem:[%s7177_s20] sm:$0xff]  ;;  %v364_v2 = vld [vmem:[%s7177_s20 + $0x8] sm:$0xff]  ;;  %v365_v3 = vld [vmem:[%s7177_s20 + $0x10] sm:$0xff]  ;;  %v7295_v56 = vadd.s32 24, %v7259_v57 }
  0x13   : > { %v395_v4 = vpack.c.bf16 %v364_v2, %v363_v1  ;;  %v366_v5 = vld [vmem:[%s7177_s20 + $0x18] sm:$0xff]  ;;  %v367_v6 = vld [vmem:[%s7177_s20 + $0x20] sm:$0xff]  ;;  %v368_v7 = vld [vmem:[%s7177_s20 + $0x28] sm:$0xff]  ;;  %v806_v60 = vand.u32 15, %v758_v58  ;;  %v820_v62 = vand.u32 15, %v760_v59  ;;  %v834_v1 = vand.u32 15, %v762_v61 }
  0x14   : > { %v396_v8 = vpack.c.bf16 %v366_v5, %v365_v3  ;;  %v397_v9 = vpack.c.bf16 %v368_v7, %v367_v6  ;;  %v369_v10 = vld [vmem:[%s7177_s20 + $0x30] sm:$0xff]  ;;  %v370_v11 = vld [vmem:[%s7177_s20 + $0x38] sm:$0xff]  ;;  %v371_v12 = vld [vmem:[%s7177_s20 + $0x40] sm:$0xff]  ;;  %v848_v3 = vand.u32 15, %v764_v63  ;;  %v770_v5 = vadd.s32 112, %v7259_v57 }
  0x15   : > { %6409 = vmatprep.mubr.msk.bf16.mxu0 %vm8989_vm0, %v395_v4  ;;  %v372_v13 = vld [vmem:[%s7177_s20 + $0x48] sm:$0xff]  ;;  %v398_v14 = vpack.c.bf16 %v370_v11, %v369_v10  ;;  %v373_v16 = vld [vmem:[%s7177_s20 + $0x50] sm:$0xff]  ;;  %v374_v17 = vld [vmem:[%s7177_s20 + $0x58] sm:$0xff]  ;;  %v1174_v0 = vadd.s32 4294967295, %v806_v60  ;;  %v1176_v2 = vadd.s32 4294967295, %v820_v62  ;;  %v766_v4 = vadd.s32 80, %v7259_v57 }
  0x16   : > { %6410 = vmatmul.mubr.msk.bf16.vlgmr.msra.gmra.mrb[0].mxu0 %vm8989_vm0, %v396_v8  ;;  %v399_v15 = vpack.c.bf16 %v372_v13, %v371_v12  ;;  %v375_v18 = vld [vmem:[%s7177_s20 + $0x60] sm:$0xff]  ;;  %v376_v19 = vld [vmem:[%s7177_s20 + $0x68] sm:$0xff]  ;;  %v400_v20 = vpack.c.bf16 %v374_v17, %v373_v16  ;;  %v377_v22 = vld [vmem:[%s7177_s20 + $0x70] sm:$0xff]  ;;  %v1178_v6 = vadd.s32 4294967295, %v834_v1  ;;  %v1180_v7 = vadd.s32 4294967295, %v848_v3 }
  0x17   : > { %6413 = vmatprep.mubr.msk.bf16.mxu0 %vm8989_vm0, %v397_v9  ;;  %v401_v21 = vpack.c.bf16 %v376_v19, %v375_v18  ;;  %v378_v23 = vld [vmem:[%s7177_s20 + $0x78] sm:$0xff]  ;;  %v379_v24 = vld [vmem:[%s7177_s20 + $0x80] sm:$0xff]  ;;  %v380_v25 = vld [vmem:[%s7177_s20 + $0x88] sm:$0xff]  ;;  %6442 = vmatpush3.bf16.msra.mxu0 %v1968_v51  ;;  %vm1206_vm2 = vcmp.ge.s32.totalorder %v1174_v0, 0  ;;  %vm1208_vm3 = vcmp.ge.s32.totalorder %v1176_v2, 0  ;;  %v862_v8 = vand.u32 15, %v766_v4 }
  0x18   : > { %v402_v26 = vpack.c.bf16 %v378_v23, %v377_v22  ;;  %v403_v27 = vpack.c.bf16 %v380_v25, %v379_v24  ;;  %v381_v28 = vld [vmem:[%s7177_s20 + $0x90] sm:$0xff]  ;;  %v382_v29 = vld [vmem:[%s7177_s20 + $0x98] sm:$0xff]  ;;  %v383_v30 = vld [vmem:[%s7177_s20 + $0xa0] sm:$0xff]  ;;  %7040 = vmatprep.subr.msk.bf16.mxu0 %vm1966_vm1, %v7255_v55  ;;  %v890_v9 = vand.u32 15, %v770_v5  ;;  %vm1210_vm8 = vcmp.ge.s32.totalorder %v1178_v6, 0 }
  0x19   : > { %v384_v31 = vld [vmem:[%s7177_s20 + $0xa8] sm:$0xff]  ;;  %v404_v32 = vpack.c.bf16 %v382_v29, %v381_v28  ;;  %v385_v34 = vld [vmem:[%s7177_s20 + $0xb0] sm:$0xff]  ;;  %v386_v35 = vld [vmem:[%s7177_s20 + $0xb8] sm:$0xff]  ;;  %v7268_v10 = vsel %vm1365_vm5, 65537, %v8963_v49  ;;  %v772_v11 = vadd.s32 128, %v7259_v57  ;;  %vm1212_vm9 = vcmp.ge.s32.totalorder %v1180_v7, 0 }
  0x1a   : > { %v405_v33 = vpack.c.bf16 %v384_v31, %v383_v30  ;;  %v387_v36 = vld [vmem:[%s7177_s20 + $0xc0] sm:$0xff]  ;;  %v388_v37 = vld [vmem:[%s7177_s20 + $0xc8] sm:$0xff]  ;;  %v406_v38 = vpack.c.bf16 %v386_v35, %v385_v34  ;;  %v389_v40 = vld [vmem:[%s7177_s20 + $0xd0] sm:$0xff]  ;;  %v768_v16 = vadd.s32 96, %v7259_v57  ;;  %vm8997_vm5 = vsmask.f32 7424 }
  0x1b   : > { %v407_v39 = vpack.c.bf16 %v388_v37, %v387_v36  ;;  %v390_v41 = vld [vmem:[%s7177_s20 + $0xd8] sm:$0xff]  ;;  %v391_v42 = vld [vmem:[%s7177_s20 + $0xe0] sm:$0xff]  ;;  %v392_v43 = vld [vmem:[%s7177_s20 + $0xe8] sm:$0xff]  ;;  %v904_v18 = vand.u32 15, %v772_v11  ;;  %v6013_v61 = vcombine.low %v7268_v10, %v7268_v10  ;;  %v778_v6 = vadd.s32 176, %v7259_v57 }
  0x1c   : > { %v408_v44 = vpack.c.bf16 %v390_v41, %v389_v40  ;;  %v409_v45 = vpack.c.bf16 %v392_v43, %v391_v42  ;;  %v393_v46 = vld [vmem:[%s7177_s20 + $0xf0] sm:$0xff]  ;;  %v394_v47 = vld [vmem:[%s7177_s20 + $0xf8] sm:$0xff]  ;;  %vm1364_vm6 = vmpackc.low %vm1206_vm2, %vm1206_vm2  ;;  %v876_v23 = vand.u32 15, %v768_v16  ;;  %v776_v41 = vadd.s32 160, %v7259_v57 }
  0x1d   : > { %v410_v48 = vpack.c.bf16 %v394_v47, %v393_v46  ;;  %vm1366_vm7 = vmpackc.low %vm1208_vm3, %vm1208_vm3  ;;  %v1394_v12 = vsel %vm1364_vm6, 65537, %v8963_v49  ;;  %v757_v47 = vadd.s32 8, %v7259_v57  ;;  %v7305_v63 = vld [vmem:[%s8954_s2] ss:$0 sm:$0xff]  ;;  %v7323_v7 = vrot.slane %v8963_v49, 7 }
  0x1e   : > { %6414 = vmatmul.mubr.msk.bf16.gmra.mrb[4].mxu0 %vm8989_vm0, %v398_v14  ;;  %v1396_v13 = vsel %vm1366_vm7, 65537, %v8963_v49  ;;  %vm1368_vm10 = vmpackc.low %vm1210_vm8, %vm1210_vm8  ;;  %v1182_v14 = vadd.s32 4294967295, %v862_v8  ;;  %v5998_v17 = vcombine.low %v1394_v12, %v7268_v10  ;;  %v1184_v30 = vadd.s32 4294967295, %v876_v23  ;;  %v7329_v11 = vld [vmem:[%s8955_s3] ss:$0 sm:$0xff] }
  0x1f   : > { %6417 = vmatprep.mubr.msk.bf16.mxu0 %vm8989_vm0, %v399_v15  ;;  %v1186_v15 = vadd.s32 4294967295, %v890_v9  ;;  %vm1370_vm11 = vmpackc.low %vm1212_vm9, %vm1212_vm9  ;;  %v5999_v19 = vcombine.low %v1396_v13, %v7268_v10  ;;  %v932_v59 = vand.u32 15, %v776_v41  ;;  %v799_v3 = vand.u32 15, %v757_v47 }
  0x20   : > { %vm1214_vm12 = vcmp.ge.s32.totalorder %v1182_v14, 0  ;;  %v1400_v22 = vsel %vm1370_vm11, 65537, %v8963_v49  ;;  %v1473_v24 = vshll.u32 %v5998_v17, 16  ;;  %v1471_v31 = vshrl.u32 %v5998_v17, 16 }
  0x21   : > { %vm1218_vm13 = vcmp.ge.s32.totalorder %v1186_v15, 0  ;;  %vm1372_vm14 = vmpackc.low %vm1214_vm12, %vm1214_vm12  ;;  %v6001_v28 = vcombine.low %v1400_v22, %v7268_v10  ;;  %v1482_v37 = vshrl.u32 %v5999_v19, 16  ;;  %vm1216_vm3 = vcmp.ge.s32.totalorder %v1184_v30, 0 }
  0x22   : > { %vm1376_vm15 = vmpackc.low %vm1218_vm13, %vm1218_vm13  ;;  %v1402_v34 = vsel %vm1372_vm14, 65537, %v8963_v49  ;;  %v813_v8 = vand.u32 15, %v7295_v56  ;;  %v1192_v12 = vadd.s32 4294967295, %v932_v59  ;;  %vm7335_vm9 = vcmp.ne.s16.totalorder %v6013_v61, 0 }
  0x23   : > { %v1406_v35 = vsel %vm1376_vm15, 65537, %v8963_v49  ;;  %v7287_v42 = vcombine.low %v1402_v34, %v7268_v10  ;;  %v1498_v51 = vshrl.u32 %v6001_v28, 16  ;;  %vm1374_vm6 = vmpackc.low %vm1216_vm3, %vm1216_vm3  ;;  %v782_v61 = vadd.s32 208, %v7259_v57 }
  0x24   : > { %v7290_v43 = vcombine.low %v1406_v35, %v7268_v10  ;;  %v1404_v2 = vsel %vm1374_vm6, 65537, %v8963_v49  ;;  %vm1224_vm11 = vcmp.ge.s32.totalorder %v1192_v12, 0 }
  0x25   : > { %v1502_v60 = vshll.u32 %v7287_v42, 16  ;;  %vm7370_vm12 = vmpackc.low %vm1224_vm11, %vm1224_vm11 }
  0x26   : > { %6418 = vmatmul.mubr.msk.bf16.gmra.mrb[8].mxu0 %vm8989_vm0, %v400_v20  ;;  %v1398_v20 = vsel %vm1368_vm10, 65537, %v8963_v49  ;;  %v1518_v62 = vshll.u32 %v7290_v43, 16  ;;  %vm1917_vm10 = vcmask 31744   ;;  %v1522_v41 = vshrl.u32 %v7290_v43, 16 }
  0x27   : > { %6421 = vmatprep.mubr.msk.bf16.mxu0 %vm8989_vm0, %v401_v21  ;;  %v774_v21 = vadd.s32 144, %v7259_v57  ;;  %v6000_v25 = vcombine.low %v1398_v20, %v7268_v10  ;;  %v1504_v15 = vrot.slane %v1502_v60, 1  ;;  %v780_v20 = vadd.s32 192, %v7259_v57 }
  0x29   : > { %v918_v29 = vand.u32 15, %v774_v21  ;;  %v7343_v21 = vcombine.low %v1404_v2, %v7268_v10 }
  0x2b   : > { %v1190_v40 = vadd.s32 4294967295, %v918_v29 }
  0x2d   : > { %vm1222_vm7 = vcmp.ge.s32.totalorder %v1190_v40, 0 }
  0x2e   : > { %6422 = vmatmul.mubr.msk.bf16.gmra.mrb[12].mxu0 %vm8989_vm0, %v402_v26  ;;  %v1188_v26 = vadd.s32 4294967295, %v904_v18  ;;  %vm7314_vm8 = vmpackc.low %vm1222_vm7, %vm1222_vm7  ;;  %v9055_v18 = vmov 0 }
  0x2f   : > { %6425 = vmatprep.mubr.msk.bf16.mxu0 %vm8989_vm0, %v403_v27  ;;  %v1478_v27 = vshll.u32 %v5999_v19, 16  ;;  %v9056_v18 = vsel %vm7335_vm9, 4294967295, %v9055_v18  ;;  %v7339_v19 = vrot.slane %v1518_v62, 1 }
  0x30   : > { %vm1220_vm2 = vcmp.ge.s32.totalorder %v1188_v26, 0  ;;  %9057 = vst [vmem:[#allocation7_spill] sm:$0xff] %v9056_v18  ;;  %v7350_v26 = vadd.s32 1, %v799_v3 }
  0x31   : > { %v1480_v36 = vrot.slane %v1478_v27, 1  ;;  %vm1378_vm4 = vmpackc.low %vm1220_vm2, %vm1220_vm2 }
  0x32   : > { %v1408_v58 = vsel %vm1378_vm4, 65537, %v8963_v49 }
  0x33   : > { %v1484_v46 = vor.u32 %v1482_v37, %v1480_v36  ;;  %v7319_v5 = vcombine.low %v1408_v58, %v7268_v10 }
  0x35   : > { %v1526_v30 = vshll.u32 %v7319_v5, 16  ;;  %v1530_v60 = vshrl.u32 %v7319_v5, 16  ;;  %v1412_v5 = vsel %vm7370_vm12, 65537, %v8963_v49 }
  0x36   : > { %6426 = vmatmul.mubr.msk.bf16.gmra.mrb[16].mxu0 %vm8989_vm0, %v404_v32  ;;  %v7281_v32 = vrot.slane %v1473_v24, 1  ;;  %v1410_v24 = vsel %vm7314_vm8, 65537, %v8963_v49 }
  0x37   : > { %6429 = vmatprep.mubr.msk.bf16.mxu0 %vm8989_vm0, %v405_v33  ;;  %v1486_v33 = vshll.u32 %v6000_v25, 16  ;;  %v7362_v37 = vcombine.low %v1410_v24, %v7268_v10  ;;  %v1528_v47 = vrot.slane %v1526_v30, 1 }
  0x38   : > { %9049 = vst [vmem:[#allocation3_spill] sm:$0xff] %v7281_v32 }
  0x39   : > { %v1534_v3 = vshll.u32 %v7362_v37, 16 }
  0x3e   : > { %6430 = vmatmul.mubr.msk.bf16.gmra.mrb[20].mxu0 %vm8989_vm0, %v406_v38  ;;  %v1490_v38 = vshrl.u32 %v6000_v25, 16  ;;  %v1506_v25 = vshrl.u32 %v7287_v42, 16 }
  0x3f   : > { %6433 = vmatprep.mubr.msk.bf16.mxu0 %vm8989_vm0, %v407_v39  ;;  %v1494_v39 = vshll.u32 %v6001_v28, 16 }
  0x40   : > { %v7367_v42 = vor.u32 %v1506_v25, %v1504_v15  ;;  %v974_v25 = vand.u32 15, %v782_v61  ;;  %v786_v61 = vadd.s32 240, %v7259_v57 }
  0x41   : > { %v1496_v50 = vrot.slane %v1494_v39, 1  ;;  %v1510_v39 = vshll.u32 %v7343_v21, 16 }
  0x43   : > { %v1500_v14 = vor.u32 %v1498_v51, %v1496_v50 }
  0x45   : > { %v7358_v35 = vsel %vm8997_vm5, %v1500_v14, %v1504_v15  ;;  %v1524_v14 = vor.u32 %v1522_v41, %v7339_v19  ;;  %v7420_v41 = vcombine.low %v1412_v5, %v7268_v10 }
  0x46   : > { %6434 = vmatmul.mubr.msk.bf16.gmra.mrb[24].mxu0 %vm8989_vm0, %v408_v44  ;;  %v1488_v44 = vrot.slane %v1486_v33, 1  ;;  %9058 = vst [vmem:[#allocation8_spill] sm:$0xff] %v7358_v35 }
  0x47   : > { %6437 = vmatprep.mubr.msk.bf16.mxu0 %vm8989_vm0, %v409_v45  ;;  %v1476_v45 = vor.u32 %v7281_v32, %v1471_v31  ;;  %v946_v31 = vand.u32 15, %v778_v6  ;;  %v1542_v5 = vshll.u32 %v7420_v41, 16 }
  0x48   : > { %v7311_v1 = vsel %vm8997_vm5, %v1484_v46, %v1488_v44 }
  0x49   : > { %v7308_v0 = vsel %vm8997_vm5, %v1476_v45, %v1480_v36  ;;  %9051 = vst [vmem:[#allocation5_spill] sm:$0xff] %v7311_v1 }
  0x4a   : > { %9050 = vst [vmem:[#allocation4_spill] sm:$0xff] %v7308_v0 }
  0x4e   : > { %6438 = vmatmul.mubr.msk.bf16.gmra.mrb[28].mxu0 %vm8989_vm0, %v410_v48  ;;  %v1492_v48 = vor.u32 %v1490_v38, %v1488_v44  ;;  %v960_v38 = vand.u32 15, %v780_v20  ;;  %v1514_v44 = vshrl.u32 %v7343_v21, 16  ;;  %v2308_v20 = vsel %vm1966_vm1, %v7255_v55, 0 }
  0x4f   : > { %6443 = vmatprep.mubr.bf16.mxu0 %v8963_v49 }
  0x50   : > { %v7332_v13 = vsel %vm8997_vm5, %v1492_v48, %v1496_v50  ;;  %v1194_v50 = vadd.s32 4294967295, %v946_v31  ;;  %v1196_v4 = vadd.s32 4294967295, %v960_v38  ;;  %v1532_v31 = vor.u32 %v1530_v60, %v1528_v47 }
  0x51   : > { %9054 = vst [vmem:[#allocation6_spill] sm:$0xff] %v7332_v13  ;;  %vm9001_vm0 = vcmp.ne.s16.totalorder %v7332_v13, 0 }
  0x52   : > { %vm1226_vm13 = vcmp.ge.s32.totalorder %v1194_v50, 0  ;;  %vm1228_vm14 = vcmp.ge.s32.totalorder %v1196_v4, 0  ;;  %v1198_v50 = vadd.s32 4294967295, %v974_v25  ;;  %v1002_v25 = vand.u32 15, %v786_v61 }
  0x53   : > { %vm7424_vm15 = vmpackc.low %vm1226_vm13, %vm1226_vm13 }
  0x54   : > { %vm7435_vm2 = vmpackc.low %vm1228_vm14, %vm1228_vm14  ;;  %v1414_v4 = vsel %vm7424_vm15, 65537, %v8963_v49  ;;  %vm1230_vm3 = vcmp.ge.s32.totalorder %v1198_v50, 0  ;;  %vm2131_vm15 = vsmask.f32 256 }
  0x55   : > { %vm7486_vm4 = vmpackc.low %vm1230_vm3, %vm1230_vm3 }
  0xe9   : > { %v6411_v9 = vpop.f32.mrb[0].mxu0 }
  0xea   : > { %v638_v16 = vmul.f32 %v6411_v9, %v7305_v63  ;;  %v502_v17 = vpop.f32.mrb[1].mxu0 }
  0xeb   : > { %v636_v22 = vmul.f32 %v7305_v63, %v502_v17  ;;  %v6412_v23 = vpop.f32.mrb[2].mxu0 }
  0xec   : > { %v677_v27 = vadd.f32 %v7329_v11, %v638_v16  ;;  %v639_v28 = vmul.f32 %v6412_v23, %v7305_v63  ;;  %v505_v29 = vpop.f32.mrb[3].mxu0 }
  0xed   : > { %v675_v33 = vadd.f32 %v7329_v11, %v636_v22  ;;  %v637_v34 = vmul.f32 %v7305_v63, %v505_v29  ;;  %v784_v29 = vadd.s32 224, %v7259_v57 }
  0xee   : > { %v678_v36 = vadd.f32 %v7329_v11, %v639_v28  ;;  %v709_v45 = vmax.f32 %v677_v27, 0.0  ;;  %v7401_v27 = vld [vmem:[%s8956_s4 + $0x4] sm:$0x3] }
  0xef   : > { %v676_v40 = vadd.f32 %v7329_v11, %v637_v34  ;;  %v707_v51 = vmax.f32 %v675_v33, 0.0  ;;  %v1512_v33 = vrot.slane %v1510_v39, 1  ;;  %v7417_v34 = vadd.s32 1, %v813_v8 }
  0xf0   : > { %v710_v46 = vmax.f32 %v678_v36, 0.0  ;;  %v7431_v8 = vsel %vm8997_vm5, %v1524_v14, %v1528_v47  ;;  %v988_v60 = vand.u32 15, %v784_v29 }
  0xf1   : > { %v708_v58 = vmax.f32 %v676_v40, 0.0  ;;  %v6415_v59 = vpop.f32.mrb[4].mxu0  ;;  %v1536_v40 = vrot.slane %v1534_v3, 1  ;;  %9064 = vst [vmem:[#allocation10_spill] sm:$0xff] %v7431_v8  ;;  %v1538_v3 = vshrl.u32 %v7362_v37, 16  ;;  %vm9035_vm6 = vcmp.ne.s16.totalorder %v7431_v8, 0 }
  0xf2   : > { %v7376_v43 = vpack.c.bf16 %v710_v46, %v709_v45  ;;  %v642_v62 = vmul.f32 %v6415_v59, %v7305_v63  ;;  %v518_v2 = vpop.f32.mrb[5].mxu0 }
  0xf3   : > { %v7380_v6 = vpack.c.bf16 %v708_v58, %v707_v51  ;;  %v640_v9 = vmul.f32 %v7305_v63, %v518_v2  ;;  %v6416_v12 = vpop.f32.mrb[6].mxu0  ;;  %v7475_v29 = vsel %vm8997_vm5, %v1532_v31, %v1536_v40 }
  0xf4   : > { %v681_v15 = vadd.f32 %v7329_v11, %v642_v62  ;;  %v643_v16 = vmul.f32 %v6416_v12, %v7305_v63  ;;  %v521_v17 = vpop.f32.mrb[7].mxu0  ;;  %v7409_v55 = vsel %vm7335_vm9, %v7376_v43, 0  ;;  %9069 = vst [vmem:[#allocation13_spill] sm:$0xff] %v7475_v29  ;;  %vm9034_vm14 = vcmp.ne.s16.totalorder %v7475_v29, 0 }
  0xf5   : > { %v679_v22 = vadd.f32 %v7329_v11, %v640_v9  ;;  %v641_v23 = vmul.f32 %v7305_v63, %v521_v17  ;;  %v7396_v24 = vsel %vm7335_vm9, %v7380_v6, 0  ;;  %9061 = vst [vmem:[#allocation9_spill] sm:$0xff] %v7409_v55 }
  0xf6   : > { %v682_v28 = vadd.f32 %v7329_v11, %v643_v16  ;;  %6444 = vmatmul.mubr.msk.bf16.vlgmr.msra.gmra.mrb[32].mxu0 %vm1917_vm10, %v7396_v24  ;;  %v713_v36 = vmax.f32 %v681_v15, 0.0  ;;  %v1416_v15 = vsel %vm7435_vm2, 65537, %v8963_v49 }
  0xf7   : > { %v680_v30 = vadd.f32 %v7329_v11, %v641_v23  ;;  %6447 = vmatprep.mubr.msk.bf16.mxu0 %vm1917_vm10, %v7409_v55  ;;  %6476 = vmatpush3.bf16.msra.mxu0 %v2308_v20  ;;  %v711_v39 = vmax.f32 %v679_v22, 0.0  ;;  %v1200_v23 = vadd.s32 4294967295, %v988_v60 }
  0xf8   : > { %v714_v38 = vmax.f32 %v682_v28, 0.0  ;;  %7041 = vmatprep.subr.msk.bf16.mxu0 %vm1966_vm1, %v7401_v27 }
  0xf9   : > { %v712_v46 = vmax.f32 %v680_v30, 0.0  ;;  %v6419_v56 = vpop.f32.mrb[8].mxu0  ;;  %v7479_v30 = vsel %vm8997_vm5, %v7367_v42, %v1512_v33  ;;  %v1544_v42 = vrot.slane %v1542_v5, 1  ;;  %vm1232_vm7 = vcmp.ge.s32.totalorder %v1200_v23, 0 }
  0xfa   : > { %v7439_v51 = vpack.c.bf16 %v714_v38, %v713_v36  ;;  %v646_v58 = vmul.f32 %v6419_v56, %v7305_v63  ;;  %v534_v59 = vpop.f32.mrb[9].mxu0  ;;  %v7483_v36 = vor.u32 %v1514_v44, %v1512_v33  ;;  %vm1390_vm8 = vmpackc.low %vm1232_vm7, %vm1232_vm7  ;;  %vm8996_vm7 = vcmp.ne.s16.totalorder %v7311_v1, 0 }
  0xfb   : > { %v7443_v62 = vpack.c.bf16 %v712_v46, %v711_v39  ;;  %v644_v47 = vmul.f32 %v7305_v63, %v534_v59  ;;  %v6420_v2 = vpop.f32.mrb[10].mxu0  ;;  %v1540_v39 = vor.u32 %v1538_v3, %v1536_v40  ;;  %v6008_v46 = vcombine.low %v1414_v4, %v7268_v10 }
  0xfc   : > { %v685_v9 = vadd.f32 %v7329_v11, %v646_v58  ;;  %v647_v12 = vmul.f32 %v6420_v2, %v7305_v63  ;;  %v537_v14 = vpop.f32.mrb[11].mxu0  ;;  %v7469_v22 = vsel %vm7335_vm9, %v7439_v51, 0  ;;  %v7492_v58 = vcombine.low %v1416_v15, %v7268_v10 }
  0xfd   : > { %v683_v16 = vadd.f32 %v7329_v11, %v644_v47  ;;  %v645_v17 = vmul.f32 %v7305_v63, %v537_v14  ;;  %v7461_v37 = vsel %vm7335_vm9, %v7443_v62, 0  ;;  %9068 = vst [vmem:[#allocation12_spill] sm:$0xff] %v7469_v22  ;;  %v1202_v40 = vadd.s32 4294967295, %v1002_v25 }
  0xfe   : > { %9067 = vst [vmem:[#allocation11_spill] sm:$0xff] %v7461_v37  ;;  %v686_v20 = vadd.f32 %v7329_v11, %v647_v12  ;;  %6448 = vmatmul.mubr.msk.bf16.gmra.mrb[36].mxu0 %vm1917_vm10, %v7461_v37  ;;  %v717_v38 = vmax.f32 %v685_v9, 0.0  ;;  %v1546_v47 = vshrl.u32 %v7420_v41, 16  ;;  %v1418_v2 = vsel %vm7486_vm4, 65537, %v8963_v49 }
  0xff   : > { %v684_v28 = vadd.f32 %v7329_v11, %v645_v17  ;;  %6451 = vmatprep.mubr.msk.bf16.mxu0 %vm1917_vm10, %v7469_v22  ;;  %v715_v48 = vmax.f32 %v683_v16, 0.0  ;;  %v7507_v12 = vsel %vm8997_vm5, %v1540_v39, %v1544_v42  ;;  %v1550_v14 = vshll.u32 %v6008_v46, 16 }
 0x100   : > { %v718_v45 = vmax.f32 %v686_v20, 0.0  ;;  %9072 = vst [vmem:[#allocation14_spill] sm:$0xff] %v7507_v12  ;;  %v1558_v16 = vshll.u32 %v7492_v58, 16  ;;  %v7528_v25 = vcombine.low %v1418_v2, %v7268_v10  ;;  %vm1234_vm11 = vcmp.ge.s32.totalorder %v1202_v40, 0 }
 0x101   : > { %v716_v31 = vmax.f32 %v684_v28, 0.0  ;;  %v6423_v50 = vpop.f32.mrb[12].mxu0  ;;  %v1548_v23 = vor.u32 %v1546_v47, %v1544_v42  ;;  %vm9017_vm12 = vcmp.ne.s16.totalorder %v7507_v12, 0  ;;  %v1562_v40 = vshrl.u32 %v7492_v58, 16  ;;  %vm7539_vm13 = vmpackc.low %vm1234_vm11, %vm1234_vm11 }
 0x102   : > { %v7494_v21 = vpack.c.bf16 %v718_v45, %v717_v38  ;;  %v650_v44 = vmul.f32 %v6423_v50, %v7305_v63  ;;  %v550_v33 = vpop.f32.mrb[13].mxu0  ;;  %v1554_v38 = vshrl.u32 %v6008_v46, 16  ;;  %v7534_v45 = vadd.s32 40, %v7259_v57 }
 0x103   : > { %v7497_v59 = vpack.c.bf16 %v716_v31, %v715_v48  ;;  %v648_v60 = vmul.f32 %v7305_v63, %v550_v33  ;;  %v6424_v61 = vpop.f32.mrb[14].mxu0  ;;  %v1552_v48 = vrot.slane %v1550_v14, 1  ;;  %v1420_v31 = vsel %vm1390_vm8, 65537, %v8963_v49 }
 0x104   : > { %v689_v3 = vadd.f32 %v7329_v11, %v650_v44  ;;  %v651_v4 = vmul.f32 %v6424_v61, %v7305_v63  ;;  %v553_v9 = vpop.f32.mrb[15].mxu0  ;;  %v7525_v20 = vsel %vm7335_vm9, %v7494_v21, 0  ;;  %v1560_v47 = vrot.slane %v1558_v16, 1 }
 0x105   : > { %v687_v5 = vadd.f32 %v7329_v11, %v648_v60  ;;  %v649_v15 = vmul.f32 %v7305_v63, %v553_v9  ;;  %v7514_v41 = vsel %vm7335_vm9, %v7497_v59, 0  ;;  %9074 = vst [vmem:[#allocation16_spill] sm:$0xff] %v7525_v20  ;;  %v1566_v2 = vshll.u32 %v7528_v25, 16 }
 0x106   : > { %9073 = vst [vmem:[#allocation15_spill] sm:$0xff] %v7514_v41  ;;  %v690_v17 = vadd.f32 %v7329_v11, %v651_v4  ;;  %6452 = vmatmul.mubr.msk.bf16.gmra.mrb[40].mxu0 %vm1917_vm10, %v7514_v41  ;;  %v721_v39 = vmax.f32 %v689_v3, 0.0  ;;  %v1556_v14 = vor.u32 %v1554_v38, %v1552_v48  ;;  %v6011_v58 = vcombine.low %v1420_v31, %v7268_v10 }
 0x107   : > { %v688_v28 = vadd.f32 %v7329_v11, %v649_v15  ;;  %6455 = vmatprep.mubr.msk.bf16.mxu0 %vm1917_vm10, %v7525_v20  ;;  %v719_v50 = vmax.f32 %v687_v5, 0.0  ;;  %v1568_v60 = vrot.slane %v1566_v2, 1  ;;  %vm8991_vm4 = vcmp.ne.s16.totalorder %v7308_v0, 0 }
 0x108   : > { %v722_v56 = vmax.f32 %v690_v17, 0.0 }
 0x109   : > { %v720_v44 = vmax.f32 %v688_v28, 0.0  ;;  %v6427_v33 = vpop.f32.mrb[16].mxu0  ;;  %v1422_v28 = vsel %vm7539_vm13, 65537, %v8963_v49  ;;  %v7581_v49 = vsel %vm8997_vm5, %v1556_v14, %v1560_v47  ;;  %v1570_v14 = vshrl.u32 %v7528_v25, 16 }
 0x10a   : > { %v7543_v46 = vpack.c.bf16 %v722_v56, %v721_v39  ;;  %v654_v42 = vmul.f32 %v6427_v33, %v7305_v63  ;;  %v566_v61 = vpop.f32.mrb[17].mxu0  ;;  %v1564_v33 = vor.u32 %v1562_v40, %v1560_v47  ;;  %9079 = vst [vmem:[#allocation19_spill] sm:$0xff] %v7581_v49  ;;  %v7584_v32 = vcombine.low %v1422_v28, %v7268_v10 }
 0x10b   : > { %v7547_v3 = vpack.c.bf16 %v720_v44, %v719_v50  ;;  %v652_v4 = vmul.f32 %v7305_v63, %v566_v61  ;;  %v6428_v9 = vpop.f32.mrb[18].mxu0  ;;  %vm8990_vm2 = vcmp.ne.s16.totalorder %v7581_v49, 0 }
 0x10c   : > { %v693_v5 = vadd.f32 %v7329_v11, %v654_v42  ;;  %v655_v15 = vmul.f32 %v6428_v9, %v7305_v63  ;;  %v569_v17 = vpop.f32.mrb[19].mxu0  ;;  %v3327_v16 = vsel %vm9035_vm6, %v7543_v46, 0  ;;  %v7573_v44 = vsel %vm7335_vm9, %v7543_v46, 0 }
 0x10d   : > { %v691_v39 = vadd.f32 %v7329_v11, %v652_v4  ;;  %v653_v38 = vmul.f32 %v7305_v63, %v569_v17  ;;  %v7565_v56 = vsel %vm7335_vm9, %v7547_v3, 0  ;;  %v3395_v31 = vshrl.u32 %v3327_v16, 16  ;;  %9078 = vst [vmem:[#allocation18_spill] sm:$0xff] %v7573_v44  ;;  %v9101_v29 = vld [vmem:[#allocation15_spill] sm:$0xff] }
 0x10e   : > { %9077 = vst [vmem:[#allocation17_spill] sm:$0xff] %v7565_v56  ;;  %v694_v50 = vadd.f32 %v7329_v11, %v655_v15  ;;  %6456 = vmatmul.mubr.msk.bf16.gmra.mrb[44].mxu0 %vm1917_vm10, %v7565_v56  ;;  %v3398_v4 = vshll.u32 %v3327_v16, 16  ;;  %v1574_v9 = vshll.u32 %v6011_v58, 16  ;;  %v725_v15 = vmax.f32 %v693_v5, 0.0 }
 0x10f   : > { %v692_v42 = vadd.f32 %v7329_v11, %v653_v38  ;;  %6459 = vmatprep.mubr.msk.bf16.mxu0 %vm1917_vm10, %v7573_v44  ;;  %v7578_v61 = vrot.slane %v3395_v31, 7  ;;  %v723_v53 = vmax.f32 %v691_v39, 0.0  ;;  %v7590_v44 = vsel %vm8997_vm5, %v1548_v23, %v1552_v48 }
 0x110   : > { %v726_v17 = vmax.f32 %v694_v50, 0.0  ;;  %9081 = vst [vmem:[#allocation21_spill] sm:$0xff] %v7590_v44  ;;  %v7596_v47 = vsel %vm8997_vm5, %v1564_v33, %v1568_v60  ;;  %v1576_v23 = vrot.slane %v1574_v9, 1  ;;  %v1578_v48 = vshrl.u32 %v6011_v58, 16 }
 0x111   : > { %v724_v40 = vmax.f32 %v692_v42, 0.0  ;;  %v6431_v2 = vpop.f32.mrb[20].mxu0  ;;  %v7587_v38 = vor.u32 %v3398_v4, %v7578_v61  ;;  %9083 = vst [vmem:[#allocation23_spill] sm:$0xff] %v7596_v47  ;;  %vm9016_vm3 = vcmp.ne.s16.totalorder %v7590_v44, 0  ;;  %vm9023_vm8 = vcmp.ne.s16.totalorder %v7596_v47, 0 }
 0x112   : > { %v7592_v31 = vpack.c.bf16 %v726_v17, %v725_v15  ;;  %v658_v5 = vmul.f32 %v6431_v2, %v7305_v63  ;;  %v582_v16 = vpop.f32.mrb[21].mxu0 }
 0x113   : > { %9080 = vst [vmem:[#allocation20_spill] sm:$0xff] %v7587_v38  ;;  %v7599_v28 = vpack.c.bf16 %v724_v40, %v723_v53  ;;  %v656_v39 = vmul.f32 %v7305_v63, %v582_v16  ;;  %v6432_v50 = vpop.f32.mrb[22].mxu0  ;;  %v1582_v53 = vshll.u32 %v7584_v32, 16  ;;  %v1572_v16 = vor.u32 %v1570_v14, %v1568_v60 }
 0x114   : > { %9082 = vst [vmem:[#allocation22_spill] sm:$0xff] %v7592_v31  ;;  %v697_v42 = vadd.f32 %v7329_v11, %v658_v5  ;;  %v659_v4 = vmul.f32 %v6432_v50, %v7305_v63  ;;  %v585_v15 = vpop.f32.mrb[23].mxu0  ;;  %v3329_v33 = vsel %vm9017_vm12, %v7592_v31, 0  ;;  %v7626_v2 = vsel %vm7335_vm9, %v7592_v31, 0 }
 0x115   : > { %9084 = vst [vmem:[#allocation24_spill] sm:$0xff] %v7599_v28  ;;  %v695_v25 = vadd.f32 %v7329_v11, %v656_v39  ;;  %v657_v17 = vmul.f32 %v7305_v63, %v585_v15  ;;  %v7614_v9 = vsel %vm7335_vm9, %v7599_v28, 0  ;;  %v3328_v58 = vsel %vm9034_vm14, %v7599_v28, 0  ;;  %9086 = vst [vmem:[#allocation26_spill] sm:$0xff] %v7626_v2 }
 0x116   : > { %9085 = vst [vmem:[#allocation25_spill] sm:$0xff] %v7614_v9  ;;  %v698_v40 = vadd.f32 %v7329_v11, %v659_v4  ;;  %6460 = vmatmul.mubr.msk.bf16.gmra.mrb[48].mxu0 %vm1917_vm10, %v7614_v9  ;;  %v3403_v5 = vshrl.u32 %v3328_v58, 16  ;;  %v3411_v50 = vshrl.u32 %v3329_v33, 16  ;;  %v3785_v15 = vsel %vm1966_vm1, %v7248_v54, 0 }
 0x117   : > { %v696_v39 = vadd.f32 %v7329_v11, %v657_v17  ;;  %6463 = vmatprep.mubr.msk.bf16.mxu0 %vm1917_vm10, %v7626_v2  ;;  %v1580_v4 = vor.u32 %v1578_v48, %v1576_v23  ;;  %v729_v38 = vmax.f32 %v697_v42, 0.0  ;;  %v3406_v20 = vshll.u32 %v3328_v58, 16 }
 0x118   : > { %v730_v56 = vmax.f32 %v698_v40, 0.0  ;;  %v3405_v9 = vrot.slane %v3403_v5, 7  ;;  %v727_v41 = vmax.f32 %v695_v25, 0.0  ;;  %v7633_v12 = vrot.slane %v3411_v50, 7 }
 0x119   : > { %v728_v22 = vmax.f32 %v696_v39, 0.0  ;;  %v6435_v31 = vpop.f32.mrb[24].mxu0  ;;  %v3414_v60 = vshll.u32 %v3329_v33, 16  ;;  %v1584_v54 = vrot.slane %v1582_v53, 1  ;;  %v1586_v40 = vshrl.u32 %v7584_v32, 16 }
 0x11a   : > { %v7636_v14 = vpack.c.bf16 %v730_v56, %v729_v38  ;;  %v662_v17 = vmul.f32 %v6435_v31, %v7305_v63  ;;  %v598_v2 = vpop.f32.mrb[25].mxu0  ;;  %v3408_v28 = vor.u32 %v3406_v20, %v3405_v9  ;;  %v7649_v20 = vsel %vm8997_vm5, %v1572_v16, %v1576_v23 }
 0x11b   : > { %v7639_v48 = vpack.c.bf16 %v728_v22, %v727_v41  ;;  %v660_v42 = vmul.f32 %v7305_v63, %v598_v2  ;;  %v6436_v58 = vpop.f32.mrb[26].mxu0  ;;  %v3416_v25 = vor.u32 %v3414_v60, %v7633_v12  ;;  %9087 = vst [vmem:[#allocation27_spill] sm:$0xff] %v7649_v20  ;;  %vm9021_vm11 = vcmp.ne.s16.totalorder %v7649_v20, 0 }
 0x11c   : > { %v701_v33 = vadd.f32 %v7329_v11, %v662_v17  ;;  %v663_v5 = vmul.f32 %v6436_v58, %v7305_v63  ;;  %v601_v56 = vpop.f32.mrb[27].mxu0  ;;  %v3409_v38 = vsel %vm2131_vm15, %v7578_v61, %v3408_v28  ;;  %v7665_v61 = vld [vmem:[%s8956_s4 + $0xa] sm:$0x3]  ;;  %v7674_v23 = vsel %vm7335_vm9, %v7636_v14, 0 }
 0x11d   : > { %v699_v22 = vadd.f32 %v7329_v11, %v660_v42  ;;  %v661_v41 = vmul.f32 %v7305_v63, %v601_v56  ;;  %6561 = vmatprep.mubr.msk.bf16.mxu1 %vm1917_vm10, %v3409_v38  ;;  %v7658_v32 = vsel %vm7335_vm9, %v7639_v48, 0  ;;  %v3417_v31 = vsel %vm2131_vm15, %v3405_v9, %v3416_v25  ;;  %9089 = vst [vmem:[#allocation29_spill] sm:$0xff] %v7674_v23 }
 0x11e   : > { %9088 = vst [vmem:[#allocation28_spill] sm:$0xff] %v7658_v32  ;;  %v702_v28 = vadd.f32 %v7329_v11, %v663_v5  ;;  %6464 = vmatmul.mubr.msk.bf16.gmra.mrb[52].mxu0 %vm1917_vm10, %v7658_v32  ;;  %6562 = vmatmul.mubr.msk.bf16.vlgmr.msra.gmra.mrb[0].mxu1 %vm1917_vm10, %v3417_v31  ;;  %v3330_v53 = vsel %vm9016_vm3, %v7639_v48, 0  ;;  %v3331_v9 = vsel %vm8990_vm2, %v7636_v14, 0  ;;  %v7686_v39 = vor.u32 %v1586_v40, %v1584_v54 }
 0x11f   : > { %v700_v2 = vadd.f32 %v7329_v11, %v661_v41  ;;  %6578 = vmatpush3.bf16.msra.mxu1 %v3785_v15  ;;  %6467 = vmatprep.mubr.msk.bf16.mxu0 %vm1917_vm10, %v7674_v23  ;;  %v3419_v16 = vshrl.u32 %v3330_v53, 16  ;;  %v733_v50 = vmax.f32 %v701_v33, 0.0  ;;  %v3427_v17 = vshrl.u32 %v3331_v9, 16 }
 0x120   : > { %v734_v60 = vmax.f32 %v702_v28, 0.0  ;;  %v7689_v42 = vsel %vm8997_vm5, %v1580_v4, %v1584_v54  ;;  %7045 = vmatprep.subr.msk.bf16.mxu1 %vm1966_vm1, %v7665_v61  ;;  %v731_v58 = vmax.f32 %v699_v22, 0.0  ;;  %v3422_v56 = vshll.u32 %v3330_v53, 16 }
 0x121   : > { %9090 = vst [vmem:[#allocation30_spill] sm:$0xff] %v7689_v42  ;;  %v732_v25 = vmax.f32 %v700_v2, 0.0  ;;  %v6439_v15 = vpop.f32.mrb[28].mxu0  ;;  %v3421_v5 = vrot.slane %v3419_v16, 7  ;;  %v3429_v31 = vrot.slane %v3427_v17, 7  ;;  %v3430_v33 = vshll.u32 %v3331_v9, 16 }
 0x122   : > { %v7693_v38 = vpack.c.bf16 %v734_v60, %v733_v50  ;;  %v666_v41 = vmul.f32 %v6439_v15, %v7305_v63  ;;  %v614_v40 = vpop.f32.mrb[29].mxu0  ;;  %vm9007_vm13 = vcmp.ne.s16.totalorder %v7686_v39, 0  ;;  %v1604_v9 = vsel %vm8991_vm4, %v7380_v6, 0 }
 0x123   : > { %v7696_v28 = vpack.c.bf16 %v732_v25, %v731_v58  ;;  %v664_v4 = vmul.f32 %v7305_v63, %v614_v40  ;;  %v6440_v54 = vpop.f32.mrb[30].mxu0  ;;  %v3424_v23 = vor.u32 %v3422_v56, %v3421_v5  ;;  %v3432_v16 = vor.u32 %v3430_v33, %v3429_v31 }
 0x124   : > { %v705_v22 = vadd.f32 %v7329_v11, %v666_v41  ;;  %v667_v53 = vmul.f32 %v6440_v54, %v7305_v63  ;;  %v617_v2 = vpop.f32.mrb[31].mxu0  ;;  %vm9004_vm2 = vcmp.ne.s16.totalorder %v7358_v35, 0  ;;  %vm2536_vm4 = vcmp.lt.s32.totalorder %v7350_v26, 16 }
 0x125   : > { %v703_v50 = vadd.f32 %v7329_v11, %v664_v4  ;;  %v665_v60 = vmul.f32 %v7305_v63, %v617_v2  ;;  %v3425_v17 = vsel %vm2131_vm15, %v7633_v12, %v3424_v23  ;;  %v7714_v58 = vsel %vm7335_vm9, %v7696_v28, 0 }
 0x126   : > { %9091 = vst [vmem:[#allocation31_spill] sm:$0xff] %v7714_v58  ;;  %v706_v25 = vadd.f32 %v7329_v11, %v667_v53  ;;  %6565 = vmatprep.mubr.msk.bf16.mxu1 %vm1917_vm10, %v3425_v17  ;;  %6468 = vmatmul.mubr.msk.bf16.gmra.mrb[56].mxu0 %vm1917_vm10, %v7714_v58  ;;  %v3433_v15 = vsel %vm2131_vm15, %v3421_v5, %v3432_v16  ;;  %v7724_v63 = vsel %vm7335_vm9, %v7693_v38, 0  ;;  %v3332_v12 = vsel %vm9023_vm8, %v7696_v28, 0 }
 0x127   : > { %9092 = vst [vmem:[#allocation32_spill] sm:$0xff] %v7724_v63  ;;  %v704_v23 = vadd.f32 %v7329_v11, %v665_v60  ;;  %6566 = vmatmul.mubr.msk.bf16.gmra.mrb[4].mxu1 %vm1917_vm10, %v3433_v15  ;;  %6471 = vmatprep.mubr.msk.bf16.mxu0 %vm1917_vm10, %v7724_v63  ;;  %v3435_v56 = vshrl.u32 %v3332_v12, 16  ;;  %v2140_v5 = vshrl.u32 %v1604_v9, 16  ;;  %v1605_v41 = vsel %vm8996_vm7, %v7376_v43, 0 }
 0x128   : > { %v737_v40 = vmax.f32 %v705_v22, 0.0  ;;  %v735_v33 = vmax.f32 %v703_v50, 0.0  ;;  %v738_v4 = vmax.f32 %v706_v25, 0.0  ;;  %v3333_v54 = vsel %vm9021_vm11, %v7693_v38, 0 }
 0x129   : > { %v736_v53 = vmax.f32 %v704_v23, 0.0  ;;  %v3437_v11 = vrot.slane %v3435_v56, 7  ;;  %v3438_v2 = vshll.u32 %v3332_v12, 16  ;;  %v3443_v16 = vshrl.u32 %v3333_v54, 16 }
 0x12a   : > { %v7740_v60 = vpack.c.bf16 %v738_v4, %v737_v40  ;;  %v2148_v17 = vshrl.u32 %v1605_v41, 16  ;;  %v7745_v15 = vsel %vm8997_vm5, %v7483_v36, %v7339_v19  ;;  %v827_v22 = vand.u32 15, %v7534_v45 }
 0x12b   : > { %9094 = vst [vmem:[#allocation34_spill] sm:$0xff] %v7745_v15  ;;  %v7748_v50 = vpack.c.bf16 %v736_v53, %v735_v33  ;;  %v3440_v25 = vor.u32 %v3438_v2, %v3437_v11  ;;  %v3445_v1 = vrot.slane %v3443_v16, 7  ;;  %v3446_v0 = vshll.u32 %v3333_v54, 16 }
 0x12c   : > { %9093 = vst [vmem:[#allocation33_spill] sm:$0xff] %v7740_v60  ;;  %vm9008_vm7 = vcmp.ne.s16.totalorder %v7689_v42, 0  ;;  %v2142_v23 = vrot.slane %v2140_v5, 7  ;;  %v3335_v12 = vsel %vm9007_vm13, %v7740_v60, 0  ;;  %v763_v56 = vadd.s32 56, %v7259_v57 }
 0x12d   : > { %v3441_v40 = vsel %vm2131_vm15, %v3429_v31, %v3440_v25  ;;  %v7759_v19 = vsel %vm7335_vm9, %v7748_v50, 0  ;;  %v3448_v36 = vor.u32 %v3446_v0, %v3445_v1  ;;  %v3334_v45 = vsel %vm9008_vm7, %v7748_v50, 0 }
 0x12e   : > { %9095 = vst [vmem:[#allocation35_spill] sm:$0xff] %v7759_v19  ;;  %6569 = vmatprep.mubr.msk.bf16.mxu1 %vm1917_vm10, %v3441_v40  ;;  %6472 = vmatmul.mubr.msk.bf16.gmra.mrb[60].mxu0 %vm1917_vm10, %v7759_v19  ;;  %v3451_v5 = vshrl.u32 %v3334_v45, 16  ;;  %v3459_v33 = vshrl.u32 %v3335_v12, 16  ;;  %v2150_v4 = vrot.slane %v2148_v17, 7  ;;  %v1606_v31 = vsel %vm9001_vm0, %v7443_v62, 0  ;;  %vm2664_vm0 = vmpackc.low %vm2536_vm4, %vm2536_vm4 }
 0x12f   : > { %v3449_v54 = vsel %vm2131_vm15, %v3437_v11, %v3448_v36  ;;  %6477 = vmatprep.mubr.msk.bf16.mxu0 %vm1917_vm10, %v7323_v7  ;;  %v2143_v0 = vshll.u32 %v1604_v9, 16  ;;  %v1607_v53 = vsel %vm9004_vm2, %v7439_v51, 0  ;;  %vm2538_vm5 = vcmp.lt.s32.totalorder %v7417_v34, 16 }
 0x130   : > { %6570 = vmatmul.mubr.msk.bf16.gmra.mrb[8].mxu1 %vm1917_vm10, %v3449_v54  ;;  %v3453_v2 = vrot.slane %v3451_v5, 7  ;;  %v3454_v16 = vshll.u32 %v3334_v45, 16  ;;  %v3461_v17 = vrot.slane %v3459_v33, 7  ;;  %v2151_v25 = vshll.u32 %v1605_v41, 16  ;;  %vm2666_vm2 = vmpackc.low %vm2538_vm5, %vm2538_vm5 }
 0x131   : > { %v2145_v40 = vor.u32 %v2143_v0, %v2142_v23  ;;  %v3462_v13 = vshll.u32 %v3335_v12, 16  ;;  %v2156_v18 = vshrl.u32 %v1606_v31, 16  ;;  %v841_v9 = vand.u32 15, %v763_v56 }
 0x132   : > { %v3456_v11 = vor.u32 %v3454_v16, %v3453_v2  ;;  %v2153_v36 = vor.u32 %v2151_v25, %v2150_v4  ;;  %v2164_v35 = vshrl.u32 %v1607_v53, 16  ;;  %v2476_v60 = vadd.s32 1, %v827_v22 }
 0x133   : > { %v3464_v34 = vor.u32 %v3462_v13, %v3461_v17  ;;  %vm1593_vm13 = vcmp.ne.s16.totalorder %v7479_v30, 0  ;;  %vm1594_vm7 = vcmp.ne.s16.totalorder %v7745_v15, 0  ;;  %v9096_v41 = vmov 0  }
 0x134   : > { %v3457_v45 = vsel %vm2131_vm15, %v3445_v1, %v3456_v11  ;;  %v2696_v12 = vsel %vm2664_vm0, 65537, %v9096_v41  ;;  %v3109_v26 = vsel %vm1966_vm1, %v7401_v27, 0  ;;  %v2146_v56 = vsel %vm2131_vm15, %v7323_v7, %v2145_v40 }
 0x135   : > { %6573 = vmatprep.mubr.msk.bf16.mxu1 %vm1917_vm10, %v3457_v45  ;;  %v2158_v5 = vrot.slane %v2156_v18, 7  ;;  %v2698_v22 = vsel %vm2666_vm2, 65537, %v9096_v41  ;;  %v2478_v13 = vadd.s32 1, %v841_v9  ;;  %v2154_v1 = vsel %vm2131_vm15, %v2142_v23, %v2153_v36 }
 0x136   : > { %6478 = vmatmul.mubr.msk.bf16.vlgmr.msra.gmra.mrb[32].mxu0 %vm1917_vm10, %v2146_v56  ;;  %v7793_v33 = vrot.slane %v2164_v35, 7  ;;  %v1608_v54 = vsel %vm1593_vm13, %v7497_v59, 0  ;;  %vm2540_vm0 = vcmp.lt.s32.totalorder %v2476_v60, 16  ;;  %v3465_v27 = vsel %vm2131_vm15, %v3453_v2, %v3464_v34 }
 0x137   : > { %6481 = vmatprep.mubr.msk.bf16.mxu0 %vm1917_vm10, %v2154_v1  ;;  %v2159_v0 = vshll.u32 %v1606_v31, 16  ;;  %v1609_v18 = vsel %vm1594_vm7, %v7494_v21, 0  ;;  %6510 = vmatpush3.bf16.msra.mxu0 %v3109_v26  ;;  %v2167_v23 = vshll.u32 %v1607_v53, 16  ;;  %v7805_v35 = vcombine.low %v7268_v10, %v2696_v12  ;;  %vm2668_vm5 = vmpackc.low %vm2540_vm0, %vm2540_vm0 }
 0x138   : > { %6574 = vmatmul.mubr.msk.bf16.gmra.mrb[12].mxu1 %vm1917_vm10, %v3465_v27  ;;  %v765_v16 = vadd.s32 72, %v7259_v57  ;;  %7042 = vmatprep.subr.msk.bf16.mxu0 %vm1966_vm1, %v7236_v52  ;;  %v2172_v31 = vshrl.u32 %v1608_v54, 16  ;;  %v6061_v2 = vcombine.low %v7268_v10, %v2698_v22  ;;  %vm2542_vm2 = vcmp.lt.s32.totalorder %v2478_v13, 16 }
 0x139   : > { %6579 = vmatprep.mubr.msk.bf16.mxu1 %vm1917_vm10, %v7396_v24  ;;  %v2161_v60 = vor.u32 %v2159_v0, %v2158_v5  ;;  %v2169_v17 = vor.u32 %v2167_v23, %v7793_v33  ;;  %v2180_v53 = vshrl.u32 %v1609_v18, 16  ;;  %v2776_v25 = vshrl.u32 %v7805_v35, 16  ;;  %vm2670_vm4 = vmpackc.low %vm2542_vm2, %vm2542_vm2 }
 0x13a   : > { %v2700_v40 = vsel %vm2668_vm5, 65537, %v9096_v41  ;;  %v855_v9 = vand.u32 15, %v765_v16  ;;  %v2174_v11 = vrot.slane %v2172_v31, 7  ;;  %v2780_v36 = vshrl.u32 %v6061_v2, 16 }
 0x13b   : > { %v2162_v52 = vsel %vm2131_vm15, %v2150_v4, %v2161_v60  ;;  %v767_v24 = vadd.s32 88, %v7259_v57  ;;  %v4179_v34 = vsel %vm1966_vm1, %v7665_v61, 0  ;;  %v2170_v45 = vsel %vm2131_vm15, %v2158_v5, %v2169_v17  ;;  %v7836_v61 = vld [vmem:[%s8956_s4 + $0xc] sm:$0x3] }
 0x13c   : > { %v7822_v12 = vrot.slane %v2180_v53, 7  ;;  %v1610_v26 = vsel %vm9035_vm6, %v7547_v3, 0  ;;  %v2175_v4 = vshll.u32 %v1608_v54, 16  ;;  %v1611_v56 = vsel %vm9034_vm14, %v7543_v46, 0 }
 0x13d   : > { %v6062_v22 = vcombine.low %v7268_v10, %v2700_v40  ;;  %v2702_v13 = vsel %vm2670_vm4, 65537, %v9096_v41  ;;  %v2183_v5 = vshll.u32 %v1609_v18, 16  ;;  %v2480_v1 = vadd.s32 1, %v855_v9 }
 0x13e   : > { %6482 = vmatmul.mubr.msk.bf16.gmra.mrb[36].mxu0 %vm1917_vm10, %v2162_v52  ;;  %v769_v54 = vadd.s32 104, %v7259_v57  ;;  %v792_v27 = vand.u32 15, %v7259_v57  ;;  %v2177_v0 = vor.u32 %v2175_v4, %v2174_v11  ;;  %v2188_v23 = vshrl.u32 %v1610_v26, 16 }
 0x13f   : > { %6485 = vmatprep.mubr.msk.bf16.mxu0 %vm1917_vm10, %v2170_v45  ;;  %v869_v16 = vand.u32 15, %v767_v24  ;;  %v2185_v60 = vor.u32 %v2183_v5, %v7822_v12  ;;  %v2196_v31 = vshrl.u32 %v1611_v56, 16  ;;  %v7846_v17 = vrot.slane %v9096_v41, 1 }
 0x140   : > { %6580 = vmatmul.mubr.msk.bf16.vlgmr.msra.gmra.mrb[16].mxu1 %vm1917_vm10, %v7409_v55  ;;  %v7850_v18 = vrot.slane %v2776_v25, 7  ;;  %v7852_v53 = vrot.slane %v2780_v36, 7  ;;  %v2783_v40 = vshll.u32 %v6061_v2, 16  ;;  %v6063_v9 = vcombine.low %v7268_v10, %v2702_v13  ;;  %v9097_v2 = vld [vmem:[#allocation24_spill] sm:$0xff] }
 0x141   : > { %6612 = vmatpush3.bf16.msra.mxu1 %v4179_v34  ;;  %6583 = vmatprep.mubr.msk.bf16.mxu1 %vm1917_vm10, %v7461_v37  ;;  %v2788_v52 = vshrl.u32 %v6062_v22, 16  ;;  %vm2544_vm0 = vcmp.lt.s32.totalorder %v2480_v1, 16  ;;  %v883_v34 = vand.u32 15, %v769_v54  ;;  %v1172_v24 = vadd.s32 4294967295, %v792_v27 }
 0x142   : > { %7046 = vmatprep.subr.msk.bf16.mxu1 %vm1966_vm1, %v7836_v61  ;;  %v2178_v45 = vsel %vm2131_vm15, %v7793_v33, %v2177_v0  ;;  %v2190_v4 = vrot.slane %v2188_v23, 7  ;;  %v2482_v5 = vadd.s32 1, %v869_v16  ;;  %v771_v37 = vadd.s32 120, %v7259_v57  ;;  %v9099_v33 = vld [vmem:[#allocation22_spill] sm:$0xff]  ;;  %vm2672_vm5 = vmpackc.low %vm2544_vm0, %vm2544_vm0 }
 0x143   : > { %v2186_v25 = vsel %vm2131_vm15, %v2174_v11, %v2185_v60  ;;  %v7860_v36 = vrot.slane %v2196_v31, 7  ;;  %v1612_v13 = vsel %vm9017_vm12, %v9097_v2, 0  ;;  %v773_v54 = vadd.s32 136, %v7259_v57 }
 0x144   : > { %v2191_v27 = vshll.u32 %v1610_v26, 16  ;;  %v1613_v0 = vsel %vm9016_vm3, %v9099_v33, 0  ;;  %v2785_v23 = vor.u32 %v2783_v40, %v7852_v53  ;;  %v2796_v16 = vshrl.u32 %v6063_v9, 16 }
 0x145   : > { %v2199_v11 = vshll.u32 %v1611_v56, 16  ;;  %v2790_v60 = vrot.slane %v2788_v52, 7  ;;  %v2791_v31 = vshll.u32 %v6062_v22, 16  ;;  %v2484_v55 = vadd.s32 1, %v883_v34 }
 0x146   : > { %6486 = vmatmul.mubr.msk.bf16.gmra.mrb[40].mxu0 %vm1917_vm10, %v2178_v45  ;;  %v9100_v45 = vld [vmem:[#allocation12_spill] sm:$0xff]  ;;  %v2193_v8 = vor.u32 %v2191_v27, %v2190_v4  ;;  %v897_v26 = vand.u32 15, %v771_v37  ;;  %vm1204_vm2 = vcmp.ge.s32.totalorder %v1172_v24, 0  ;;  %v2212_v44 = vshrl.u32 %v1613_v0, 16 }
 0x147   : > { %6489 = vmatprep.mubr.msk.bf16.mxu0 %vm1917_vm10, %v2186_v25  ;;  %v2204_v25 = vshrl.u32 %v1612_v13, 16  ;;  %v2201_v40 = vor.u32 %v2199_v11, %v7860_v36  ;;  %vm2546_vm4 = vcmp.lt.s32.totalorder %v2482_v5, 16  ;;  %v911_v15 = vand.u32 15, %v773_v54  ;;  %vm7887_vm3 = vmpackc.low %vm1204_vm2, %vm1204_vm2 }
 0x148   : > { %6584 = vmatmul.mubr.msk.bf16.gmra.mrb[20].mxu1 %vm1917_vm10, %v9100_v45  ;;  %v7880_v56 = vsel %vm2131_vm15, %v7850_v18, %v2785_v23  ;;  %v7882_v22 = vrot.slane %v2796_v16, 7  ;;  %v2799_v52 = vshll.u32 %v6063_v9, 16  ;;  %v775_v34 = vadd.s32 152, %v7259_v57  ;;  %vm7893_vm12 = vmpackc.low %vm2546_vm4, %vm2546_vm4 }
 0x149   : > { %6587 = vmatprep.mubr.msk.bf16.mxu1 %vm1917_vm10, %v9101_v29  ;;  %9102 = vst [vmem:[#allocation24_spill] sm:$0xff] %v7880_v56  ;;  %v2793_v27 = vor.u32 %v2791_v31, %v2790_v60  ;;  %v3980_v1 = vshll.u32 %v7805_v35, 16  ;;  %v2704_v37 = vsel %vm2672_vm5, 65537, %v9096_v41  ;;  %vm2548_vm0 = vcmp.lt.s32.totalorder %v2484_v55, 16 }
 0x14a   : > { %v2194_v5 = vsel %vm2131_vm15, %v7822_v12, %v2193_v8  ;;  %v2206_v54 = vrot.slane %v2204_v25, 7  ;;  %v2486_v9 = vadd.s32 1, %v897_v26  ;;  %v777_v16 = vadd.s32 168, %v7259_v57  ;;  %vm2676_vm2 = vmpackc.low %vm2548_vm0, %vm2548_vm0 }
 0x14b   : > { %v2202_v35 = vsel %vm2131_vm15, %v2190_v4, %v2201_v40  ;;  %v7900_v11 = vrot.slane %v2212_v44, 7  ;;  %vm9107_vm5 = vcmp.ne.s16.totalorder %v7581_v49, 0  ;;  %v2488_v29 = vadd.s32 1, %v911_v15  ;;  %v9109_v40 = vld [vmem:[#allocation17_spill] sm:$0xff] }
 0x14c   : > { %v1614_v31 = vsel %vm9107_vm5, %v7639_v48, 0  ;;  %v2207_v8 = vshll.u32 %v1612_v13, 16  ;;  %v1615_v12 = vsel %vm9023_vm8, %v7636_v14, 0  ;;  %v2801_v25 = vor.u32 %v2799_v52, %v7882_v22 }
 0x14d   : > { %v925_v26 = vand.u32 15, %v775_v34  ;;  %v2215_v44 = vshll.u32 %v1613_v0, 16  ;;  %v7913_v4 = vcombine.low %v7268_v10, %v2704_v37  ;;  %v2706_v15 = vsel %vm7893_vm12, 65537, %v9096_v41 }
 0x14e   : > { %6490 = vmatmul.mubr.msk.bf16.gmra.mrb[44].mxu0 %vm1917_vm10, %v2194_v5  ;;  %v9108_v5 = vld [vmem:[#allocation16_spill] sm:$0xff]  ;;  %v3306_v13 = vsel %vm7887_vm3, 65537, %v9096_v41  ;;  %v2209_v52 = vor.u32 %v2207_v8, %v2206_v54  ;;  %v2220_v34 = vshrl.u32 %v1614_v31, 16  ;;  %vm2550_vm4 = vcmp.lt.s32.totalorder %v2486_v9, 16 }
 0x14f   : > { %6493 = vmatprep.mubr.msk.bf16.mxu0 %vm1917_vm10, %v2202_v35  ;;  %v939_v0 = vand.u32 15, %v777_v16  ;;  %v2217_v37 = vor.u32 %v2215_v44, %v7900_v11  ;;  %v2228_v35 = vshrl.u32 %v1615_v12, 16  ;;  %vm2552_vm5 = vcmp.lt.s32.totalorder %v2488_v29, 16  ;;  %vm7942_vm12 = vmpackc.low %vm2550_vm4, %vm2550_vm4 }
 0x150   : > { %6588 = vmatmul.mubr.msk.bf16.gmra.mrb[24].mxu1 %vm1917_vm10, %v9108_v5  ;;  %v779_v23 = vadd.s32 184, %v7259_v57  ;;  %v7929_v24 = vsel %vm2131_vm15, %v7852_v53, %v2793_v27  ;;  %v7932_v5 = vsel %vm2131_vm15, %v2790_v60, %v2801_v25  ;;  %v7935_v8 = vor.u32 %v3980_v1, %v7850_v18  ;;  %vm7951_vm3 = vmpackc.low %vm2552_vm5, %vm2552_vm5 }
 0x151   : > { %6591 = vmatprep.mubr.msk.bf16.mxu1 %vm1917_vm10, %v9109_v40  ;;  %9110 = vst [vmem:[#allocation22_spill] sm:$0xff] %v7929_v24  ;;  %v2490_v55 = vadd.s32 1, %v925_v26  ;;  %v2804_v9 = vshrl.u32 %v7913_v4, 16  ;;  %v7939_v16 = vcombine.low %v7268_v10, %v2706_v15  ;;  %v2708_v29 = vsel %vm2676_vm2, 65537, %v9096_v41 }
 0x152   : > { %9111 = vst [vmem:[#allocation36_spill] sm:$0xff] %v7935_v8  ;;  %v7947_v53 = vcombine.low %v3306_v13, %v7268_v10  ;;  %v2210_v60 = vsel %vm2131_vm15, %v7860_v36, %v2209_v52  ;;  %v2222_v18 = vrot.slane %v2220_v34, 7  ;;  %v2492_v1 = vadd.s32 1, %v939_v0  ;;  %v9117_v0 = vld [vmem:[#allocation18_spill] sm:$0xff] }
 0x153   : > { %v781_v25 = vadd.s32 200, %v7259_v57  ;;  %v2218_v26 = vsel %vm2131_vm15, %v2206_v54, %v2217_v37  ;;  %v7958_v15 = vrot.slane %v2228_v35, 7  ;;  %v1616_v13 = vsel %vm9021_vm11, %v7696_v28, 0 }
 0x154   : > { %v953_v40 = vand.u32 15, %v779_v23  ;;  %v2223_v36 = vshll.u32 %v1614_v31, 16  ;;  %vm9116_vm0 = vcmp.ne.s16.totalorder %v7689_v42, 0  ;;  %v7968_v34 = vcombine.low %v7268_v10, %v2708_v29  ;;  %v9118_v23 = vld [vmem:[#allocation25_spill] sm:$0xff] }
 0x155   : > { %v1617_v52 = vsel %vm9116_vm0, %v7693_v38, 0  ;;  %vm2554_vm2 = vcmp.lt.s32.totalorder %v2490_v55, 16  ;;  %v2231_v54 = vshll.u32 %v1615_v12, 16  ;;  %vm9026_vm4 = vcmp.ne.s16.totalorder %v7880_v56, 0 }
 0x156   : > { %6494 = vmatmul.mubr.msk.bf16.gmra.mrb[48].mxu0 %vm1917_vm10, %v2210_v60  ;;  %v2812_v37 = vshrl.u32 %v7939_v16, 16  ;;  %v2710_v31 = vsel %vm7942_vm12, 65537, %v9096_v41  ;;  %v2712_v35 = vsel %vm7951_vm3, 65537, %v9096_v41  ;;  %v2225_v55 = vor.u32 %v2223_v36, %v2222_v18  ;;  %vm2682_vm0 = vmpackc.low %vm2554_vm2, %vm2554_vm2 }
 0x157   : > { %6497 = vmatprep.mubr.msk.bf16.mxu0 %vm1917_vm10, %v2218_v26  ;;  %v2236_v29 = vshrl.u32 %v1616_v13, 16  ;;  %vm2556_vm5 = vcmp.lt.s32.totalorder %v2492_v1, 16  ;;  %v967_v60 = vand.u32 15, %v781_v25  ;;  %v2233_v12 = vor.u32 %v2231_v54, %v7958_v15 }
 0x158   : > { %6592 = vmatmul.mubr.msk.bf16.gmra.mrb[28].mxu1 %vm1917_vm10, %v9117_v0  ;;  %v2244_v26 = vshrl.u32 %v1617_v52, 16  ;;  %v2494_v0 = vadd.s32 1, %v953_v40  ;;  %v3314_v45 = vshll.u32 %v7947_v53, 16  ;;  %v2806_v44 = vrot.slane %v2804_v9, 7  ;;  %vm7992_vm12 = vmpackc.low %vm2556_vm5, %vm2556_vm5 }
 0x159   : > { %6595 = vmatprep.mubr.msk.bf16.mxu1 %vm1917_vm10, %v9118_v23  ;;  %v2807_v42 = vshll.u32 %v7913_v4, 16  ;;  %v6067_v27 = vcombine.low %v7268_v10, %v2710_v31  ;;  %v7987_v47 = vrot.slane %v2812_v37, 7  ;;  %v2815_v36 = vshll.u32 %v7939_v16, 16 }
 0x15a   : > { %v2820_v1 = vshrl.u32 %v7968_v34, 16  ;;  %v6068_v25 = vcombine.low %v7268_v10, %v2712_v35  ;;  %v2226_v40 = vsel %vm2131_vm15, %v7900_v11, %v2225_v55  ;;  %v2238_v4 = vrot.slane %v2236_v29, 7 }
 0x15b   : > { %v2714_v9 = vsel %vm2682_vm0, 65537, %v9096_v41  ;;  %v2496_v31 = vadd.s32 1, %v967_v60  ;;  %v2234_v37 = vsel %vm2131_vm15, %v2222_v18, %v2233_v12  ;;  %v8001_v16 = vrot.slane %v2244_v26, 7  ;;  %v9122_v60 = vld [vmem:[#allocation26_spill] sm:$0xff] }
 0x15c   : > { %vm9121_vm3 = vcmp.ne.s16.totalorder %v7686_v39, 0  ;;  %vm9029_vm2 = vcmp.ne.s16.totalorder %v7929_v24, 0  ;;  %vm9033_vm5 = vcmp.ne.s16.totalorder %v7935_v8, 0  ;;  %vm2558_vm11 = vcmp.lt.s32.totalorder %v2494_v0, 16 }
 0x15d   : > { %v1618_v35 = vsel %vm9121_vm3, %v7748_v50, 0  ;;  %v2239_v11 = vshll.u32 %v1616_v13, 16  ;;  %v2809_v55 = vor.u32 %v2807_v42, %v2806_v44  ;;  %v2828_v29 = vshrl.u32 %v6067_v27, 16 }
 0x15e   : > { %6498 = vmatmul.mubr.msk.bf16.gmra.mrb[52].mxu0 %vm1917_vm10, %v2226_v40  ;;  %v2716_v18 = vsel %vm7992_vm12, 65537, %v9096_v41  ;;  %v2247_v12 = vshll.u32 %v1617_v52, 16  ;;  %vm9037_vm0 = vcmp.ne.s16.totalorder %v7932_v5, 0  ;;  %v2823_v39 = vshll.u32 %v7968_v34, 16  ;;  %vm2686_vm12 = vmpackc.low %vm2558_vm11, %vm2558_vm11 }
 0x15f   : > { %6501 = vmatprep.mubr.msk.bf16.mxu0 %vm1917_vm10, %v2234_v37  ;;  %v2836_v26 = vshrl.u32 %v6068_v25, 16  ;;  %v6069_v40 = vcombine.low %v7268_v10, %v2714_v9  ;;  %v2241_v42 = vor.u32 %v2239_v11, %v2238_v4  ;;  %v2252_v13 = vshrl.u32 %v1618_v35, 16 }
 0x160   : > { %6596 = vmatmul.mubr.msk.bf16.gmra.mrb[0].mxu1 %vm1917_vm10, %v9122_v60  ;;  %v2822_v37 = vrot.slane %v2820_v1, 7  ;;  %vm2560_vm3 = vcmp.lt.s32.totalorder %v2496_v31, 16  ;;  %v2249_v54 = vor.u32 %v2247_v12, %v8001_v16  ;;  %v2817_v52 = vor.u32 %v2815_v36, %v7987_v47 }
 0x161   : > { %6599 = vmatprep.mubr.msk.bf16.mxu1 %vm1917_vm10, %v7658_v32  ;;  %v6070_v20 = vcombine.low %v7268_v10, %v2716_v18  ;;  %v8024_v34 = vrot.slane %v3314_v45, 1  ;;  %v8029_v9 = vsel %vm9026_vm4, %v7380_v6, 0  ;;  %v8033_v1 = vsel %vm2131_vm15, %v7882_v22, %v2809_v55  ;;  %vm2688_vm11 = vmpackc.low %vm2560_vm3, %vm2560_vm3 }
 0x162   : > { %v2830_v0 = vrot.slane %v2828_v29, 7  ;;  %v2831_v11 = vshll.u32 %v6067_v27, 16  ;;  %v8035_v31 = vrot.slane %v2836_v26, 7  ;;  %v2839_v12 = vshll.u32 %v6068_v25, 16 }
 0x163   : > { %v2844_v32 = vshrl.u32 %v6069_v40, 16  ;;  %v2718_v36 = vsel %vm2686_vm12, 65537, %v9096_v41  ;;  %v2242_v45 = vsel %vm2131_vm15, %v7958_v15, %v2241_v42  ;;  %v2254_v18 = vrot.slane %v2252_v13, 7  ;;  %v9124_v42 = vld [vmem:[#allocation29_spill] sm:$0xff] }
 0x164   : > { %v2825_v60 = vor.u32 %v2823_v39, %v2822_v37  ;;  %v783_v23 = vadd.s32 216, %v7259_v57  ;;  %v2250_v22 = vsel %vm2131_vm15, %v2238_v4, %v2249_v54  ;;  %v2936_v27 = vshll.u32 %v8029_v9, 16 }
 0x165   : > { %vm9036_vm8 = vcmp.ne.s16.totalorder %v8033_v1, 0  ;;  %v8046_v25 = vsel %vm2131_vm15, %v2806_v44, %v2817_v52  ;;  %v2852_v55 = vshrl.u32 %v6070_v20, 16  ;;  %v2255_v29 = vshll.u32 %v1618_v35, 16 }
 0x166   : > { %6502 = vmatmul.mubr.msk.bf16.gmra.mrb[56].mxu0 %vm1917_vm10, %v2242_v45  ;;  %9123 = vst [vmem:[#allocation37_spill] sm:$0xff] %v8046_v25  ;;  %v2833_v15 = vor.u32 %v2831_v11, %v2830_v0  ;;  %v8050_v39 = vcombine.low %v7268_v10, %v2718_v36  ;;  %v2720_v26 = vsel %vm2688_vm11, 65537, %v9096_v41  ;;  %v2841_v4 = vor.u32 %v2839_v12, %v8035_v31 }
 0x167   : > { %6505 = vmatprep.mubr.msk.bf16.mxu0 %vm1917_vm10, %v2250_v22  ;;  %v2846_v13 = vrot.slane %v2844_v32, 7  ;;  %v2847_v54 = vshll.u32 %v6069_v40, 16  ;;  %v785_v44 = vadd.s32 232, %v7259_v57  ;;  %v2257_v52 = vor.u32 %v2255_v29, %v2254_v18 }
 0x168   : > { %6600 = vmatmul.mubr.msk.bf16.gmra.mrb[4].mxu1 %vm1917_vm10, %v9124_v42  ;;  %v2916_v35 = vsel %vm9029_vm2, %v7376_v43, 0  ;;  %v3984_v11 = vsel %vm9033_vm5, %v7380_v6, 0  ;;  %v981_v36 = vand.u32 15, %v783_v23  ;;  %v2938_v45 = vrot.slane %v2936_v27, 1 }
 0x169   : > { %6603 = vmatprep.mubr.msk.bf16.mxu1 %vm1917_vm10, %v7714_v58  ;;  %v8065_v22 = vrot.slane %v2852_v55, 7  ;;  %v2855_v32 = vshll.u32 %v6070_v20, 16  ;;  %v8068_v40 = vcombine.low %v7268_v10, %v2720_v26  ;;  %v8073_v12 = vsel %vm9037_vm0, %v7443_v62, 0 }
 0x16a   : > { %vm2903_vm12 = vcmp.ne.s16.totalorder %v8046_v25, 0  ;;  %v8078_v18 = vsel %vm2131_vm15, %v7987_v47, %v2825_v60  ;;  %v2860_v23 = vshrl.u32 %v8050_v39, 16  ;;  %v2944_v27 = vshll.u32 %v2916_v35, 16 }
 0x16b   : > { %9125 = vst [vmem:[#allocation38_spill] sm:$0xff] %v8078_v18  ;;  %v4005_v55 = vshll.u32 %v3984_v11, 16  ;;  %v8082_v20 = vsel %vm2131_vm15, %v2822_v37, %v2833_v15  ;;  %v995_v29 = vand.u32 15, %v785_v44  ;;  %v2258_v26 = vsel %vm2131_vm15, %v8001_v16, %v2257_v52 }
 0x16c   : > { %9126 = vst [vmem:[#allocation39_spill] sm:$0xff] %v8082_v20  ;;  %v8087_v8 = vsel %vm2131_vm15, %v2830_v0, %v2841_v4  ;;  %v2849_v58 = vor.u32 %v2847_v54, %v2846_v13  ;;  %v2498_v42 = vadd.s32 1, %v981_v36  ;;  %vm9128_vm3 = vsmask.f32 7424 }
 0x16d   : > { %9127 = vst [vmem:[#allocation40_spill] sm:$0xff] %v8087_v8  ;;  %v2939_v47 = vsel %vm9128_vm3, %v7846_v17, %v2938_v45  ;;  %v2952_v60 = vshll.u32 %v8073_v12, 16  ;;  %vm2904_vm11 = vcmp.ne.s16.totalorder %v8078_v18, 0  ;;  %v2857_v37 = vor.u32 %v2855_v32, %v8065_v22 }
 0x16e   : > { %6506 = vmatmul.mubr.msk.bf16.gmra.mrb[60].mxu0 %vm1917_vm10, %v2258_v26  ;;  %v2868_v15 = vshrl.u32 %v8068_v40, 16  ;;  %v2940_v16 = vshrl.u32 %v8029_v9, 16  ;;  %v8101_v0 = vsel %vm9026_vm4, %v7376_v43, 0  ;;  %v8103_v4 = vrot.slane %v2860_v23, 7 }
 0x16f   : > { %6511 = vmatprep.mubr.msk.bf16.mxu0 %vm1917_vm10, %v2939_v47  ;;  %v787_v54 = vadd.s32 248, %v7259_v57  ;;  %v2946_v44 = vrot.slane %v2944_v27, 1  ;;  %v4007_v52 = vrot.slane %v4005_v55, 1  ;;  %vm2905_vm3 = vcmp.ne.s16.totalorder %v8082_v20, 0 }
 0x170   : > { %6604 = vmatmul.mubr.msk.bf16.gmra.mrb[8].mxu1 %vm1917_vm10, %v7724_v63  ;;  %v2863_v9 = vshll.u32 %v8050_v39, 16  ;;  %v2500_v36 = vadd.s32 1, %v995_v29  ;;  %v2942_v32 = vor.u32 %v2940_v16, %v2938_v45  ;;  %v2918_v23 = vsel %vm9036_vm8, %v7439_v51, 0 }
 0x171   : > { %6607 = vmatprep.mubr.msk.bf16.mxu1 %vm1917_vm10, %v7759_v19  ;;  %v3986_v57 = vsel %vm9029_vm2, %v7443_v62, 0  ;;  %vm2562_vm4 = vcmp.lt.s32.totalorder %v2498_v42, 16  ;;  %v2948_v27 = vshrl.u32 %v2916_v35, 16  ;;  %v2954_v55 = vrot.slane %v2952_v60, 1 }
 0x172   : > { %v4003_v26 = vshrl.u32 %v3984_v11, 16  ;;  %v4010_v47 = vshll.u32 %v8101_v0, 16  ;;  %v8122_v39 = vsel %vm2903_vm12, %v7497_v59, 0  ;;  %v8126_v45 = vsel %vm2131_vm15, %v8035_v31, %v2849_v58  ;;  %vm8138_vm5 = vmpackc.low %vm2562_vm4, %vm2562_vm4 }
 0x173   : > { %v8129_v29 = vsel %vm2131_vm15, %v2846_v13, %v2857_v37  ;;  %v1009_v16 = vand.u32 15, %v787_v54  ;;  %v2950_v24 = vor.u32 %v2948_v27, %v2946_v44  ;;  %v2960_v35 = vshll.u32 %v2918_v23, 16 }
 0x174   : > { %v4008_v19 = vor.u32 %v4007_v52, %v4003_v26  ;;  %v4018_v60 = vshll.u32 %v3986_v57, 16  ;;  %vm9129_vm2 = vsmask.f32 7424  ;;  %v2865_v56 = vor.u32 %v2863_v9, %v8103_v4  ;;  %v9135_v52 = vld [vmem:[#allocation2_spill] sm:$0xff] }
 0x175   : > { %v2947_v11 = vsel %vm9129_vm2, %v2942_v32, %v2946_v44  ;;  %v8133_v63 = vrot.slane %v2868_v15, 7  ;;  %v2871_v49 = vshll.u32 %v8068_v40, 16  ;;  %vm9132_vm14 = vmmov %vm9129_vm2  ;;  %v4012_v13 = vrot.slane %v4010_v47, 1  ;;  %v9133_v15 = vld [vmem:[#allocation33_spill] sm:$0xff] }
 0x176   : > { %6512 = vmatmul.mubr.msk.bf16.vlgmr.msra.gmra.mrb[32].mxu0 %vm1917_vm10, %v2947_v11  ;;  %v2955_v31 = vsel %vm9132_vm14, %v2950_v24, %v2954_v55  ;;  %v2968_v37 = vshll.u32 %v8122_v39, 16  ;;  %vm2906_vm2 = vcmp.ne.s16.totalorder %v8087_v8, 0  ;;  %vm2564_vm6 = vcmp.lt.s32.totalorder %v2500_v36, 16 }
 0x177   : > { %v8149_v40 = vsel %vm7335_vm9, %v9133_v15, 0  ;;  %6515 = vmatprep.mubr.msk.bf16.mxu0 %vm1917_vm10, %v2955_v31  ;;  %v2956_v42 = vshrl.u32 %v8073_v12, 16  ;;  %v8156_v44 = vsel %vm9037_vm0, %v7439_v51, 0  ;;  %v2502_v24 = vadd.s32 1, %v1009_v16  ;;  %6544 = vmatpush3.bf16.msra.mxu0 %v9135_v52  ;;  %vm2692_vm4 = vmpackc.low %vm2564_vm6, %vm2564_vm6 }
 0x178   : > { %6608 = vmatmul.mubr.msk.bf16.gmra.mrb[12].mxu1 %vm1917_vm10, %v8149_v40  ;;  %v4013_v9 = vsel %vm9132_vm14, %v4008_v19, %v4012_v13  ;;  %v2962_v32 = vrot.slane %v2960_v35, 1  ;;  %v4020_v27 = vrot.slane %v4018_v60, 1  ;;  %vm9043_vm9 = vcmp.ne.s16.totalorder %v8126_v45, 0  ;;  %vm9136_vm6 = vmmov %vm9132_vm14 }
 0x179   : > { %v2722_v12 = vsel %vm8138_vm5, 65537, %v9096_v41  ;;  %6613 = vmatprep.mubr.msk.bf16.mxu1 %vm1917_vm10, %v4013_v9  ;;  %v2958_v26 = vor.u32 %v2956_v42, %v2954_v55  ;;  %v2920_v47 = vsel %vm2904_vm11, %v7494_v21, 0  ;;  %v3988_v16 = vsel %vm9036_vm8, %v7497_v59, 0 }
 0x17a   : > { %v2873_v19 = vor.u32 %v2871_v49, %v8133_v63  ;;  %v2964_v35 = vshrl.u32 %v2918_v23, 16  ;;  %v2970_v60 = vrot.slane %v2968_v37, 1  ;;  %v4022_v11 = vshrl.u32 %v3986_v57, 16 }
 0x17b   : > { %v4026_v31 = vshll.u32 %v8156_v44, 16  ;;  %v4014_v55 = vshrl.u32 %v8101_v0, 16  ;;  %v8181_v58 = vsel %vm2905_vm3, %v7547_v3, 0  ;;  %v6073_v54 = vcombine.low %v7268_v10, %v2722_v12 }
 0x17c   : > { %vm2566_vm5 = vcmp.lt.s32.totalorder %v2502_v24, 16  ;;  %v2966_v42 = vor.u32 %v2964_v35, %v2962_v32  ;;  %v4024_v49 = vor.u32 %v4022_v11, %v4020_v27  ;;  %v2976_v23 = vshll.u32 %v2920_v47, 16 }
 0x17d   : > { %v4034_v37 = vshll.u32 %v3988_v16, 16  ;;  %v4016_v57 = vor.u32 %v4014_v55, %v4012_v13  ;;  %v2963_v52 = vsel %vm9132_vm14, %v2958_v26, %v2962_v32  ;;  %v8187_v36 = vsel %vm2131_vm15, %v8065_v22, %v2865_v56  ;;  %vm8196_vm0 = vmpackc.low %vm2566_vm5, %vm2566_vm5  ;;  %v8211_v26 = vld [vmem:[%s8956_s4 + $0xe] sm:$0x3] }
 0x17e   : > { %v2724_v0 = vsel %vm2692_vm4, 65537, %v9096_v41  ;;  %6516 = vmatmul.mubr.msk.bf16.gmra.mrb[36].mxu0 %vm1917_vm10, %v2963_v52  ;;  %v4567_v9 = vsel %vm1966_vm1, %v7836_v61, 0  ;;  %v2971_v24 = vsel %vm9136_vm6, %v2966_v42, %v2970_v60  ;;  %v4028_v12 = vrot.slane %v4026_v31, 1  ;;  %vm9139_vm14 = vmmov %vm9136_vm6 }
 0x17f   : > { %v2984_v35 = vshll.u32 %v8181_v58, 16  ;;  %vm9042_vm8 = vcmp.ne.s16.totalorder %v8129_v29, 0  ;;  %v4021_v56 = vsel %vm9139_vm14, %v4016_v57, %v4020_v27  ;;  %6519 = vmatprep.mubr.msk.bf16.mxu0 %vm1917_vm10, %v2971_v24  ;;  %v2972_v22 = vshrl.u32 %v8122_v39, 16  ;;  %vm9140_vm4 = vmmov %vm9136_vm6 }
 0x180   : > { %v8206_v61 = vsel %vm2903_vm12, %v7494_v21, 0  ;;  %v2876_v32 = vshrl.u32 %v6073_v54, 16  ;;  %6614 = vmatmul.mubr.msk.bf16.vlgmr.msra.gmra.mrb[16].mxu1 %vm1917_vm10, %v4021_v56  ;;  %v4029_v11 = vsel %vm9140_vm4, %v4024_v49, %v4028_v12  ;;  %v2978_v27 = vrot.slane %v2976_v23, 1 }
 0x181   : > { %v4036_v31 = vrot.slane %v4034_v37, 1  ;;  %vm9045_vm5 = vcmp.ne.s16.totalorder %v8187_v36, 0  ;;  %v8217_v39 = vcombine.low %v7268_v10, %v2724_v0  ;;  %6646 = vmatpush3.bf16.msra.mxu1 %v4567_v9  ;;  %6617 = vmatprep.mubr.msk.bf16.mxu1 %vm1917_vm10, %v4029_v11  ;;  %v2974_v55 = vor.u32 %v2972_v22, %v2970_v60 }
 0x182   : > { %v2922_v42 = vsel %vm2906_vm2, %v7543_v46, 0  ;;  %v3990_v57 = vsel %vm2904_vm11, %v7547_v3, 0  ;;  %v2726_v49 = vsel %vm8196_vm0, 65537, %v9096_v41  ;;  %v2980_v23 = vshrl.u32 %v2920_v47, 16  ;;  %7047 = vmatprep.subr.msk.bf16.mxu1 %vm1966_vm1, %v8211_v26  ;;  %vm9141_vm0 = vmmov %vm9140_vm4 }
 0x183   : > { %v2986_v37 = vrot.slane %v2984_v35, 1  ;;  %v4038_v52 = vshrl.u32 %v3988_v16, 16  ;;  %v4042_v0 = vshll.u32 %v8206_v61, 16  ;;  %v4030_v60 = vshrl.u32 %v8156_v44, 16  ;;  %vm9142_vm6 = vmmov %vm9141_vm0 }
 0x184   : > { %v8236_v9 = vsel %vm9043_vm9, %v9097_v2, 0  ;;  %v8238_v24 = vrot.slane %v2876_v32, 7  ;;  %v2879_v56 = vshll.u32 %v6073_v54, 16  ;;  %v2982_v13 = vor.u32 %v2980_v23, %v2978_v27  ;;  %vm9143_vm14 = vmmov %vm9141_vm0 }
 0x185   : > { %v4040_v22 = vor.u32 %v4038_v52, %v4036_v31  ;;  %v2992_v47 = vshll.u32 %v2922_v42, 16  ;;  %v4050_v35 = vshll.u32 %v3990_v57, 16  ;;  %v2979_v16 = vsel %vm9141_vm0, %v2974_v55, %v2978_v27  ;;  %vm9144_vm4 = vmmov %vm9141_vm0 }
 0x186   : > { %v4032_v11 = vor.u32 %v4030_v60, %v4028_v12  ;;  %v8243_v18 = vsel %vm2131_vm15, %v8103_v4, %v2873_v19  ;;  %v6075_v44 = vcombine.low %v7268_v10, %v2726_v49  ;;  %6520 = vmatmul.mubr.msk.bf16.gmra.mrb[40].mxu0 %vm1917_vm10, %v2979_v16  ;;  %v2987_v25 = vsel %vm9142_vm6, %v2982_v13, %v2986_v37  ;;  %vm9145_vm6 = vmmov %vm9141_vm0 }
 0x187   : > { %v4044_v32 = vrot.slane %v4042_v0, 1  ;;  %v3000_v54 = vshll.u32 %v8236_v9, 16  ;;  %v2884_v23 = vshrl.u32 %v8217_v39, 16  ;;  %6523 = vmatprep.mubr.msk.bf16.mxu0 %vm1917_vm10, %v2987_v25  ;;  %v2988_v12 = vshrl.u32 %v8181_v58, 16 }
 0x188   : > { %v4037_v52 = vsel %vm9143_vm14, %v4032_v11, %v4036_v31  ;;  %v3991_v4 = vsel %vm2905_vm3, %v7543_v46, 0  ;;  %v2881_v10 = vor.u32 %v2879_v56, %v8238_v24  ;;  %v2994_v27 = vrot.slane %v2992_v47, 1 }
 0x189   : > { %6618 = vmatmul.mubr.msk.bf16.gmra.mrb[20].mxu1 %vm1917_vm10, %v4037_v52  ;;  %v4045_v19 = vsel %vm9144_vm4, %v4040_v22, %v4044_v32  ;;  %v4052_v55 = vrot.slane %v4050_v35, 1  ;;  %v2887_v49 = vshll.u32 %v8217_v39, 16  ;;  %v2990_v31 = vor.u32 %v2988_v12, %v2986_v37  ;;  %vm9146_vm4 = vmmov %vm9141_vm0 }
 0x18a   : > { %6621 = vmatprep.mubr.msk.bf16.mxu1 %vm1917_vm10, %v4045_v19  ;;  %v2924_v25 = vsel %vm9042_vm8, %v9099_v33, 0  ;;  %v3992_v58 = vsel %vm2906_vm2, %v9097_v2, 0  ;;  %v2892_v0 = vshrl.u32 %v6075_v44, 16  ;;  %v2996_v60 = vshrl.u32 %v2922_v42, 16 }
 0x18b   : > { %v3002_v56 = vrot.slane %v3000_v54, 1  ;;  %v4054_v13 = vshrl.u32 %v3990_v57, 16  ;;  %v4058_v22 = vshll.u32 %v3991_v4, 16  ;;  %v4046_v47 = vshrl.u32 %v8206_v61, 16 }
 0x18c   : > { %v8271_v39 = vsel %vm9045_vm5, %v7639_v48, 0  ;;  %v8275_v37 = vsel %vm2131_vm15, %v8133_v63, %v2881_v10  ;;  %v2886_v35 = vrot.slane %v2884_v23, 7  ;;  %v2998_v16 = vor.u32 %v2996_v60, %v2994_v27 }
 0x18d   : > { %v4056_v11 = vor.u32 %v4054_v13, %v4052_v55  ;;  %v3008_v52 = vshll.u32 %v2924_v25, 16  ;;  %v4066_v12 = vshll.u32 %v3992_v58, 16  ;;  %v2995_v42 = vsel %vm9141_vm0, %v2990_v31, %v2994_v27 }
 0x18e   : > { %v4048_v57 = vor.u32 %v4046_v47, %v4044_v32  ;;  %v8278_v54 = vrot.slane %v2892_v0, 7  ;;  %v2895_v61 = vshll.u32 %v6075_v44, 16  ;;  %6524 = vmatmul.mubr.msk.bf16.gmra.mrb[44].mxu0 %vm1917_vm10, %v2995_v42  ;;  %v3003_v19 = vsel %vm9145_vm6, %v2998_v16, %v3002_v56 }
 0x18f   : > { %v4060_v8 = vrot.slane %v4058_v22, 1  ;;  %v3016_v20 = vshll.u32 %v8271_v39, 16  ;;  %vm9044_vm14 = vcmp.ne.s16.totalorder %v8243_v18, 0  ;;  %6527 = vmatprep.mubr.msk.bf16.mxu0 %vm1917_vm10, %v3003_v19  ;;  %v3004_v23 = vshrl.u32 %v8236_v9, 16 }
 0x190   : > { %v4053_v63 = vsel %vm9146_vm4, %v4048_v57, %v4052_v55  ;;  %v3993_v32 = vsel %vm9043_vm9, %v9099_v33, 0  ;;  %v2889_v44 = vor.u32 %v2887_v49, %v2886_v35  ;;  %v3010_v27 = vrot.slane %v3008_v52, 1  ;;  %vm9148_vm4 = vmmov %vm9141_vm0 }
 0x191   : > { %6622 = vmatmul.mubr.msk.bf16.gmra.mrb[24].mxu1 %vm1917_vm10, %v4053_v63  ;;  %v4061_v10 = vsel %vm9141_vm0, %v4056_v11, %v4060_v8  ;;  %v4068_v31 = vrot.slane %v4066_v12, 1  ;;  %vm9046_vm6 = vcmp.ne.s16.totalorder %v8275_v37, 0  ;;  %v3006_v55 = vor.u32 %v3004_v23, %v3002_v56  ;;  %vm9149_vm9 = vmmov %vm9141_vm0 }
 0x192   : > { %6625 = vmatprep.mubr.msk.bf16.mxu1 %vm1917_vm10, %v4061_v10  ;;  %v2926_v9 = vsel %vm9044_vm14, %v7636_v14, 0  ;;  %v3994_v0 = vsel %vm9042_vm8, %v7639_v48, 0  ;;  %v2897_v49 = vor.u32 %v2895_v61, %v8278_v54  ;;  %v3012_v60 = vshrl.u32 %v2924_v25, 16 }
 0x193   : > { %v3018_v13 = vrot.slane %v3016_v20, 1  ;;  %v4070_v22 = vshrl.u32 %v3992_v58, 16  ;;  %v4074_v47 = vshll.u32 %v3993_v32, 16  ;;  %v4062_v16 = vshrl.u32 %v3991_v4, 16 }
 0x194   : > { %v2927_v11 = vsel %vm9046_vm6, %v7696_v28, 0  ;;  %v8306_v56 = vsel %vm2131_vm15, %v8238_v24, %v2889_v44  ;;  %v9147_v52 = vshrl.u32 %v7947_v53, 16  ;;  %v3014_v42 = vor.u32 %v3012_v60, %v3010_v27 }
 0x195   : > { %v4072_v57 = vor.u32 %v4070_v22, %v4068_v31  ;;  %v3024_v61 = vshll.u32 %v2926_v9, 16  ;;  %v4082_v25 = vshll.u32 %v3994_v0, 16  ;;  %v3011_v20 = vsel %vm9148_vm4, %v3006_v55, %v3010_v27  ;;  %vm9151_vm4 = vmmov %vm9141_vm0 }
 0x196   : > { %v3317_v12 = vor.u32 %v8024_v34, %v9147_v52  ;;  %v4064_v58 = vor.u32 %v4062_v16, %v4060_v8  ;;  %v8313_v4 = vsel %vm2131_vm15, %v2886_v35, %v2897_v49  ;;  %6528 = vmatmul.mubr.msk.bf16.gmra.mrb[48].mxu0 %vm1917_vm10, %v3011_v20  ;;  %v3019_v19 = vsel %vm9141_vm0, %v3014_v42, %v3018_v13  ;;  %v9150_v35 = vld [vmem:[#allocation3_spill] sm:$0xff] }
 0x197   : > { %v4076_v24 = vrot.slane %v4074_v47, 1  ;;  %v3032_v63 = vshll.u32 %v2927_v11, 16  ;;  %vm9047_vm8 = vcmp.ne.s16.totalorder %v8306_v56, 0  ;;  %6531 = vmatprep.mubr.msk.bf16.mxu0 %vm1917_vm10, %v3019_v19  ;;  %v3020_v23 = vshrl.u32 %v8271_v39, 16 }
 0x198   : > { %v4069_v53 = vsel %vm9149_vm9, %v4064_v58, %v4068_v31  ;;  %v3995_v8 = vsel %vm9045_vm5, %v7636_v14, 0  ;;  %v8326_v44 = vsel %vm9151_vm4, %v3317_v12, %v9150_v35  ;;  %v3026_v27 = vrot.slane %v3024_v61, 1  ;;  %vm9153_vm5 = vmmov %vm9141_vm0 }
 0x199   : > { %6626 = vmatmul.mubr.msk.bf16.gmra.mrb[28].mxu1 %vm1917_vm10, %v4069_v53  ;;  %v4077_v10 = vsel %vm9141_vm0, %v4072_v57, %v4076_v24  ;;  %v4084_v55 = vrot.slane %v4082_v25, 1  ;;  %vm2913_vm9 = vcmp.ne.s16.totalorder %v8313_v4, 0  ;;  %v3022_v31 = vor.u32 %v3020_v23, %v3018_v13 }
 0x19a   : > { %6629 = vmatprep.mubr.msk.bf16.mxu1 %vm1917_vm10, %v4077_v10  ;;  %v2928_v39 = vsel %vm9047_vm8, %v7693_v38, 0  ;;  %v3996_v49 = vsel %vm9044_vm14, %v7696_v28, 0  ;;  %v3028_v60 = vshrl.u32 %v2926_v9, 16  ;;  %v3034_v22 = vrot.slane %v3032_v63, 1  ;;  %vm9152_vm14 = vmmov %vm9141_vm0 }
 0x19b   : > { %v4086_v47 = vshrl.u32 %v3994_v0, 16  ;;  %v4090_v16 = vshll.u32 %v3995_v8, 16  ;;  %v4078_v52 = vshrl.u32 %v3993_v32, 16  ;;  %v2929_v12 = vsel %vm2913_vm9, %v7748_v50, 0 }
 0x19c   : > { %vm3319_vm4 = vcmp.ne.s16.totalorder %v8326_v44, 0  ;;  %v3030_v13 = vor.u32 %v3028_v60, %v3026_v27  ;;  %v3040_v57 = vshll.u32 %v2928_v39, 16  ;;  %v4098_v61 = vshll.u32 %v3996_v49, 16 }
 0x19d   : > { %v4088_v42 = vor.u32 %v4086_v47, %v4084_v55  ;;  %v3027_v25 = vsel %vm9141_vm0, %v3022_v31, %v3026_v27  ;;  %v4080_v20 = vor.u32 %v4078_v52, %v4076_v24  ;;  %v4092_v0 = vrot.slane %v4090_v16, 1 }
 0x19e   : > { %6532 = vmatmul.mubr.msk.bf16.gmra.mrb[52].mxu0 %vm1917_vm10, %v3027_v25  ;;  %v3035_v9 = vsel %vm9152_vm14, %v3030_v13, %v3034_v22  ;;  %v3048_v58 = vshll.u32 %v2929_v12, 16  ;;  %v3036_v19 = vshrl.u32 %v2927_v11, 16  ;;  %v3997_v63 = vsel %vm9046_vm6, %v7693_v38, 0  ;;  %vm9155_vm6 = vmmov %vm9141_vm0 }
 0x19f   : > { %v4085_v32 = vsel %vm9153_vm5, %v4080_v20, %v4084_v55  ;;  %6535 = vmatprep.mubr.msk.bf16.mxu0 %vm1917_vm10, %v3035_v9  ;;  %v3320_v53 = vsel %vm3319_vm4, %v7380_v6, 0  ;;  %v4093_v24 = vsel %vm9141_vm0, %v4088_v42, %v4092_v0  ;;  %v3042_v23 = vrot.slane %v3040_v57, 1  ;;  %vm9154_vm5 = vmmov %vm9141_vm0 }
 0x1a0   : > { %v4100_v35 = vrot.slane %v4098_v61, 1  ;;  %vm2914_vm14 = vcmp.ne.s16.totalorder %v8278_v54, 0  ;;  %v3038_v10 = vor.u32 %v3036_v19, %v3034_v22  ;;  %v4094_v11 = vshrl.u32 %v3995_v8, 16 }
 0x1a1   : > { %6630 = vmatmul.mubr.msk.bf16.gmra.mrb[0].mxu1 %vm1917_vm10, %v4085_v32  ;;  %v3044_v27 = vshrl.u32 %v2928_v39, 16  ;;  %v3998_v55 = vsel %vm9047_vm8, %v7748_v50, 0  ;;  %v3050_v31 = vrot.slane %v3048_v58, 1  ;;  %v4102_v60 = vshrl.u32 %v3996_v49, 16  ;;  %v9156_v49 = vld [vmem:[#allocation4_spill] sm:$0xff]  ;;  %v9158_v32 = vld [vmem:[#allocation5_spill] sm:$0xff] }
 0x1a2   : > { %6633 = vmatprep.mubr.msk.bf16.mxu1 %vm1917_vm10, %v4093_v24  ;;  %v4106_v47 = vshll.u32 %v3997_v63, 16  ;;  %v3339_v16 = vshrl.u32 %v3320_v53, 16  ;;  %v4096_v52 = vor.u32 %v4094_v11, %v4092_v0  ;;  %v2930_v57 = vsel %vm2914_vm14, %v9133_v15, 0 }
 0x1a3   : > { %v3046_v13 = vor.u32 %v3044_v27, %v3042_v23  ;;  %v4104_v42 = vor.u32 %v4102_v60, %v4100_v35  ;;  %v4114_v61 = vshll.u32 %v3998_v55, 16  ;;  %v3043_v54 = vsel %vm9154_vm5, %v3038_v10, %v3042_v23  ;;  %vm9164_vm5 = vmmov %vm9141_vm0 }
 0x1a4   : > { %v4101_v22 = vsel %vm9141_vm0, %v4096_v52, %v4100_v35  ;;  %v4108_v39 = vrot.slane %v4106_v47, 1  ;;  %v3341_v25 = vrot.slane %v3339_v16, 7  ;;  %vm9157_vm8 = vcmp.ne.s16.totalorder %v9156_v49, 0 }
 0x1a5   : > { %v3051_v8 = vsel %vm9155_vm6, %v3046_v13, %v3050_v31  ;;  %v3321_v20 = vsel %vm9157_vm8, %v7376_v43, 0  ;;  %v3052_v9 = vshrl.u32 %v2929_v12, 16  ;;  %v3056_v0 = vshll.u32 %v2930_v57, 16  ;;  %vm9160_vm6 = vmmov %vm9141_vm0 }
 0x1a6   : > { %6536 = vmatmul.mubr.msk.bf16.gmra.mrb[56].mxu0 %vm1917_vm10, %v3043_v54  ;;  %v3999_v58 = vsel %vm2913_vm9, %v9133_v15, 0  ;;  %vm9159_vm14 = vcmp.ne.s16.totalorder %v9158_v32, 0  ;;  %v4109_v24 = vsel %vm9160_vm6, %v4104_v42, %v4108_v39  ;;  %v4116_v23 = vrot.slane %v4114_v61, 1  ;;  %vm9161_vm9 = vmmov %vm9141_vm0 }
 0x1a7   : > { %6539 = vmatprep.mubr.msk.bf16.mxu0 %vm1917_vm10, %v3051_v8  ;;  %v3322_v19 = vsel %vm9159_vm14, %v7443_v62, 0  ;;  %v3342_v35 = vshll.u32 %v3320_v53, 16  ;;  %v3054_v10 = vor.u32 %v3052_v9, %v3050_v31  ;;  %v3347_v11 = vshrl.u32 %v3321_v20, 16  ;;  %v9165_v9 = vld [vmem:[#allocation8_spill] sm:$0xff]  ;;  %vm9167_vm14 = vmmov %vm9164_vm5 }
 0x1a8   : > { %vm4374_vm8 = vcmp.ne.s16.totalorder %v8024_v34, 0  ;;  %v4376_v4 = vsel %vm3319_vm4, %v7376_v43, 0  ;;  %v4118_v27 = vshrl.u32 %v3998_v55, 16  ;;  %v4122_v60 = vshll.u32 %v3999_v58, 16  ;;  %v9162_v55 = vld [vmem:[#allocation6_spill] sm:$0xff] }
 0x1a9   : > { %6634 = vmatmul.mubr.msk.bf16.gmra.mrb[4].mxu1 %vm1917_vm10, %v4101_v22  ;;  %v3344_v12 = vor.u32 %v3342_v35, %v3341_v25  ;;  %v3355_v47 = vshrl.u32 %v3322_v19, 16  ;;  %v3058_v16 = vrot.slane %v3056_v0, 1  ;;  %v4110_v52 = vshrl.u32 %v3997_v63, 16 }
 0x1aa   : > { %6637 = vmatprep.mubr.msk.bf16.mxu1 %vm1917_vm10, %v4109_v24  ;;  %v4120_v13 = vor.u32 %v4118_v27, %v4116_v23  ;;  %v4398_v42 = vshrl.u32 %v4376_v4, 16  ;;  %v3349_v61 = vrot.slane %v3347_v11, 7  ;;  %v4375_v31 = vsel %vm4374_vm8, %v7380_v6, 0 }
 0x1ab   : > { %v3059_v53 = vsel %vm9161_vm9, %v3054_v10, %v3058_v16  ;;  %v4112_v57 = vor.u32 %v4110_v52, %v4108_v39  ;;  %v3345_v34 = vsel %vm2131_vm15, %v7323_v7, %v3344_v12  ;;  %v4124_v44 = vrot.slane %v4122_v60, 1  ;;  %vm9170_vm9 = vmmov %vm9164_vm5 }
 0x1ac   : > { %v3357_v54 = vrot.slane %v3355_v47, 7  ;;  %vm9163_vm4 = vcmp.ne.s16.totalorder %v9162_v55, 0  ;;  %v3350_v8 = vshll.u32 %v3321_v20, 16  ;;  %v3358_v39 = vshll.u32 %v3322_v19, 16 }
 0x1ad   : > { %v3323_v22 = vsel %vm9163_vm4, %v7439_v51, 0  ;;  %v4117_v63 = vsel %vm9164_vm5, %v4112_v57, %v4116_v23  ;;  %vm9166_vm0 = vcmp.ne.s16.totalorder %v9165_v9, 0  ;;  %v4125_v0 = vsel %vm9167_vm14, %v4120_v13, %v4124_v44 }
 0x1ae   : > { %6540 = vmatmul.mubr.msk.bf16.gmra.mrb[60].mxu0 %vm1917_vm10, %v3059_v53  ;;  %v3324_v6 = vsel %vm9166_vm0, %v7497_v59, 0  ;;  %v4394_v24 = vshrl.u32 %v4375_v31, 16  ;;  %v4400_v35 = vrot.slane %v4398_v42, 7  ;;  %vm9168_vm6 = vcmp.ne.s16.totalorder %v9156_v49, 0  ;;  %vm9172_vm5 = vmmov %vm9166_vm0 }
 0x1af   : > { %6545 = vmatprep.mubr.msk.bf16.mxu0 %vm1917_vm10, %v3345_v34  ;;  %v4377_v10 = vsel %vm9168_vm6, %v7443_v62, 0  ;;  %v3352_v23 = vor.u32 %v3350_v8, %v3349_v61  ;;  %v4126_v11 = vshrl.u32 %v3999_v58, 16  ;;  %v3363_v20 = vshrl.u32 %v3323_v22, 16 }
 0x1b0   : > { %vm9169_vm8 = vcmp.ne.s16.totalorder %v9158_v32, 0  ;;  %v3360_v12 = vor.u32 %v3358_v39, %v3357_v54  ;;  %v4401_v27 = vshll.u32 %v4376_v4, 16  ;;  %v3371_v60 = vshrl.u32 %v3324_v6, 16 }
 0x1b1   : > { %6638 = vmatmul.mubr.msk.bf16.gmra.mrb[8].mxu1 %vm1917_vm10, %v4117_v63  ;;  %v4378_v19 = vsel %vm9169_vm8, %v7439_v51, 0  ;;  %v4128_v47 = vor.u32 %v4126_v11, %v4124_v44  ;;  %v4406_v16 = vshrl.u32 %v4377_v10, 16  ;;  %v4396_v52 = vrot.slane %v4394_v24, 7 }
 0x1b2   : > { %6641 = vmatprep.mubr.msk.bf16.mxu1 %vm1917_vm10, %v4125_v0  ;;  %v4403_v13 = vor.u32 %v4401_v27, %v4400_v35  ;;  %v4414_v42 = vshrl.u32 %v4378_v19, 16  ;;  %v3353_v49 = vsel %vm2131_vm15, %v3341_v25, %v3352_v23  ;;  %v3365_v53 = vrot.slane %v3363_v20, 7 }
 0x1b3   : > { %v3361_v58 = vsel %vm2131_vm15, %v3349_v61, %v3360_v12  ;;  %v3373_v57 = vrot.slane %v3371_v60, 7  ;;  %v3325_v32 = vsel %vm1593_vm13, %v7494_v21, 0  ;;  %v4129_v4 = vsel %vm9170_vm9, %v4128_v47, %v7846_v17 }
 0x1b4   : > { %v3366_v31 = vshll.u32 %v3323_v22, 16  ;;  %v4408_v34 = vrot.slane %v4406_v16, 7  ;;  %v3326_v25 = vsel %vm1594_vm7, %v7547_v3, 0  ;;  %v4404_v61 = vsel %vm2131_vm15, %v4396_v52, %v4403_v13 }
 0x1b5   : > { %v3374_v63 = vshll.u32 %v3324_v6, 16  ;;  %v4416_v8 = vrot.slane %v4414_v42, 7  ;;  %v4379_v39 = vsel %vm9163_vm4, %v7497_v59, 0  ;;  %v4409_v24 = vshll.u32 %v4377_v10, 16 }
 0x1b6   : > { %6546 = vmatmul.mubr.msk.bf16.vlgmr.msra.gmra.mrb[32].mxu0 %vm1917_vm10, %v3353_v49  ;;  %v3368_v0 = vor.u32 %v3366_v31, %v3365_v53  ;;  %v3379_v22 = vshrl.u32 %v3325_v32, 16  ;;  %v4380_v23 = vsel %vm9172_vm5, %v7494_v21, 0  ;;  %v4417_v20 = vshll.u32 %v4378_v19, 16  ;;  %v8435_v49 = vld [vmem:[%s8956_s4 + $0x10] sm:$0x3] }
 0x1b7   : > { %6549 = vmatprep.mubr.msk.bf16.mxu0 %vm1917_vm10, %v3361_v58  ;;  %v3376_v11 = vor.u32 %v3374_v63, %v3373_v57  ;;  %v3387_v12 = vshrl.u32 %v3326_v25, 16  ;;  %v4411_v27 = vor.u32 %v4409_v24, %v4408_v34  ;;  %v4422_v60 = vshrl.u32 %v4379_v39, 16 }
 0x1b8   : > { %v4419_v6 = vor.u32 %v4417_v20, %v4416_v8  ;;  %v4430_v47 = vshrl.u32 %v4380_v23, 16  ;;  %v3369_v16 = vsel %vm2131_vm15, %v3357_v54, %v3368_v0  ;;  %v3381_v55 = vrot.slane %v3379_v22, 7 }
 0x1b9   : > { %6642 = vmatmul.mubr.msk.bf16.gmra.mrb[12].mxu1 %vm1917_vm10, %v4129_v4  ;;  %v4825_v10 = vsel %vm1966_vm1, %v8211_v26, 0  ;;  %v3377_v52 = vsel %vm2131_vm15, %v3365_v53, %v3376_v11  ;;  %v3389_v13 = vrot.slane %v3387_v12, 7  ;;  %v4412_v9 = vsel %vm2131_vm15, %v4400_v35, %v4411_v27  ;;  %v9173_v11 = vld [vmem:[#allocation10_spill] sm:$0xff]  ;;  %v9175_v12 = vld [vmem:[#allocation13_spill] sm:$0xff] }
 0x1ba   : > { %6647 = vmatprep.mubr.msk.bf16.mxu1 %vm1917_vm10, %v4404_v61  ;;  %v3382_v19 = vshll.u32 %v3325_v32, 16  ;;  %v4424_v42 = vrot.slane %v4422_v60, 7  ;;  %v4420_v54 = vsel %vm2131_vm15, %v4408_v34, %v4419_v6  ;;  %v3390_v58 = vshll.u32 %v3326_v25, 16 }
 0x1bb   : > { %v4432_v26 = vrot.slane %v4430_v47, 7  ;;  %v4381_v53 = vsel %vm1593_vm13, %v7547_v3, 0  ;;  %v4425_v32 = vshll.u32 %v4379_v39, 16  ;;  %v4382_v4 = vsel %vm1594_vm7, %v7543_v46, 0 }
 0x1bc   : > { %v3384_v35 = vor.u32 %v3382_v19, %v3381_v55  ;;  %v3392_v31 = vor.u32 %v3390_v58, %v3389_v13  ;;  %v4433_v61 = vshll.u32 %v4380_v23, 16  ;;  %v4438_v25 = vshrl.u32 %v4381_v53, 16 }
 0x1bd   : > { %v4427_v34 = vor.u32 %v4425_v32, %v4424_v42  ;;  %v4446_v0 = vshrl.u32 %v4382_v4, 16  ;;  %vm9174_vm7 = vcmp.ne.s16.totalorder %v9173_v11, 0  ;;  %vm9176_vm13 = vcmp.ne.s16.totalorder %v9175_v12, 0 }
 0x1be   : > { %6550 = vmatmul.mubr.msk.bf16.gmra.mrb[36].mxu0 %vm1917_vm10, %v3369_v16  ;;  %v4435_v63 = vor.u32 %v4433_v61, %v4432_v26  ;;  %v3385_v30 = vsel %vm2131_vm15, %v3373_v57, %v3384_v35  ;;  %v3393_v24 = vsel %vm2131_vm15, %v3381_v55, %v3392_v31  ;;  %v4440_v44 = vrot.slane %v4438_v25, 7  ;;  %v9177_v55 = vld [vmem:[#allocation20_spill] sm:$0xff]  ;;  %v9180_v35 = vld [vmem:[#allocation21_spill] sm:$0xff] }
 0x1bf   : > { %6553 = vmatprep.mubr.msk.bf16.mxu0 %vm1917_vm10, %v3377_v52  ;;  %v4428_v39 = vsel %vm2131_vm15, %v4416_v8, %v4427_v34  ;;  %v4448_v23 = vrot.slane %v4446_v0, 7  ;;  %v4383_v20 = vsel %vm9174_vm7, %v9097_v2, 0  ;;  %v4441_v57 = vshll.u32 %v4381_v53, 16 }
 0x1c0   : > { %v4436_v22 = vsel %vm2131_vm15, %v4424_v42, %v4435_v63  ;;  %v4384_v27 = vsel %vm9176_vm13, %v9099_v33, 0  ;;  %v4449_v8 = vshll.u32 %v4382_v4, 16  ;;  %v4454_v6 = vshrl.u32 %v4383_v20, 16 }
 0x1c1   : > { %6648 = vmatmul.mubr.msk.bf16.vlgmr.msra.gmra.mrb[16].mxu1 %vm1917_vm10, %v4412_v9  ;;  %v4443_v60 = vor.u32 %v4441_v57, %v4440_v44  ;;  %v4462_v16 = vshrl.u32 %v4384_v27, 16  ;;  %v4457_v53 = vshll.u32 %v4383_v20, 16  ;;  %vm9181_vm14 = vcmp.ne.s16.totalorder %v9180_v35, 0 }
 0x1c2   : > { %6680 = vmatpush3.bf16.msra.mxu1 %v4825_v10  ;;  %6651 = vmatprep.mubr.msk.bf16.mxu1 %vm1917_vm10, %v4420_v54  ;;  %v4451_v47 = vor.u32 %v4449_v8, %v4448_v23  ;;  %v3401_v10 = vsel %vm2131_vm15, %v3389_v13, %v9177_v55  ;;  %v4456_v9 = vrot.slane %v4454_v6, 7  ;;  %v9178_v54 = vld [vmem:[#allocation14_spill] sm:$0xff]  ;;  %v4386_v13 = vsel %vm9181_vm14, %v7636_v14, 0 }
 0x1c3   : > { %7048 = vmatprep.subr.msk.bf16.mxu1 %vm1966_vm1, %v8435_v49  ;;  %v4444_v52 = vsel %vm2131_vm15, %v4432_v26, %v4443_v60  ;;  %v4464_v42 = vrot.slane %v4462_v16, 7  ;;  %vm9179_vm0 = vcmp.ne.s16.totalorder %v9178_v54, 0  ;;  %v4465_v32 = vshll.u32 %v4384_v27, 16 }
 0x1c4   : > { %v4452_v19 = vsel %vm2131_vm15, %v4440_v44, %v4451_v47  ;;  %v4385_v58 = vsel %vm9179_vm0, %v7639_v48, 0  ;;  %v4459_v4 = vor.u32 %v4457_v53, %v4456_v9  ;;  %v4478_v61 = vshrl.u32 %v4386_v13, 16  ;;  %v9184_v44 = vld [vmem:[#allocation23_spill] sm:$0xff] }
 0x1c5   : > { %v4470_v26 = vshrl.u32 %v4385_v58, 16  ;;  %v4467_v31 = vor.u32 %v4465_v32, %v4464_v42  ;;  %vm9185_vm8 = vcmp.ne.s16.totalorder %v9184_v44, 0  ;;  %v4481_v11 = vshll.u32 %v4386_v13, 16  ;;  %v9186_v47 = vld [vmem:[#allocation27_spill] sm:$0xff] }
 0x1c6   : > { %6554 = vmatmul.mubr.msk.bf16.gmra.mrb[40].mxu0 %vm1917_vm10, %v3385_v30  ;;  %v4460_v34 = vsel %vm2131_vm15, %v4448_v23, %v4459_v4  ;;  %v4480_v0 = vrot.slane %v4478_v61, 7  ;;  %v9182_v30 = vld [vmem:[#allocation19_spill] sm:$0xff]  ;;  %vm9187_vm9 = vcmp.ne.s16.totalorder %v9186_v47, 0  ;;  %vm9210_vm7 = vcmp.ne.s16.totalorder %v7932_v5, 0 }
 0x1c7   : > { %6557 = vmatprep.mubr.msk.bf16.mxu0 %vm1917_vm10, %v3393_v24  ;;  %v4472_v25 = vrot.slane %v4470_v26, 7  ;;  %v4468_v63 = vsel %vm2131_vm15, %v4456_v9, %v4467_v31  ;;  %vm9183_vm6 = vcmp.ne.s16.totalorder %v9182_v30, 0  ;;  %v4389_v16 = vsel %vm9187_vm9, %v7748_v50, 0  ;;  %v9193_v44 = vld [vmem:[#allocation15_spill] sm:$0xff] }
 0x1c8   : > { %v4387_v24 = vsel %vm9183_vm6, %v7696_v28, 0  ;;  %v4483_v57 = vor.u32 %v4481_v11, %v4480_v0  ;;  %v4505_v4 = vshll.u32 %v4389_v16, 16  ;;  %v5207_v30 = vsel %vm1966_vm1, %v8435_v49, 0  ;;  %v9196_v11 = vld [vmem:[#allocation18_spill] sm:$0xff]  ;;  %v9197_v49 = vld [vmem:[#allocation25_spill] sm:$0xff] }
 0x1c9   : > { %6652 = vmatmul.mubr.msk.bf16.gmra.mrb[20].mxu1 %vm1917_vm10, %v4428_v39  ;;  %v4473_v39 = vshll.u32 %v4385_v58, 16  ;;  %v4486_v23 = vshrl.u32 %v4387_v24, 16  ;;  %v4489_v55 = vshll.u32 %v4387_v24, 16  ;;  %v9191_v24 = vld [vmem:[#allocation11_spill] sm:$0xff]  ;;  %vm9211_vm13 = vsmask.f32 7424 }
 0x1ca   : > { %6655 = vmatprep.mubr.msk.bf16.mxu1 %vm1917_vm10, %v4436_v22  ;;  %v4388_v22 = vsel %vm9185_vm8, %v7693_v38, 0  ;;  %v4484_v60 = vsel %vm2131_vm15, %v4472_v25, %v4483_v57  ;;  %v9200_v57 = vld [vmem:[#allocation29_spill] sm:$0xff]  ;;  %vm9212_vm0 = vcmp.ne.s16.totalorder %v8033_v1, 0  ;;  %v5025_v5 = vsel %vm2903_vm12, %v7547_v3, 0  ;;  %vm9214_vm14 = vmmov %vm9211_vm13 }
 0x1cb   : > { %v4475_v20 = vor.u32 %v4473_v39, %v4472_v25  ;;  %v4494_v12 = vshrl.u32 %v4388_v22, 16  ;;  %v4488_v8 = vrot.slane %v4486_v23, 7  ;;  %v4497_v9 = vshll.u32 %v4388_v22, 16  ;;  %v9192_v39 = vld [vmem:[#allocation12_spill] sm:$0xff]  ;;  %vm9215_vm6 = vmmov %vm9211_vm13 }
 0x1cc   : > { %v9194_v22 = vld [vmem:[#allocation16_spill] sm:$0xff]  ;;  %vm9218_vm12 = vmmov %vm9215_vm6 }
 0x1cd   : > { %v4476_v27 = vsel %vm2131_vm15, %v4464_v42, %v4475_v20  ;;  %v4496_v6 = vrot.slane %v4494_v12, 7  ;;  %v4502_v42 = vshrl.u32 %v4389_v16, 16  ;;  %v9198_v20 = vld [vmem:[#allocation26_spill] sm:$0xff]  ;;  %v9199_v23 = vld [vmem:[#allocation28_spill] sm:$0xff]  ;;  %vm9219_vm8 = vmmov %vm9215_vm6 }
 0x1ce   : > { %6558 = vmatmul.mubr.msk.bf16.gmra.mrb[44].mxu0 %vm1917_vm10, %v3401_v10  ;;  %v9188_v10 = vld [vmem:[#allocation30_spill] sm:$0xff]  ;;  %v9205_v16 = vld [vmem:[#allocation24_spill] sm:$0xff] }
 0x1cf   : > { %vm9189_vm4 = vcmp.ne.s16.totalorder %v9188_v10, 0  ;;  %v4499_v54 = vor.u32 %v4497_v9, %v4496_v6  ;;  %v4504_v35 = vrot.slane %v4502_v42, 7  ;;  %v5528_v12 = vld [vmem:[%s8959_s7] sm:$0x3]  ;;  %vm9206_vm5 = vcmp.ne.s16.totalorder %v9205_v16, 0 }
 0x1d0   : > { %7049 = vmatprep.subr.msk.bf16.mxu0 %vm1966_vm1, %v5528_v12  ;;  %v9208_v42 = vld [vmem:[#allocation22_spill] sm:$0xff] }
 0x1d1   : > { %6656 = vmatmul.mubr.msk.bf16.gmra.mrb[24].mxu1 %vm1917_vm10, %v4444_v52  ;;  %v4390_v52 = vsel %vm9189_vm4, %v9133_v15, 0  ;;  %v4500_v13 = vsel %vm2131_vm15, %v4488_v8, %v4499_v54  ;;  %v4507_v31 = vor.u32 %v4505_v4, %v4504_v35  ;;  %vm9225_vm4 = vcmp.ne.s16.totalorder %v8187_v36, 0 }
 0x1d2   : > { %6659 = vmatprep.mubr.msk.bf16.mxu1 %vm1917_vm10, %v4452_v19  ;;  %v4491_v19 = vor.u32 %v4489_v55, %v4488_v8  ;;  %v4510_v58 = vshrl.u32 %v4390_v52, 16  ;;  %v4513_v26 = vshll.u32 %v4390_v52, 16  ;;  %v9201_v8 = vld [vmem:[#allocation31_spill] sm:$0xff]  ;;  %v5021_v55 = vsel %vm9206_vm5, %v7443_v62, 0 }
 0x1d3   : > { %v9207_v52 = vld [vmem:[#allocation35_spill] sm:$0xff]  ;;  %v5045_v9 = vshll.u32 %v5021_v55, 16  ;;  %v5049_v4 = vshrl.u32 %v5021_v55, 16 }
 0x1d4   : > { %v4492_v53 = vsel %vm2131_vm15, %v4480_v0, %v4491_v19  ;;  %v4512_v32 = vrot.slane %v4510_v58, 7  ;;  %v9190_v0 = vld [vmem:[#allocation9_spill] sm:$0xff] }
 0x1d6   : > { %v4515_v61 = vor.u32 %v4513_v26, %v4512_v32 }
 0x1d8   : > { %v4516_v25 = vsel %vm2131_vm15, %v4504_v35, %v4515_v61 }
 0x1d9   : > { %6660 = vmatmul.mubr.msk.bf16.gmra.mrb[28].mxu1 %vm1917_vm10, %v4460_v34  ;;  %v4508_v34 = vsel %vm2131_vm15, %v4496_v6, %v4507_v31  ;;  %v9203_v6 = vld [vmem:[#allocation36_spill] sm:$0xff] }
 0x1da   : > { %6663 = vmatprep.mubr.msk.bf16.mxu1 %vm1917_vm10, %v4468_v63  ;;  %v4517_v63 = vsel %vm2131_vm15, %v4512_v32, %v7323_v7  ;;  %v9195_v7 = vld [vmem:[#allocation17_spill] sm:$0xff]  ;;  %vm9204_vm15 = vcmp.ne.s16.totalorder %v9203_v6, 0 }
 0x1db   : > { %v5020_v47 = vsel %vm9204_vm15, %v7376_v43, 0  ;;  %v5023_v43 = vsel %vm9210_vm7, %v7497_v59, 0  ;;  %vm9229_vm7 = vcmp.ne.s16.totalorder %v8275_v37, 0 }
 0x1dc   : > { %v5040_v10 = vshll.u32 %v5020_v47, 16  ;;  %v5038_v58 = vshrl.u32 %v5020_v47, 16  ;;  %v5061_v32 = vshll.u32 %v5023_v43, 16 }
 0x1de   : > { %v5042_v19 = vrot.slane %v5040_v10, 1  ;;  %v5063_v61 = vrot.slane %v5061_v32, 1 }
 0x1e0   : > { %v5043_v62 = vor.u32 %v5042_v19, %v5038_v58  ;;  %v5031_v58 = vsel %vm9225_vm4, %v7696_v28, 0 }
 0x1e1   : > { %6664 = vmatmul.mubr.msk.bf16.gmra.mrb[0].mxu1 %vm1917_vm10, %v4476_v27  ;;  %v5578_v27 = vsel %vm1966_vm1, %v5528_v12, 0  ;;  %vm9209_vm1 = vcmp.ne.s16.totalorder %v9208_v42, 0  ;;  %v5081_v12 = vshrl.u32 %v5025_v5, 16 }
 0x1e2   : > { %6667 = vmatprep.mubr.msk.bf16.mxu1 %vm1917_vm10, %v4484_v60  ;;  %6748 = vmatpush3.bf16.msra.mxu0 %v5578_v27  ;;  %v9202_v60 = vld [vmem:[#allocation32_spill] sm:$0xff]  ;;  %v5022_v54 = vsel %vm9209_vm1, %v7439_v51, 0  ;;  %v5024_v51 = vsel %vm9212_vm0, %v7494_v21, 0  ;;  %vm9228_vm1 = vcmp.ne.s16.totalorder %v8243_v18, 0 }
 0x1e3   : > { %v5053_v35 = vshll.u32 %v5022_v54, 16  ;;  %v5057_v31 = vshrl.u32 %v5022_v54, 16 }
 0x1e9   : > { %6668 = vmatmul.mubr.msk.bf16.gmra.mrb[4].mxu1 %vm1917_vm10, %v4492_v53  ;;  %v5047_v53 = vrot.slane %v5045_v9, 1 }
 0x1ea   : > { %6671 = vmatprep.mubr.msk.bf16.mxu1 %vm1917_vm10, %v4500_v13 }
 0x1eb   : > { %v5048_v13 = vsel %vm9211_vm13, %v5043_v62, %v5047_v53  ;;  %v5051_v26 = vor.u32 %v5049_v4, %v5047_v53  ;;  %v5032_v4 = vsel %vm9228_vm1, %v7693_v38, 0 }
 0x1ec   : > { %v5137_v37 = vshrl.u32 %v5032_v4, 16 }
 0x1f1   : > { %6672 = vmatmul.mubr.msk.bf16.gmra.mrb[8].mxu1 %vm1917_vm10, %v4508_v34 }
 0x1f2   : > { %6675 = vmatprep.mubr.msk.bf16.mxu1 %vm1917_vm10, %v4516_v25 }
 0x1f9   : > { %6676 = vmatmul.mubr.msk.bf16.gmra.mrb[12].mxu1 %vm1917_vm10, %v4517_v63 }
 0x1fa   : > { %6681 = vmatprep.mubr.msk.bf16.mxu1 %vm1917_vm10, %v9190_v0  ;;  %v5077_v0 = vshll.u32 %v5025_v5, 16  ;;  %v5129_v5 = vshrl.u32 %v5031_v58, 16 }
 0x1fc   : > { %v5079_v3 = vrot.slane %v5077_v0, 1 }
 0x201   : > { %6682 = vmatmul.mubr.msk.bf16.vlgmr.msra.gmra.mrb[16].mxu1 %vm1917_vm10, %v9191_v24 }
 0x202   : > { %6714 = vmatpush3.bf16.msra.mxu1 %v5207_v30  ;;  %6685 = vmatprep.mubr.msk.bf16.mxu1 %vm1917_vm10, %v9192_v39  ;;  %v5065_v30 = vshrl.u32 %v5023_v43, 16  ;;  %v5026_v39 = vsel %vm2904_vm11, %v7543_v46, 0  ;;  %v5083_v46 = vor.u32 %v5081_v12, %v5079_v3  ;;  %vm9221_vm11 = vcmp.ne.s16.totalorder %v8126_v45, 0 }
 0x203   : > { %v5089_v6 = vshrl.u32 %v5026_v39, 16  ;;  %v5029_v47 = vsel %vm9221_vm11, %v7639_v48, 0 }
 0x204   : > { %v5067_v21 = vor.u32 %v5065_v30, %v5063_v61  ;;  %v5109_v9 = vshll.u32 %v5029_v47, 16  ;;  %v5113_v32 = vshrl.u32 %v5029_v47, 16 }
 0x206   : > { %v5111_v48 = vrot.slane %v5109_v9, 1 }
 0x209   : > { %6686 = vmatmul.mubr.msk.bf16.gmra.mrb[20].mxu1 %vm1917_vm10, %v9193_v44  ;;  %v5073_v44 = vshrl.u32 %v5024_v51, 16 }
 0x20a   : > { %6689 = vmatprep.mubr.msk.bf16.mxu1 %vm1917_vm10, %v9194_v22 }
 0x211   : > { %6690 = vmatmul.mubr.msk.bf16.gmra.mrb[24].mxu1 %vm1917_vm10, %v9195_v7  ;;  %v5027_v7 = vsel %vm2905_vm3, %v9097_v2, 0  ;;  %vm9222_vm3 = vmmov %vm9215_vm6 }
 0x212   : > { %6693 = vmatprep.mubr.msk.bf16.mxu1 %vm1917_vm10, %v9196_v11  ;;  %vm9223_vm9 = vmmov %vm9222_vm3  ;;  %v5097_v19 = vshrl.u32 %v5027_v7, 16 }
 0x213   : > { %vm9226_vm15 = vmmov %vm9222_vm3 }
 0x214   : > { %vm9227_vm5 = vmmov %vm9222_vm3 }
 0x215   : > { %vm9230_vm13 = vmmov %vm9222_vm3 }
 0x216   : > { %vm9231_vm0 = vmmov %vm9222_vm3 }
 0x217   : > { %vm9236_vm11 = vmmov %vm9231_vm0 }
 0x219   : > { %6694 = vmatmul.mubr.msk.bf16.gmra.mrb[28].mxu1 %vm1917_vm10, %v9197_v49  ;;  %v5085_v49 = vshll.u32 %v5026_v39, 16 }
 0x21a   : > { %6697 = vmatprep.mubr.msk.bf16.mxu1 %vm1917_vm10, %v9198_v20 }
 0x21b   : > { %v5087_v27 = vrot.slane %v5085_v49, 1 }
 0x21d   : > { %v5091_v16 = vor.u32 %v5089_v6, %v5087_v27  ;;  %v5088_v10 = vsel %vm9222_vm3, %v5083_v46, %v5087_v27 }
 0x221   : > { %6698 = vmatmul.mubr.msk.bf16.gmra.mrb[0].mxu1 %vm1917_vm10, %v9199_v23 }
 0x222   : > { %6701 = vmatprep.mubr.msk.bf16.mxu1 %vm1917_vm10, %v9200_v57  ;;  %v5093_v57 = vshll.u32 %v5027_v7, 16 }
 0x224   : > { %v5095_v2 = vrot.slane %v5093_v57, 1 }
 0x229   : > { %6702 = vmatmul.mubr.msk.bf16.gmra.mrb[4].mxu1 %vm1917_vm10, %v9201_v8 }
 0x22a   : > { %6705 = vmatprep.mubr.msk.bf16.mxu1 %vm1917_vm10, %v9202_v60  ;;  %v5028_v60 = vsel %vm2906_vm2, %v9099_v33, 0  ;;  %v5099_v33 = vor.u32 %v5097_v19, %v5095_v2  ;;  %vm9224_vm2 = vcmp.ne.s16.totalorder %v8129_v29, 0 }
 0x22b   : > { %v5101_v55 = vshll.u32 %v5028_v60, 16  ;;  %v5030_v54 = vsel %vm9224_vm2, %v7636_v14, 0  ;;  %v5105_v45 = vshrl.u32 %v5028_v60, 16  ;;  %v5115_v14 = vor.u32 %v5113_v32, %v5111_v48 }
 0x22c   : > { %v5117_v43 = vshll.u32 %v5030_v54, 16  ;;  %v5121_v36 = vshrl.u32 %v5030_v54, 16 }
 0x22d   : > { %v5103_v42 = vrot.slane %v5101_v55, 1 }
 0x22e   : > { %v5119_v29 = vrot.slane %v5117_v43, 1 }
 0x22f   : > { %v5107_v53 = vor.u32 %v5105_v45, %v5103_v42  ;;  %v5104_v62 = vsel %vm9226_vm15, %v5099_v33, %v5103_v42 }
 0x231   : > { %6706 = vmatmul.mubr.msk.bf16.gmra.mrb[8].mxu1 %vm1917_vm10, %v9207_v52  ;;  %v5096_v52 = vsel %vm9223_vm9, %v5091_v16, %v5095_v2 }
 0x232   : > { %6709 = vmatprep.mubr.msk.bf16.mxu1 %vm1917_vm10, %v8149_v40  ;;  %v5055_v40 = vrot.slane %v5053_v35, 1  ;;  %v5112_v35 = vsel %vm9227_vm5, %v5107_v53, %v5111_v48 }
 0x234   : > { %v5059_v34 = vor.u32 %v5057_v31, %v5055_v40  ;;  %v5056_v25 = vsel %vm9214_vm14, %v5051_v26, %v5055_v40  ;;  %v5033_v40 = vsel %vm9229_vm7, %v7748_v50, 0  ;;  %v5123_v26 = vor.u32 %v5121_v36, %v5119_v29 }
 0x235   : > { %v5120_v31 = vsel %vm9230_vm13, %v5115_v14, %v5119_v29  ;;  %v5141_v59 = vshll.u32 %v5033_v40, 16  ;;  %vm9232_vm14 = vcmp.ne.s16.totalorder %v8306_v56, 0  ;;  %v8670_v29 = vld [vmem:[%s8958_s6] ss:$0 sm:$0xff] }
 0x236   : > { %v5064_v63 = vsel %vm9215_vm6, %v5059_v34, %v5063_v61  ;;  %v5034_v38 = vsel %vm9232_vm14, %v9133_v15, 0  ;;  %vm9233_vm6 = vmmov %vm9231_vm0 }
 0x237   : > { %v5143_v50 = vrot.slane %v5141_v59, 1  ;;  %v5153_v15 = vshrl.u32 %v5034_v38, 16 }
 0x239   : > { %6710 = vmatmul.mubr.bf16.gmra.mrb[12].mxu1 %v9096_v41  ;;  %v5069_v41 = vshll.u32 %v5024_v51, 16  ;;  %v5133_v51 = vshll.u32 %v5032_v4, 16 }
 0x23a   : > { %6715 = vmatprep.mubr.msk.bf16.mxu1 %vm1917_vm10, %v5048_v13  ;;  %v5125_v13 = vshll.u32 %v5031_v58, 16 }
 0x23b   : > { %v5071_v1 = vrot.slane %v5069_v41, 1  ;;  %v5135_v18 = vrot.slane %v5133_v51, 1  ;;  %v5149_v41 = vshll.u32 %v5034_v38, 16 }
 0x23c   : > { %v5127_v28 = vrot.slane %v5125_v13, 1 }
 0x23d   : > { %v5075_v11 = vor.u32 %v5073_v44, %v5071_v1  ;;  %v5072_v20 = vsel %vm9218_vm12, %v5067_v21, %v5071_v1  ;;  %vm9234_vm12 = vmmov %vm9231_vm0  ;;  %v5151_v30 = vrot.slane %v5149_v41, 1  ;;  %v5145_v21 = vshrl.u32 %v5033_v40, 16 }
 0x23e   : > { %v5128_v61 = vsel %vm9231_vm0, %v5123_v26, %v5127_v28  ;;  %v5131_v34 = vor.u32 %v5129_v5, %v5127_v28 }
 0x23f   : > { %v5080_v23 = vsel %vm9219_vm8, %v5075_v11, %v5079_v3  ;;  %v5147_v39 = vor.u32 %v5145_v21, %v5143_v50  ;;  %v5155_v3 = vor.u32 %v5153_v15, %v5151_v30  ;;  %vm9235_vm8 = vmmov %vm9231_vm0 }
 0x241   : > { %6716 = vmatmul.mubr.msk.bf16.vlgmr.msra.gmra.mrb[16].mxu1 %vm1917_vm10, %v5056_v25  ;;  %v5139_v25 = vor.u32 %v5137_v37, %v5135_v18  ;;  %v5152_v22 = vsel %vm9235_vm8, %v5147_v39, %v5151_v30  ;;  %v5156_v7 = vsel %vm9236_vm11, %v5155_v3, %v7846_v17 }
 0x242   : > { %6719 = vmatprep.mubr.msk.bf16.mxu1 %vm1917_vm10, %v5064_v63  ;;  %v5136_v63 = vsel %vm9233_vm6, %v5131_v34, %v5135_v18 }
 0x243   : > { %v5144_v0 = vsel %vm9234_vm12, %v5139_v25, %v5143_v50 }
 0x249   : > { %6720 = vmatmul.mubr.msk.bf16.gmra.mrb[20].mxu1 %vm1917_vm10, %v5072_v20 }
 0x24a   : > { %6723 = vmatprep.mubr.msk.bf16.mxu1 %vm1917_vm10, %v5080_v23 }
 0x251   : > { %6724 = vmatmul.mubr.msk.bf16.gmra.mrb[24].mxu1 %vm1917_vm10, %v5088_v10 }
 0x252   : > { %6727 = vmatprep.mubr.msk.bf16.mxu1 %vm1917_vm10, %v5096_v52 }
 0x259   : > { %6728 = vmatmul.mubr.msk.bf16.gmra.mrb[28].mxu1 %vm1917_vm10, %v5104_v62 }
 0x25a   : > { %6731 = vmatprep.mubr.msk.bf16.mxu1 %vm1917_vm10, %v5112_v35  ;;  %v8665_v35 = vld [vmem:[%s8957_s5] ss:$0 sm:$0xff] }
 0x261   : > { %6732 = vmatmul.mubr.msk.bf16.gmra.mrb[0].mxu1 %vm1917_vm10, %v5120_v31 }
 0x262   : > { %6735 = vmatprep.mubr.msk.bf16.mxu1 %vm1917_vm10, %v5128_v61 }
 0x269   : > { %6736 = vmatmul.mubr.msk.bf16.gmra.mrb[4].mxu1 %vm1917_vm10, %v5136_v63  ;;  %v8615_v1 = vpop.f32.mrb[48].mxu0 }
 0x26a   : > { %6739 = vmatprep.mubr.msk.bf16.mxu1 %vm1917_vm10, %v5144_v0  ;;  %v8617_v56 = vpop.f32.mrb[49].mxu0 }
 0x26b   : > { %v8619_v24 = vpop.f32.mrb[50].mxu0 }
 0x26c   : > { %v8621_v44 = vpop.f32.mrb[51].mxu0 }
 0x271   : > { %6740 = vmatmul.mubr.msk.bf16.gmra.mrb[8].mxu1 %vm1917_vm10, %v5152_v22  ;;  %v8628_v11 = vpop.f32.mrb[52].mxu0 }
 0x272   : > { %6743 = vmatprep.mubr.msk.bf16.mxu1 %vm1917_vm10, %v5156_v7  ;;  %v8630_v49 = vpop.f32.mrb[53].mxu0 }
 0x273   : > { %v8632_v20 = vpop.f32.mrb[54].mxu0 }
 0x274   : > { %v8634_v23 = vpop.f32.mrb[55].mxu0 }
 0x279   : > { %6744 = vmatmul.mubr.msk.bf16.gmra.mrb[12].mxu1 %vm1917_vm10, %v7846_v17  ;;  %v8638_v57 = vpop.f32.mrb[56].mxu0 }
 0x27a   : > { %v8640_v12 = vpop.f32.mrb[57].mxu0 }
 0x27b   : > { %v8642_v27 = vpop.f32.mrb[58].mxu0 }
 0x27c   : > { %v8644_v46 = vpop.f32.mrb[59].mxu0 }
 0x281   : > { %v8646_v8 = vpop.f32.mrb[60].mxu0 }
 0x282   : > { %v8648_v60 = vpop.f32.mrb[61].mxu0 }
 0x283   : > { %v8650_v6 = vpop.f32.mrb[62].mxu0 }
 0x284   : > { %v8652_v2 = vpop.f32.mrb[63].mxu0 }
 0x289   : > { %v6547_v47 = vpop.f32.mrb[32].mxu0 }
 0x28a   : > { %v3551_v16 = vpop.f32.mrb[33].mxu0 }
 0x28b   : > { %v6548_v55 = vpop.f32.mrb[34].mxu0 }
 0x28c   : > { %v3554_v17 = vpop.f32.mrb[35].mxu0 }
 0x291   : > { %v6551_v10 = vpop.f32.mrb[36].mxu0 }
 0x292   : > { %v3567_v52 = vpop.f32.mrb[37].mxu0 }
 0x293   : > { %v6552_v9 = vpop.f32.mrb[38].mxu0 }
 0x294   : > { %v3570_v19 = vpop.f32.mrb[39].mxu0 }
 0x299   : > { %v6555_v42 = vpop.f32.mrb[40].mxu0 }
 0x29a   : > { %v3583_v33 = vpop.f32.mrb[41].mxu0 }
 0x29b   : > { %v6556_v54 = vpop.f32.mrb[42].mxu0 }
 0x29c   : > { %v3586_v45 = vpop.f32.mrb[43].mxu0 }
 0x2a1   : > { %v8654_v48 = vpop.f32.mrb[44].mxu0 }
 0x2a2   : > { %v8656_v58 = vpop.f32.mrb[45].mxu0 }
 0x2a3   : > { %v8658_v53 = vpop.f32.mrb[46].mxu0 }
 0x2a4   : > { %v8660_v43 = vpop.f32.mrb[47].mxu0 }
 0x314   : > { %v6717_v62 = vpop.f32.mrb[16].mxu1 }
 0x315   : > { %v6783_v13 = vadd.f32 %v6717_v62, %v6547_v47  ;;  %v5243_v32 = vpop.f32.mrb[17].mxu1 }
 0x316   : > { %v6784_v14 = vadd.f32 %v5243_v32, %v3551_v16  ;;  %v6718_v4 = vpop.f32.mrb[18].mxu1 }
 0x317   : > { %v5411_v36 = vmul.f32 %v6783_v13, %v8665_v35  ;;  %v6785_v28 = vadd.f32 %v6718_v4, %v6548_v55  ;;  %v5246_v40 = vpop.f32.mrb[19].mxu1 }
 0x318   : > { %v5409_v26 = vmul.f32 %v6784_v14, %v8665_v35  ;;  %v6786_v51 = vadd.f32 %v5246_v40, %v3554_v17 }
 0x319   : > { %v5450_v31 = vadd.f32 %v8670_v29, %v5411_v36  ;;  %v5412_v61 = vmul.f32 %v6785_v28, %v8665_v35 }
 0x31a   : > { %v5448_v59 = vadd.f32 %v8670_v29, %v5409_v26  ;;  %v5410_v5 = vmul.f32 %v6786_v51, %v8665_v35 }
 0x31b   : > { %v5451_v38 = vadd.f32 %v8670_v29, %v5412_v61  ;;  %v5482_v37 = vmax.f32 %v5450_v31, 0.0 }
 0x31c   : > { %v5449_v18 = vadd.f32 %v8670_v29, %v5410_v5  ;;  %v6721_v34 = vpop.f32.mrb[20].mxu1  ;;  %v5480_v63 = vmax.f32 %v5448_v59, 0.0 }
 0x31d   : > { %v5483_v50 = vmax.f32 %v5451_v38, 0.0  ;;  %v6787_v41 = vadd.f32 %v6721_v34, %v6551_v10  ;;  %v5259_v25 = vpop.f32.mrb[21].mxu1 }
 0x31e   : > { %v5481_v0 = vmax.f32 %v5449_v18, 0.0  ;;  %v6788_v30 = vadd.f32 %v5259_v25, %v3567_v52  ;;  %v6722_v21 = vpop.f32.mrb[22].mxu1 }
 0x31f   : > { %v5513_v15 = vpack.c.bf16 %v5483_v50, %v5482_v37  ;;  %v5415_v39 = vmul.f32 %v6787_v41, %v8665_v35  ;;  %v6789_v3 = vadd.f32 %v6722_v21, %v6552_v9  ;;  %v5262_v22 = vpop.f32.mrb[23].mxu1 }
 0x320   : > { %v5512_v7 = vpack.c.bf16 %v5481_v0, %v5480_v63  ;;  %v5413_v47 = vmul.f32 %v6788_v30, %v8665_v35  ;;  %v6790_v16 = vadd.f32 %v5262_v22, %v3570_v19 }
 0x321   : > { %v5454_v55 = vadd.f32 %v8670_v29, %v5415_v39  ;;  %v5416_v17 = vmul.f32 %v6789_v3, %v8665_v35 }
 0x322   : > { %v5452_v10 = vadd.f32 %v8670_v29, %v5413_v47  ;;  %v5414_v62 = vmul.f32 %v6790_v16, %v8665_v35  ;;  %6749 = vmatprep.mubr.msk.bf16.mxu0 %vm1917_vm10, %v5512_v7 }
 0x323   : > { %v5455_v52 = vadd.f32 %v8670_v29, %v5416_v17  ;;  %6750 = vmatmul.mubr.msk.bf16.vlgmr.msra.gmra.mrb[64].mxu0 %vm1917_vm10, %v5513_v15  ;;  %v5486_v32 = vmax.f32 %v5454_v55, 0.0 }
 0x324   : > { %v5453_v9 = vadd.f32 %v8670_v29, %v5414_v62  ;;  %v6725_v13 = vpop.f32.mrb[24].mxu1  ;;  %v5484_v36 = vmax.f32 %v5452_v10, 0.0 }
 0x325   : > { %v5487_v14 = vmax.f32 %v5455_v52, 0.0  ;;  %v6791_v19 = vadd.f32 %v6725_v13, %v6555_v42  ;;  %v5275_v4 = vpop.f32.mrb[25].mxu1 }
 0x326   : > { %v5485_v28 = vmax.f32 %v5453_v9, 0.0  ;;  %v6792_v40 = vadd.f32 %v5275_v4, %v3583_v33  ;;  %v6726_v26 = vpop.f32.mrb[26].mxu1 }
 0x327   : > { %v5515_v51 = vpack.c.bf16 %v5487_v14, %v5486_v32  ;;  %v5419_v31 = vmul.f32 %v6791_v19, %v8665_v35  ;;  %v6793_v61 = vadd.f32 %v6726_v26, %v6556_v54  ;;  %v5278_v59 = vpop.f32.mrb[27].mxu1 }
 0x328   : > { %v5514_v5 = vpack.c.bf16 %v5485_v28, %v5484_v36  ;;  %v5417_v38 = vmul.f32 %v6792_v40, %v8665_v35  ;;  %v6794_v18 = vadd.f32 %v5278_v59, %v3586_v45 }
 0x329   : > { %v5458_v34 = vadd.f32 %v8670_v29, %v5419_v31  ;;  %v5420_v37 = vmul.f32 %v6793_v61, %v8665_v35 }
 0x32a   : > { %v5456_v42 = vadd.f32 %v8670_v29, %v5417_v38  ;;  %v5418_v50 = vmul.f32 %v6794_v18, %v8665_v35  ;;  %6753 = vmatprep.mubr.msk.bf16.mxu0 %vm1917_vm10, %v5514_v5 }
 0x32b   : > { %v5459_v33 = vadd.f32 %v8670_v29, %v5420_v37  ;;  %6754 = vmatmul.mubr.msk.bf16.gmra.mrb[68].mxu0 %vm1917_vm10, %v5515_v51  ;;  %v5490_v25 = vmax.f32 %v5458_v34, 0.0 }
 0x32c   : > { %v5457_v54 = vadd.f32 %v8670_v29, %v5418_v50  ;;  %v6729_v41 = vpop.f32.mrb[28].mxu1  ;;  %v5488_v30 = vmax.f32 %v5456_v42, 0.0 }
 0x32d   : > { %v5491_v63 = vmax.f32 %v5459_v33, 0.0  ;;  %v6795_v45 = vadd.f32 %v6729_v41, %v8654_v48  ;;  %v5291_v0 = vpop.f32.mrb[29].mxu1 }
 0x32e   : > { %v5489_v21 = vmax.f32 %v5457_v54, 0.0  ;;  %v6796_v15 = vadd.f32 %v5291_v0, %v8656_v58  ;;  %v6730_v39 = vpop.f32.mrb[30].mxu1 }
 0x32f   : > { %v5517_v3 = vpack.c.bf16 %v5491_v63, %v5490_v25  ;;  %v5423_v22 = vmul.f32 %v6795_v45, %v8665_v35  ;;  %v6797_v7 = vadd.f32 %v6730_v39, %v8658_v53  ;;  %v5294_v47 = vpop.f32.mrb[31].mxu1 }
 0x330   : > { %v5516_v16 = vpack.c.bf16 %v5489_v21, %v5488_v30  ;;  %v5421_v55 = vmul.f32 %v6796_v15, %v8665_v35  ;;  %v6798_v17 = vadd.f32 %v5294_v47, %v8660_v43 }
 0x331   : > { %v5462_v10 = vadd.f32 %v8670_v29, %v5423_v22  ;;  %v5424_v48 = vmul.f32 %v6797_v7, %v8665_v35 }
 0x332   : > { %v5460_v62 = vadd.f32 %v8670_v29, %v5421_v55  ;;  %v5422_v58 = vmul.f32 %v6798_v17, %v8665_v35  ;;  %6757 = vmatprep.mubr.msk.bf16.mxu0 %vm1917_vm10, %v5516_v16 }
 0x333   : > { %v5463_v52 = vadd.f32 %v8670_v29, %v5424_v48  ;;  %6758 = vmatmul.mubr.msk.bf16.gmra.mrb[72].mxu0 %vm1917_vm10, %v5517_v3  ;;  %v5494_v13 = vmax.f32 %v5462_v10, 0.0 }
 0x334   : > { %v5461_v53 = vadd.f32 %v8670_v29, %v5422_v58  ;;  %v6733_v9 = vpop.f32.mrb[0].mxu1  ;;  %v5492_v19 = vmax.f32 %v5460_v62, 0.0 }
 0x335   : > { %v5495_v32 = vmax.f32 %v5463_v52, 0.0  ;;  %v6799_v43 = vadd.f32 %v6733_v9, %v8615_v1  ;;  %v5307_v14 = vpop.f32.mrb[1].mxu1 }
 0x336   : > { %v5493_v4 = vmax.f32 %v5461_v53, 0.0  ;;  %v6800_v36 = vadd.f32 %v5307_v14, %v8617_v56  ;;  %v6734_v28 = vpop.f32.mrb[2].mxu1 }
 0x337   : > { %v5519_v40 = vpack.c.bf16 %v5495_v32, %v5494_v13  ;;  %v5427_v26 = vmul.f32 %v6799_v43, %v8665_v35  ;;  %v6801_v51 = vadd.f32 %v6734_v28, %v8619_v24  ;;  %v5310_v31 = vpop.f32.mrb[3].mxu1 }
 0x338   : > { %v5518_v61 = vpack.c.bf16 %v5493_v4, %v5492_v19  ;;  %v5425_v59 = vmul.f32 %v6800_v36, %v8665_v35  ;;  %v6802_v5 = vadd.f32 %v5310_v31, %v8621_v44 }
 0x339   : > { %v5466_v38 = vadd.f32 %v8670_v29, %v5427_v26  ;;  %v5428_v1 = vmul.f32 %v6801_v51, %v8665_v35 }
 0x33a   : > { %v5464_v18 = vadd.f32 %v8670_v29, %v5425_v59  ;;  %v5426_v56 = vmul.f32 %v6802_v5, %v8665_v35  ;;  %6761 = vmatprep.mubr.msk.bf16.mxu0 %vm1917_vm10, %v5518_v61 }
 0x33b   : > { %v5467_v34 = vadd.f32 %v8670_v29, %v5428_v1  ;;  %6762 = vmatmul.mubr.msk.bf16.gmra.mrb[76].mxu0 %vm1917_vm10, %v5519_v40  ;;  %v5498_v42 = vmax.f32 %v5466_v38, 0.0 }
 0x33c   : > { %v5465_v24 = vadd.f32 %v8670_v29, %v5426_v56  ;;  %v6737_v37 = vpop.f32.mrb[4].mxu1  ;;  %v5496_v54 = vmax.f32 %v5464_v18, 0.0 }
 0x33d   : > { %v5499_v50 = vmax.f32 %v5467_v34, 0.0  ;;  %v6803_v44 = vadd.f32 %v6737_v37, %v8628_v11  ;;  %v5323_v33 = vpop.f32.mrb[5].mxu1 }
 0x33e   : > { %v5497_v41 = vmax.f32 %v5465_v24, 0.0  ;;  %v6804_v25 = vadd.f32 %v5323_v33, %v8630_v49  ;;  %v6738_v63 = vpop.f32.mrb[6].mxu1 }
 0x33f   : > { %v5521_v45 = vpack.c.bf16 %v5499_v50, %v5498_v42  ;;  %v5431_v0 = vmul.f32 %v6803_v44, %v8665_v35  ;;  %v6805_v30 = vadd.f32 %v6738_v63, %v8632_v20  ;;  %v5326_v21 = vpop.f32.mrb[7].mxu1 }
 0x340   : > { %v5520_v15 = vpack.c.bf16 %v5497_v41, %v5496_v54  ;;  %v5429_v39 = vmul.f32 %v6804_v25, %v8665_v35  ;;  %v6806_v3 = vadd.f32 %v5326_v21, %v8634_v23 }
 0x341   : > { %v5470_v22 = vadd.f32 %v8670_v29, %v5431_v0  ;;  %v5432_v11 = vmul.f32 %v6805_v30, %v8665_v35 }
 0x342   : > { %v5468_v7 = vadd.f32 %v8670_v29, %v5429_v39  ;;  %v5430_v49 = vmul.f32 %v6806_v3, %v8665_v35  ;;  %6765 = vmatprep.mubr.msk.bf16.mxu0 %vm1917_vm10, %v5520_v15 }
 0x343   : > { %v5471_v47 = vadd.f32 %v8670_v29, %v5432_v11  ;;  %6766 = vmatmul.mubr.msk.bf16.gmra.mrb[80].mxu0 %vm1917_vm10, %v5521_v45  ;;  %v5502_v55 = vmax.f32 %v5470_v22, 0.0 }
 0x344   : > { %v5469_v20 = vadd.f32 %v8670_v29, %v5430_v49  ;;  %v6741_v16 = vpop.f32.mrb[8].mxu1  ;;  %v5500_v48 = vmax.f32 %v5468_v7, 0.0 }
 0x345   : > { %v5503_v17 = vmax.f32 %v5471_v47, 0.0  ;;  %v6807_v23 = vadd.f32 %v6741_v16, %v8638_v57  ;;  %v5339_v10 = vpop.f32.mrb[9].mxu1  ;;  %v7061_v47 = vld [vmem:[%s7177_s20 + $0x10] sm:$0xff] }
 0x346   : > { %v5501_v62 = vmax.f32 %v5469_v20, 0.0  ;;  %v6808_v58 = vadd.f32 %v5339_v10, %v8640_v12  ;;  %v6742_v52 = vpop.f32.mrb[10].mxu1 }
 0x347   : > { %v5523_v53 = vpack.c.bf16 %v5503_v17, %v5502_v55  ;;  %v5435_v9 = vmul.f32 %v6807_v23, %v8665_v35  ;;  %v6809_v13 = vadd.f32 %v6742_v52, %v8642_v27  ;;  %v5342_v32 = vpop.f32.mrb[11].mxu1  ;;  %v7062_v55 = vld [vmem:[%s7177_s20] sm:$0xff]  ;;  %v7064_v52 = vld [vmem:[%s7177_s20 + $0x8] sm:$0xff] }
 0x348   : > { %v5522_v43 = vpack.c.bf16 %v5501_v62, %v5500_v48  ;;  %v5433_v14 = vmul.f32 %v6808_v58, %v8665_v35  ;;  %v6810_v19 = vadd.f32 %v5342_v32, %v8644_v46  ;;  %v7063_v48 = vld [vmem:[%s7177_s20 + $0x18] sm:$0xff] }
 0x349   : > { %v5474_v4 = vadd.f32 %v8670_v29, %v5435_v9  ;;  %v5436_v57 = vmul.f32 %v6809_v13, %v8665_v35 }
 0x34a   : > { %v5472_v36 = vadd.f32 %v8670_v29, %v5433_v14  ;;  %v5434_v12 = vmul.f32 %v6810_v19, %v8665_v35  ;;  %6769 = vmatprep.mubr.msk.bf16.mxu0 %vm1917_vm10, %v5522_v43 }
 0x34b   : > { %v5475_v28 = vadd.f32 %v8670_v29, %v5436_v57  ;;  %6770 = vmatmul.mubr.msk.bf16.gmra.mrb[84].mxu0 %vm1917_vm10, %v5523_v53  ;;  %v5506_v26 = vmax.f32 %v5474_v4, 0.0 }
 0x34c   : > { %v5473_v27 = vadd.f32 %v8670_v29, %v5434_v12  ;;  %v6745_v40 = vpop.f32.mrb[12].mxu1  ;;  %v5504_v61 = vmax.f32 %v5472_v36, 0.0 }
 0x34d   : > { %v5507_v51 = vmax.f32 %v5475_v28, 0.0  ;;  %v6811_v46 = vadd.f32 %v6745_v40, %v8646_v8  ;;  %v5355_v31 = vpop.f32.mrb[13].mxu1  ;;  %v7065_v40 = vld [vmem:[%s7177_s20 + $0x30] sm:$0xff] }
 0x34e   : > { %v5505_v59 = vmax.f32 %v5473_v27, 0.0  ;;  %v6812_v5 = vadd.f32 %v5355_v31, %v8648_v60  ;;  %v6746_v38 = vpop.f32.mrb[14].mxu1 }
 0x34f   : > { %v5525_v1 = vpack.c.bf16 %v5507_v51, %v5506_v26  ;;  %v5439_v18 = vmul.f32 %v6811_v46, %v8665_v35  ;;  %v6813_v56 = vadd.f32 %v6746_v38, %v8650_v6  ;;  %v5358_v34 = vpop.f32.mrb[15].mxu1  ;;  %v7066_v46 = vld [vmem:[%s7177_s20 + $0x20] sm:$0xff] }
 0x350   : > { %v5524_v24 = vpack.c.bf16 %v5505_v59, %v5504_v61  ;;  %v5437_v37 = vmul.f32 %v6812_v5, %v8665_v35  ;;  %v6814_v42 = vadd.f32 %v5358_v34, %v8652_v2  ;;  %v7067_v5 = vld [vmem:[%s7177_s20 + $0x38] sm:$0xff] }
 0x351   : > { %v5478_v50 = vadd.f32 %v8670_v29, %v5439_v18  ;;  %v5440_v8 = vmul.f32 %v6813_v56, %v8665_v35  ;;  %v7068_v18 = vld [vmem:[%s7177_s20 + $0x28] sm:$0xff] }
 0x352   : > { %v5476_v44 = vadd.f32 %v8670_v29, %v5437_v37  ;;  %v5438_v60 = vmul.f32 %v6814_v42, %v8665_v35  ;;  %6773 = vmatprep.mubr.msk.bf16.mxu0 %vm1917_vm10, %v5524_v24  ;;  %v8775_v35 = vld [vmem:[%s8960_s8] ss:$0 sm:$0xff] }
 0x353   : > { %v5479_v33 = vadd.f32 %v8670_v29, %v5440_v8  ;;  %6774 = vmatmul.mubr.msk.bf16.gmra.mrb[88].mxu0 %vm1917_vm10, %v5525_v1  ;;  %v5510_v54 = vmax.f32 %v5478_v50, 0.0 }
 0x354   : > { %v5477_v6 = vadd.f32 %v8670_v29, %v5438_v60  ;;  %v5508_v25 = vmax.f32 %v5476_v44, 0.0  ;;  %v8780_v29 = vld [vmem:[%s8961_s9] ss:$0 sm:$0xff] }
 0x355   : > { %v5511_v41 = vmax.f32 %v5479_v33, 0.0 }
 0x356   : > { %v5509_v2 = vmax.f32 %v5477_v6, 0.0 }
 0x357   : > { %v5527_v63 = vpack.c.bf16 %v5511_v41, %v5510_v54 }
 0x358   : > { %v5526_v45 = vpack.c.bf16 %v5509_v2, %v5508_v25  ;;  %v7069_v25 = vld [vmem:[%s7177_s20 + $0x50] sm:$0xff] }
 0x35a   : > { %6777 = vmatprep.mubr.msk.bf16.mxu0 %vm1917_vm10, %v5526_v45  ;;  %v7070_v45 = vld [vmem:[%s7177_s20 + $0x40] sm:$0xff] }
 0x35b   : > { %6778 = vmatmul.mubr.msk.bf16.gmra.mrb[92].mxu0 %vm1917_vm10, %v5527_v63  ;;  %vm9237_vm10 = vcmask 130048  }
 0x35c   : > { %vm9238_vm3 = vmmov %vm9237_vm10 }
 0x35d   : > { %vm9239_vm9 = vmmov %vm9238_vm3 }
 0x35e   : > { %vm9240_vm2 = vmmov %vm9238_vm3 }
 0x35f   : > { %vm9241_vm4 = vmmov %vm9240_vm2 }
 0x360   : > { %vm9242_vm15 = vmmov %vm9240_vm2 }
 0x361   : > { %vm9243_vm5 = vmmov %vm9240_vm2 }
 0x362   : > { %vm9244_vm1 = vmmov %vm9240_vm2 }
 0x363   : > { %vm9245_vm7 = vmmov %vm9244_vm1 }
 0x364   : > { %vm9246_vm13 = vmmov %vm9244_vm1 }
 0x365   : > { %vm9247_vm0 = vmmov %vm9244_vm1 }
 0x366   : > { %vm9248_vm14 = vmmov %vm9247_vm0 }
 0x367   : > { %vm9249_vm6 = vmmov %vm9247_vm0 }
 0x368   : > { %vm9250_vm12 = vmmov %vm9247_vm0 }
 0x369   : > { %vm9251_vm8 = vmmov %vm9247_vm0 }
 0x36a   : > { %vm9252_vm11 = vmmov %vm9247_vm0 }
 0x3f6   : > { %v6751_v0 = vpop.f32.mrb[64].mxu0 }
 0x3f7   : > { %v5750_v30 = vmul.f32 %v6751_v0, %v8775_v35  ;;  %v5614_v21 = vpop.f32.mrb[65].mxu0 }
 0x3f8   : > { %v5748_v15 = vmul.f32 %v8775_v35, %v5614_v21  ;;  %v6752_v39 = vpop.f32.mrb[66].mxu0 }
 0x3f9   : > { %v5789_v3 = vadd.f32 %v8780_v29, %v5750_v30  ;;  %v5751_v22 = vmul.f32 %v6752_v39, %v8775_v35  ;;  %v5617_v11 = vpop.f32.mrb[67].mxu0 }
 0x3fa   : > { %v5787_v7 = vadd.f32 %v8780_v29, %v5748_v15  ;;  %v5749_v49 = vmul.f32 %v8775_v35, %v5617_v11  ;;  %v7071_v15 = vld [vmem:[%s7177_s20 + $0x58] sm:$0xff] }
 0x3fb   : > { %v5821_v20 = vadd.f32 %v7061_v47, %v5789_v3  ;;  %v5790_v16 = vadd.f32 %v8780_v29, %v5751_v22  ;;  %v7072_v22 = vld [vmem:[%s7177_s20 + $0x48] sm:$0xff] }
 0x3fc   : > { %v5819_v17 = vadd.f32 %v7062_v55, %v5787_v7  ;;  %v5788_v23 = vadd.f32 %v8780_v29, %v5749_v49 }
 0x3fd   : > { %v5853_v10 = vmax.f32 %v5821_v20, 0.0  ;;  %v5822_v62 = vadd.f32 %v7063_v48, %v5790_v16 }
 0x3fe   : > { %v5851_v58 = vmax.f32 %v5819_v17, 0.0  ;;  %v5820_v53 = vadd.f32 %v7064_v52, %v5788_v23  ;;  %v6755_v9 = vpop.f32.mrb[68].mxu0  ;;  %v7073_v52 = vld [vmem:[%s7177_s20 + $0x70] sm:$0xff] }
 0x3ff   : > { %5885 = vst.msk [vmem:[%s8795_s23 + $0x10] sm:$0xff] %vm9237_vm10, %v5853_v10  ;;  %v5854_v13 = vmax.f32 %v5822_v62, 0.0  ;;  %v5754_v32 = vmul.f32 %v6755_v9, %v8775_v35  ;;  %v5630_v43 = vpop.f32.mrb[69].mxu0  ;;  %vm9253_vm10 = vmmov %vm9247_vm0 }
 0x400   : > { %5883 = vst.msk [vmem:[%s8795_s23] sm:$0xff] %vm9238_vm3, %v5851_v58  ;;  %v5852_v14 = vmax.f32 %v5820_v53, 0.0  ;;  %v5752_v19 = vmul.f32 %v8775_v35, %v5630_v43  ;;  %v6756_v4 = vpop.f32.mrb[70].mxu0  ;;  %vm9254_vm3 = vmmov %vm9247_vm0 }
 0x401   : > { %5886 = vst.msk [vmem:[%s8795_s23 + $0x18] sm:$0xff] %vm9239_vm9, %v5854_v13  ;;  %v5793_v57 = vadd.f32 %v8780_v29, %v5754_v32  ;;  %v5755_v36 = vmul.f32 %v6756_v4, %v8775_v35  ;;  %v5633_v12 = vpop.f32.mrb[71].mxu0  ;;  %v7074_v13 = vld [vmem:[%s7177_s20 + $0x60] sm:$0xff]  ;;  %vm9255_vm9 = vmmov %vm9247_vm0 }
 0x402   : > { %5884 = vst.msk [vmem:[%s8795_s23 + $0x8] sm:$0xff] %vm9240_vm2, %v5852_v14  ;;  %v5791_v28 = vadd.f32 %v8780_v29, %v5752_v19  ;;  %v5753_v27 = vmul.f32 %v8775_v35, %v5633_v12  ;;  %v7075_v19 = vld [vmem:[%s7177_s20 + $0x78] sm:$0xff]  ;;  %vm9256_vm2 = vmmov %vm9247_vm0 }
 0x403   : > { %v5825_v26 = vadd.f32 %v7065_v40, %v5793_v57  ;;  %v5794_v51 = vadd.f32 %v8780_v29, %v5755_v36  ;;  %v7076_v36 = vld [vmem:[%s7177_s20 + $0x68] sm:$0xff] }
 0x404   : > { %v5823_v31 = vadd.f32 %v7066_v46, %v5791_v28  ;;  %v5792_v61 = vadd.f32 %v8780_v29, %v5753_v27 }
 0x405   : > { %v5857_v59 = vmax.f32 %v5825_v26, 0.0  ;;  %v5826_v38 = vadd.f32 %v7067_v5, %v5794_v51 }
 0x406   : > { %v5855_v1 = vmax.f32 %v5823_v31, 0.0  ;;  %v5824_v56 = vadd.f32 %v7068_v18, %v5792_v61  ;;  %v6759_v34 = vpop.f32.mrb[72].mxu0  ;;  %v7077_v18 = vld [vmem:[%s7177_s20 + $0x90] sm:$0xff] }
 0x407   : > { %5889 = vst.msk [vmem:[%s8795_s23 + $0x30] sm:$0xff] %vm9241_vm4, %v5857_v59  ;;  %v5858_v24 = vmax.f32 %v5826_v38, 0.0  ;;  %v5758_v37 = vmul.f32 %v6759_v34, %v8775_v35  ;;  %v5646_v42 = vpop.f32.mrb[73].mxu0  ;;  %vm9257_vm4 = vmmov %vm9247_vm0 }
 0x408   : > { %5887 = vst.msk [vmem:[%s8795_s23 + $0x20] sm:$0xff] %vm9242_vm15, %v5855_v1  ;;  %v5856_v50 = vmax.f32 %v5824_v56, 0.0  ;;  %v5756_v8 = vmul.f32 %v8775_v35, %v5646_v42  ;;  %v6760_v44 = vpop.f32.mrb[74].mxu0  ;;  %vm9258_vm15 = vmmov %vm9247_vm0 }
 0x409   : > { %5890 = vst.msk [vmem:[%s8795_s23 + $0x38] sm:$0xff] %vm9243_vm5, %v5858_v24  ;;  %v5797_v60 = vadd.f32 %v8780_v29, %v5758_v37  ;;  %v5759_v33 = vmul.f32 %v6760_v44, %v8775_v35  ;;  %v5649_v6 = vpop.f32.mrb[75].mxu0  ;;  %v7078_v24 = vld [vmem:[%s7177_s20 + $0x80] sm:$0xff]  ;;  %vm9259_vm5 = vmmov %vm9247_vm0 }
 0x40a   : > { %5888 = vst.msk [vmem:[%s8795_s23 + $0x28] sm:$0xff] %vm9244_vm1, %v5856_v50  ;;  %v5795_v54 = vadd.f32 %v8780_v29, %v5756_v8  ;;  %v5757_v41 = vmul.f32 %v8775_v35, %v5649_v6  ;;  %v7079_v8 = vld [vmem:[%s7177_s20 + $0x98] sm:$0xff]  ;;  %vm9260_vm1 = vmmov %vm9247_vm0 }
 0x40b   : > { %v5829_v2 = vadd.f32 %v7069_v25, %v5797_v60  ;;  %v5798_v63 = vadd.f32 %v8780_v29, %v5759_v33  ;;  %v7080_v33 = vld [vmem:[%s7177_s20 + $0x88] sm:$0xff] }
 0x40c   : > { %v5827_v0 = vadd.f32 %v7070_v45, %v5795_v54  ;;  %v5796_v30 = vadd.f32 %v8780_v29, %v5757_v41 }
 0x40d   : > { %v5861_v21 = vmax.f32 %v5829_v2, 0.0  ;;  %v5830_v39 = vadd.f32 %v7071_v15, %v5798_v63 }
 0x40e   : > { %v5859_v3 = vmax.f32 %v5827_v0, 0.0  ;;  %v5828_v11 = vadd.f32 %v7072_v22, %v5796_v30  ;;  %v6763_v7 = vpop.f32.mrb[76].mxu0  ;;  %v7081_v22 = vld [vmem:[%s7177_s20 + $0xb0] sm:$0xff] }
 0x40f   : > { %5893 = vst.msk [vmem:[%s8795_s23 + $0x50] sm:$0xff] %vm9245_vm7, %v5861_v21  ;;  %v5862_v49 = vmax.f32 %v5830_v39, 0.0  ;;  %v5762_v47 = vmul.f32 %v6763_v7, %v8775_v35  ;;  %v5662_v20 = vpop.f32.mrb[77].mxu0  ;;  %vm9261_vm7 = vmmov %vm9247_vm0 }
 0x410   : > { %5891 = vst.msk [vmem:[%s8795_s23 + $0x40] sm:$0xff] %vm9246_vm13, %v5859_v3  ;;  %v5860_v16 = vmax.f32 %v5828_v11, 0.0  ;;  %v5760_v55 = vmul.f32 %v8775_v35, %v5662_v20  ;;  %v6764_v17 = vpop.f32.mrb[78].mxu0  ;;  %vm9262_vm13 = vmmov %vm9247_vm0 }
 0x411   : > { %5894 = vst.msk [vmem:[%s8795_s23 + $0x58] sm:$0xff] %vm9247_vm0, %v5862_v49  ;;  %v5801_v23 = vadd.f32 %v8780_v29, %v5762_v47  ;;  %v5763_v10 = vmul.f32 %v6764_v17, %v8775_v35  ;;  %v5665_v48 = vpop.f32.mrb[79].mxu0  ;;  %v7082_v49 = vld [vmem:[%s7177_s20 + $0xa0] sm:$0xff] }
 0x412   : > { %5892 = vst.msk [vmem:[%s8795_s23 + $0x48] sm:$0xff] %vm9248_vm14, %v5860_v16  ;;  %v5799_v62 = vadd.f32 %v8780_v29, %v5760_v55  ;;  %v5761_v58 = vmul.f32 %v8775_v35, %v5665_v48  ;;  %v7083_v55 = vld [vmem:[%s7177_s20 + $0xb8] sm:$0xff]  ;;  %vm9263_vm14 = vmmov %vm9247_vm0 }
 0x413   : > { %v5833_v53 = vadd.f32 %v7073_v52, %v5801_v23  ;;  %v5802_v9 = vadd.f32 %v8780_v29, %v5763_v10  ;;  %v7084_v10 = vld [vmem:[%s7177_s20 + $0xa8] sm:$0xff] }
 0x414   : > { %v5831_v32 = vadd.f32 %v7074_v13, %v5799_v62  ;;  %v5800_v43 = vadd.f32 %v8780_v29, %v5761_v58 }
 0x415   : > { %v5865_v14 = vmax.f32 %v5833_v53, 0.0  ;;  %v5834_v4 = vadd.f32 %v7075_v19, %v5802_v9 }
 0x416   : > { %v5863_v57 = vmax.f32 %v5831_v32, 0.0  ;;  %v5832_v12 = vadd.f32 %v7076_v36, %v5800_v43  ;;  %v6767_v28 = vpop.f32.mrb[80].mxu0  ;;  %v7085_v36 = vld [vmem:[%s7177_s20 + $0xd0] sm:$0xff] }
 0x417   : > { %5897 = vst.msk [vmem:[%s8795_s23 + $0x70] sm:$0xff] %vm9249_vm6, %v5865_v14  ;;  %v5866_v27 = vmax.f32 %v5834_v4, 0.0  ;;  %v5766_v40 = vmul.f32 %v6767_v28, %v8775_v35  ;;  %v5678_v26 = vpop.f32.mrb[81].mxu0  ;;  %vm9264_vm6 = vmmov %vm9247_vm0 }
 0x418   : > { %5895 = vst.msk [vmem:[%s8795_s23 + $0x60] sm:$0xff] %vm9250_vm12, %v5863_v57  ;;  %v5864_v51 = vmax.f32 %v5832_v12, 0.0  ;;  %v5764_v46 = vmul.f32 %v8775_v35, %v5678_v26  ;;  %v6768_v31 = vpop.f32.mrb[82].mxu0  ;;  %vm9265_vm12 = vmmov %vm9247_vm0 }
 0x419   : > { %5898 = vst.msk [vmem:[%s8795_s23 + $0x78] sm:$0xff] %vm9251_vm8, %v5866_v27  ;;  %v5805_v61 = vadd.f32 %v8780_v29, %v5766_v40  ;;  %v5767_v59 = vmul.f32 %v6768_v31, %v8775_v35  ;;  %v5681_v5 = vpop.f32.mrb[83].mxu0  ;;  %v7086_v27 = vld [vmem:[%s7177_s20 + $0xc0] sm:$0xff]  ;;  %vm9266_vm8 = vmmov %vm9247_vm0 }
 0x41a   : > { %5896 = vst.msk [vmem:[%s8795_s23 + $0x68] sm:$0xff] %vm9252_vm11, %v5864_v51  ;;  %v5803_v38 = vadd.f32 %v8780_v29, %v5764_v46  ;;  %v5765_v1 = vmul.f32 %v8775_v35, %v5681_v5  ;;  %v7087_v46 = vld [vmem:[%s7177_s20 + $0xd8] sm:$0xff]  ;;  %vm9267_vm11 = vmmov %vm9247_vm0 }
 0x41b   : > { %v5837_v56 = vadd.f32 %v7077_v18, %v5805_v61  ;;  %v5806_v34 = vadd.f32 %v8780_v29, %v5767_v59  ;;  %v7088_v59 = vld [vmem:[%s7177_s20 + $0xc8] sm:$0xff] }
 0x41c   : > { %v5835_v37 = vadd.f32 %v7078_v24, %v5803_v38  ;;  %v5804_v42 = vadd.f32 %v8780_v29, %v5765_v1 }
 0x41d   : > { %v5869_v50 = vmax.f32 %v5837_v56, 0.0  ;;  %v5838_v44 = vadd.f32 %v7079_v8, %v5806_v34 }
 0x41e   : > { %v5867_v60 = vmax.f32 %v5835_v37, 0.0  ;;  %v5836_v6 = vadd.f32 %v7080_v33, %v5804_v42  ;;  %v6771_v54 = vpop.f32.mrb[84].mxu0  ;;  %v7089_v33 = vld [vmem:[%s7177_s20 + $0xf0] sm:$0xff] }
 0x41f   : > { %5901 = vst.msk [vmem:[%s8795_s23 + $0x90] sm:$0xff] %vm9253_vm10, %v5869_v50  ;;  %v5870_v41 = vmax.f32 %v5838_v44, 0.0  ;;  %v5770_v25 = vmul.f32 %v6771_v54, %v8775_v35  ;;  %v5694_v2 = vpop.f32.mrb[85].mxu0 }
 0x420   : > { %5899 = vst.msk [vmem:[%s8795_s23 + $0x80] sm:$0xff] %vm9254_vm3, %v5867_v60  ;;  %v5868_v63 = vmax.f32 %v5836_v6, 0.0  ;;  %v5768_v45 = vmul.f32 %v8775_v35, %v5694_v2  ;;  %v6772_v0 = vpop.f32.mrb[86].mxu0 }
 0x421   : > { %5902 = vst.msk [vmem:[%s8795_s23 + $0x98] sm:$0xff] %vm9255_vm9, %v5870_v41  ;;  %v5809_v30 = vadd.f32 %v8780_v29, %v5770_v25  ;;  %v5771_v21 = vmul.f32 %v6772_v0, %v8775_v35  ;;  %v5697_v15 = vpop.f32.mrb[87].mxu0  ;;  %v7090_v41 = vld [vmem:[%s7177_s20 + $0xe0] sm:$0xff] }
 0x422   : > { %5900 = vst.msk [vmem:[%s8795_s23 + $0x88] sm:$0xff] %vm9256_vm2, %v5868_v63  ;;  %v5807_v39 = vadd.f32 %v8780_v29, %v5768_v45  ;;  %v5769_v3 = vmul.f32 %v8775_v35, %v5697_v15  ;;  %v7091_v45 = vld [vmem:[%s7177_s20 + $0xf8] sm:$0xff] }
 0x423   : > { %v5841_v11 = vadd.f32 %v7081_v22, %v5809_v30  ;;  %v5810_v7 = vadd.f32 %v8780_v29, %v5771_v21  ;;  %v7092_v21 = vld [vmem:[%s7177_s20 + $0xe8] sm:$0xff] }
 0x424   : > { %v5839_v47 = vadd.f32 %v7082_v49, %v5807_v39  ;;  %v5808_v20 = vadd.f32 %v8780_v29, %v5769_v3 }
 0x425   : > { %v5873_v16 = vmax.f32 %v5841_v11, 0.0  ;;  %v5842_v17 = vadd.f32 %v7083_v55, %v5810_v7 }
 0x426   : > { %v5871_v23 = vmax.f32 %v5839_v47, 0.0  ;;  %v5840_v48 = vadd.f32 %v7084_v10, %v5808_v20  ;;  %v6775_v62 = vpop.f32.mrb[88].mxu0 }
 0x427   : > { %5905 = vst.msk [vmem:[%s8795_s23 + $0xb0] sm:$0xff] %vm9257_vm4, %v5873_v16  ;;  %v5874_v58 = vmax.f32 %v5842_v17, 0.0  ;;  %v5774_v52 = vmul.f32 %v6775_v62, %v8775_v35  ;;  %v5710_v53 = vpop.f32.mrb[89].mxu0 }
 0x428   : > { %5903 = vst.msk [vmem:[%s8795_s23 + $0xa0] sm:$0xff] %vm9258_vm15, %v5871_v23  ;;  %v5872_v9 = vmax.f32 %v5840_v48, 0.0  ;;  %v5772_v13 = vmul.f32 %v8775_v35, %v5710_v53  ;;  %v6776_v32 = vpop.f32.mrb[90].mxu0 }
 0x429   : > { %5906 = vst.msk [vmem:[%s8795_s23 + $0xb8] sm:$0xff] %vm9259_vm5, %v5874_v58  ;;  %v5813_v43 = vadd.f32 %v8780_v29, %v5774_v52  ;;  %v5775_v14 = vmul.f32 %v6776_v32, %v8775_v35  ;;  %v5713_v19 = vpop.f32.mrb[91].mxu0 }
 0x42a   : > { %5904 = vst.msk [vmem:[%s8795_s23 + $0xa8] sm:$0xff] %vm9260_vm1, %v5872_v9  ;;  %v5811_v4 = vadd.f32 %v8780_v29, %v5772_v13  ;;  %v5773_v57 = vmul.f32 %v8775_v35, %v5713_v19 }
 0x42b   : > { %v5845_v12 = vadd.f32 %v7085_v36, %v5813_v43  ;;  %v5814_v28 = vadd.f32 %v8780_v29, %v5775_v14 }
 0x42c   : > { %v5843_v40 = vadd.f32 %v7086_v27, %v5811_v4  ;;  %v5812_v26 = vadd.f32 %v8780_v29, %v5773_v57 }
 0x42d   : > { %v5877_v51 = vmax.f32 %v5845_v12, 0.0  ;;  %v5846_v31 = vadd.f32 %v7087_v46, %v5814_v28 }
 0x42e   : > { %v5875_v61 = vmax.f32 %v5843_v40, 0.0  ;;  %v5844_v5 = vadd.f32 %v7088_v59, %v5812_v26  ;;  %v6779_v38 = vpop.f32.mrb[92].mxu0 }
 0x42f   : > { %5909 = vst.msk [vmem:[%s8795_s23 + $0xd0] sm:$0xff] %vm9261_vm7, %v5877_v51  ;;  %v5878_v1 = vmax.f32 %v5846_v31, 0.0  ;;  %v5778_v18 = vmul.f32 %v6779_v38, %v8775_v35  ;;  %v5726_v56 = vpop.f32.mrb[93].mxu0 }
 0x430   : > { %5907 = vst.msk [vmem:[%s8795_s23 + $0xc0] sm:$0xff] %vm9262_vm13, %v5875_v61  ;;  %v5876_v34 = vmax.f32 %v5844_v5, 0.0  ;;  %v5776_v24 = vmul.f32 %v8775_v35, %v5726_v56  ;;  %v6780_v37 = vpop.f32.mrb[94].mxu0 }
 0x431   : > { %5910 = vst.msk [vmem:[%s8795_s23 + $0xd8] sm:$0xff] %vm9247_vm0, %v5878_v1  ;;  %v5817_v42 = vadd.f32 %v8780_v29, %v5778_v18  ;;  %v5779_v50 = vmul.f32 %v6780_v37, %v8775_v35  ;;  %v5729_v8 = vpop.f32.mrb[95].mxu0 }
 0x432   : > { %5908 = vst.msk [vmem:[%s8795_s23 + $0xc8] sm:$0xff] %vm9263_vm14, %v5876_v34  ;;  %v5815_v44 = vadd.f32 %v8780_v29, %v5776_v24  ;;  %v5777_v60 = vmul.f32 %v8775_v35, %v5729_v8 }
 0x433   : > { %v5849_v6 = vadd.f32 %v7089_v33, %v5817_v42  ;;  %v5818_v54 = vadd.f32 %v8780_v29, %v5779_v50 }
 0x434   : > { %v5847_v25 = vadd.f32 %v7090_v41, %v5815_v44  ;;  %v5816_v2 = vadd.f32 %v8780_v29, %v5777_v60 }
 0x435   : > { %v5881_v63 = vmax.f32 %v5849_v6, 0.0  ;;  %v5850_v0 = vadd.f32 %v7091_v45, %v5818_v54 }
 0x436   : > { %v5879_v30 = vmax.f32 %v5847_v25, 0.0  ;;  %v5848_v15 = vadd.f32 %v7092_v21, %v5816_v2 }
 0x437   : > { %5913 = vst.msk [vmem:[%s8795_s23 + $0xf0] sm:$0xff] %vm9264_vm6, %v5881_v63  ;;  %v5882_v39 = vmax.f32 %v5850_v0, 0.0 }
 0x438   : > { %5911 = vst.msk [vmem:[%s8795_s23 + $0xe0] sm:$0xff] %vm9265_vm12, %v5879_v30  ;;  %v5880_v35 = vmax.f32 %v5848_v15, 0.0 }
 0x439   : > { %5914 = vst.msk [vmem:[%s8795_s23 + $0xf8] sm:$0xff] %vm9266_vm8, %v5882_v39 }
 0x43a   : > { %5912 = vst.msk [vmem:[%s8795_s23 + $0xe8] sm:$0xff] %vm9267_vm11, %v5880_v35 }
 0x43b PF: > { %s20_s13 = sadd.s32 1, %s7099_s13  }
 0x43c   : > { %p17_p4 = scmp.ge.s32.totalorder %s20_s13, 4  }
 0x43e   :  { %19 = sbr.rel (!%p17_p4) target bundleno = 1 (0x1), region = 98 }

</bundles_post_ra>
